<compile_context>
chip_gen: v7x
topology: tpu7x:2x2x1
jax: 0.10.0
libtpu: 0.0.40
codegen_flags: <defaults>
</compile_context>

<pallas_src>
import jax
import jax.numpy as jnp
import numpy as np
from jax.experimental import pallas as pl
from jax.experimental.pallas import tpu as pltpu

_VMEM_LIMIT = 32 * 1024 * 1024   # safe on v5e / v6e / v7x


def _round_up(x, m):
    return ((x + m - 1) // m) * m


def _pick_tm(m):
    # Large M tiles (512 rows) amortize the ~0.35us per-grid-step overhead.
    if m >= 512:
        return 512
    return _round_up(m, 8)


# ----------------------------------------------------------------------------
# Pallas kernels
# ----------------------------------------------------------------------------
def _gemm_stats_kernel(a_ref, b_ref, o_ref, s_ref):
    """One (tm, K) x (K, Cp) GEMM tile; epilogue emits per-channel sum/sumsq."""
    y = jnp.dot(a_ref[...], b_ref[...], preferred_element_type=jnp.float32)
    o_ref[...] = y
    s_ref[0:1, :] = jnp.sum(y, axis=0, keepdims=True)
    s_ref[1:2, :] = jnp.sum(y * y, axis=0, keepdims=True)


def batched_gemm_stats(cols, wmat, tm):
    """cols: (P, Mp, K), wmat: (P, K, Cp) -> y (P, Mp, Cp), stats (P, nm, 2, Cp)."""
    p_dim, mp, k = cols.shape
    cp = wmat.shape[2]
    nm = mp // tm
    return pl.pallas_call(
        _gemm_stats_kernel,
        out_shape=(jax.ShapeDtypeStruct((p_dim, mp, cp), jnp.float32),
                   jax.ShapeDtypeStruct((p_dim, nm, 2, cp), jnp.float32)),
        grid=(p_dim, nm),
        in_specs=[pl.BlockSpec((None, tm, k), lambda p, i: (p, i, 0)),
                  pl.BlockSpec((None, k, cp), lambda p, i: (p, 0, 0))],
        out_specs=(pl.BlockSpec((None, tm, cp), lambda p, i: (p, i, 0)),
                   pl.BlockSpec((None, None, 2, cp), lambda p, i: (p, i, 0, 0))),
        compiler_params=pltpu.CompilerParams(
            dimension_semantics=("parallel", "parallel"),
            vmem_limit_bytes=_VMEM_LIMIT),
    )(cols, wmat)


def _gemm_tanh_kernel(a_ref, b_ref, o_ref):
    y = jnp.dot(a_ref[...], b_ref[...], preferred_element_type=jnp.float32)
    o_ref[...] = jnp.tanh(y)


def batched_gemm_tanh(cols, wmat, tm):
    p_dim, mp, k = cols.shape
    cp = wmat.shape[2]
    nm = mp // tm
    return pl.pallas_call(
        _gemm_tanh_kernel,
        out_shape=jax.ShapeDtypeStruct((p_dim, mp, cp), jnp.float32),
        grid=(p_dim, nm),
        in_specs=[pl.BlockSpec((None, tm, k), lambda p, i: (p, i, 0)),
                  pl.BlockSpec((None, k, cp), lambda p, i: (p, 0, 0))],
        out_specs=pl.BlockSpec((None, tm, cp), lambda p, i: (p, i, 0)),
        compiler_params=pltpu.CompilerParams(
            dimension_semantics=("parallel", "parallel"),
            vmem_limit_bytes=_VMEM_LIMIT),
    )(cols, wmat)


def _bn_apply_kernel(y_ref, sc_ref, sh_ref, o_ref):
    o_ref[...] = jnp.maximum(y_ref[...] * sc_ref[...] + sh_ref[...], 0.0)


def bn_relu_apply(y, scale, shift, tm):
    p_dim, mp, cp = y.shape
    nm = mp // tm
    return pl.pallas_call(
        _bn_apply_kernel,
        out_shape=jax.ShapeDtypeStruct((p_dim, mp, cp), jnp.float32),
        grid=(p_dim, nm),
        in_specs=[pl.BlockSpec((None, tm, cp), lambda p, i: (p, i, 0)),
                  pl.BlockSpec((1, cp), lambda p, i: (0, 0)),
                  pl.BlockSpec((1, cp), lambda p, i: (0, 0))],
        out_specs=pl.BlockSpec((None, tm, cp), lambda p, i: (p, i, 0)),
        compiler_params=pltpu.CompilerParams(
            dimension_semantics=("parallel", "parallel"),
            vmem_limit_bytes=_VMEM_LIMIT),
    )(y, scale, shift)


# ----------------------------------------------------------------------------
# XLA glue: phase im2col, BN scale/shift, weight prep
# ----------------------------------------------------------------------------
# TODO(synk): the 2x2 patch extraction / phase interleave / padding below stay
# as XLA glue; a pure-Pallas gather variant would need manual DMA scatter.
def _phase_cols(h):
    """NHWC h -> (4 phases, N*H*W, 4*C) 2x2-window im2col (no zero dilation)."""
    n, hgt, wid, c = h.shape
    hp = jnp.pad(h, ((0, 0), (1, 1), (1, 1), (0, 0)))
    cols = []
    for py in (0, 1):
        for px in (0, 1):
            taps = [hp[:, py + a:py + a + hgt, px + b:px + b + wid, :]
                    for a in (0, 1) for b in (0, 1)]
            patch = jnp.stack(taps, axis=3)            # (N, H, W, 4, C)
            cols.append(patch.reshape(n * hgt * wid, 4 * c))
    return jnp.stack(cols, axis=0)                     # (4, N*H*W, 4*C)


def _bn_scale_shift(stats, gamma_p, beta_p, n_rows):
    """Reduce per-tile partials -> per-channel affine (training-mode BN)."""
    s = jnp.sum(stats, axis=(0, 1))                    # (2, Cp)
    mean = s[0] * (1.0 / n_rows)
    var = jnp.maximum(s[1] * (1.0 / n_rows) - mean * mean, 0.0)  # biased
    inv = jax.lax.rsqrt(var + 1e-5)
    scale = gamma_p * inv
    shift = beta_p - mean * scale
    return scale.reshape(1, -1), shift.reshape(1, -1)


_TAPS = ((3, 1), (2, 0))   # kernel-row taps for even / odd output phase


def _phase_weight_mats(w, c_pad):
    """Torch ConvTranspose2d weight (C_in, C_out, 4, 4) -> (4, 4*C_in, Cp)."""
    c_in, c_out = w.shape[0], w.shape[1]
    mats = []
    for py in (0, 1):
        for px in (0, 1):
            sel = w[:, :, np.array(_TAPS[py]), :][:, :, :, np.array(_TAPS[px])]
            # (C_in, C_out, 2, 2) -> (a, b, ci, co) -> (4*C_in, C_out)
            mats.append(sel.transpose(2, 3, 0, 1).reshape(4 * c_in, c_out))
    wm = jnp.stack(mats, axis=0)
    return jnp.pad(wm, ((0, 0), (0, 0), (0, c_pad - c_out)))


def _conv1_weight_mats(w, c_pad):
    """(nz, C_out, 4, 4) -> (16 spatial slots, nz, Cp)."""
    nz, c_out = w.shape[0], w.shape[1]
    wm = w.transpose(2, 3, 0, 1).reshape(16, nz, c_out)
    return jnp.pad(wm, ((0, 0), (0, 0), (0, c_pad - c_out)))


def prepare_params(params):
    """Hoist weight reshaping / lane padding out of the per-call path."""
    (w1, g1, b1), (w2, g2, b2), (w3, g3, b3), (w4, g4, b4), w5 = params

    def pad_vec(v, cp):
        return jnp.pad(v, (0, cp - v.shape[0]))

    cs = (w1.shape[1], w2.shape[1], w3.shape[1], w4.shape[1], w5.shape[1])
    cps = tuple(_round_up(c, 128) for c in cs)
    return dict(
        l1=dict(w=_conv1_weight_mats(w1, cps[0]),
                g=pad_vec(g1, cps[0]), b=pad_vec(b1, cps[0]), c=cs[0]),
        l2=dict(w=_phase_weight_mats(w2, cps[1]),
                g=pad_vec(g2, cps[1]), b=pad_vec(b2, cps[1]), c=cs[1]),
        l3=dict(w=_phase_weight_mats(w3, cps[2]),
                g=pad_vec(g3, cps[2]), b=pad_vec(b3, cps[2]), c=cs[2]),
        l4=dict(w=_phase_weight_mats(w4, cps[3]),
                g=pad_vec(g4, cps[3]), b=pad_vec(b4, cps[3]), c=cs[3]),
        l5=dict(w=_phase_weight_mats(w5, cps[4]), c=cs[4]),
    )


# ----------------------------------------------------------------------------
# Layers
# ----------------------------------------------------------------------------
def _conv1_bn_relu(x, layer):
    """ConvT(nz->C, 4, 1, 0) on 1x1 input + BN + ReLU; NHWC (N, 4, 4, C)."""
    n, nz = x.shape[0], x.shape[1]
    x2 = x.reshape(n, nz)
    mp = _round_up(n, 8)
    if mp != n:
        x2 = jnp.pad(x2, ((0, mp - n), (0, 0)))
    cols = jnp.broadcast_to(x2[None], (16, mp, nz))    # one slot per (ky,kx)
    y, stats = batched_gemm_stats(cols, layer["w"], mp)
    scale, shift = _bn_scale_shift(stats, layer["g"], layer["b"],
                                   float(16 * n))
    y = bn_relu_apply(y, scale, shift, mp)
    c = layer["c"]
    return y[:, :n, :c].reshape(4, 4, n, c).transpose(2, 0, 1, 3)


def _convT_bn_relu(h, layer):
    """ConvT(C_in->C_out, 4, 2, 1) + BN + ReLU via 4-phase decomposition."""
    n, hgt, wid, _ = h.shape
    m = n * hgt * wid
    tm = _pick_tm(m)
    mp = _round_up(m, tm)
    cols = _phase_cols(h)
    if mp != m:
        cols = jnp.pad(cols, ((0, 0), (0, mp - m), (0, 0)))
    y, stats = batched_gemm_stats(cols, layer["w"], tm)
    scale, shift = _bn_scale_shift(stats, layer["g"], layer["b"], float(4 * m))
    y = bn_relu_apply(y, scale, shift, tm)
    c = layer["c"]
    y = y[:, :m, :c].reshape(2, 2, n, hgt, wid, c)
    return y.transpose(2, 3, 0, 4, 1, 5).reshape(n, 2 * hgt, 2 * wid, c)


def _convT_tanh(h, layer):
    """Last layer: ConvT(C_in->nc, 4, 2, 1) with tanh fused in the GEMM."""
    n, hgt, wid, _ = h.shape
    m = n * hgt * wid
    tm = _pick_tm(m)
    mp = _round_up(m, tm)
    cols = _phase_cols(h)
    if mp != m:
        cols = jnp.pad(cols, ((0, 0), (0, mp - m), (0, 0)))
    y = batched_gemm_tanh(cols, layer["w"], tm)
    c = layer["c"]
    y = y[:, :m, :c].reshape(2, 2, n, hgt, wid, c)
    return y.transpose(2, 3, 0, 4, 1, 5).reshape(n, 2 * hgt, 2 * wid, c)


def generator_forward(x, prepped):
    h = _conv1_bn_relu(x, prepped["l1"])      # (N,  4,  4, 8*ngf)
    h = _convT_bn_relu(h, prepped["l2"])      # (N,  8,  8, 4*ngf)
    h = _convT_bn_relu(h, prepped["l3"])      # (N, 16, 16, 2*ngf)
    h = _convT_bn_relu(h, prepped["l4"])      # (N, 32, 32,   ngf)
    h = _convT_tanh(h, prepped["l5"])         # (N, 64, 64,    nc)
    return h.transpose(0, 3, 1, 2)            # NCHW, to match PyTorch


# ----------------------------------------------------------------------------
# Pure-JAX reference (for correctness check)
# ----------------------------------------------------------------------------
def _ref_convT(x, w, stride, padding):
    k = w.shape[2]
    w_conv = jnp.flip(w, (2, 3)).transpose(1, 0, 2, 3)   # (C_out, C_in, k, k)
    return jax.lax.conv_general_dilated(
        x, w_conv, window_strides=(1, 1),
        padding=[(k - 1 - padding,) * 2] * 2,
        lhs_dilation=(stride, stride),
        dimension_numbers=("NCHW", "OIHW", "NCHW"))


def _ref_bn_relu(x, g, b):
    mean = x.mean(axis=(0, 2, 3), keepdims=True)
    var = x.var(axis=(0, 2, 3), keepdims=True)           # biased (training BN)
    y = (x - mean) / jnp.sqrt(var + 1e-5)
    y = y * g.reshape(1, -1, 1, 1) + b.reshape(1, -1, 1, 1)
    return jnp.maximum(y, 0.0)


def generator_reference(x, params):
    (w1, g1, b1), (w2, g2, b2), (w3, g3, b3), (w4, g4, b4), w5 = params
    h = _ref_bn_relu(_ref_convT(x, w1, 1, 0), g1, b1)
    h = _ref_bn_relu(_ref_convT(h, w2, 2, 1), g2, b2)
    h = _ref_bn_relu(_ref_convT(h, w3, 2, 1), g3, b3)
    h = _ref_bn_relu(_ref_convT(h, w4, 2, 1), g4, b4)
    return jnp.tanh(_ref_convT(h, w5, 2, 1))


# ----------------------------------------------------------------------------
# Parameter init (deterministic kaiming-like normals; BN gamma ~ N(1, 0.02))
# ----------------------------------------------------------------------------
def init_params(key, nz, ngf, nc):
    def convT_w(k, c_in, c_out):
        fan_in = c_out * 4 * 4
        std = np.sqrt(2.0 / fan_in)
        return jax.random.normal(k, (c_in, c_out, 4, 4), jnp.float32) * std

    def bn(k, c):
        g = 1.0 + 0.02 * jax.random.normal(k, (c,), jnp.float32)
        b = jnp.zeros((c,), jnp.float32)
        return g, b

    ks = jax.random.split(key, 9)
    w1 = convT_w(ks[0], nz, ngf * 8);      g1, b1 = bn(ks[1], ngf * 8)
    w2 = convT_w(ks[2], ngf * 8, ngf * 4); g2, b2 = bn(ks[3], ngf * 4)
    w3 = convT_w(ks[4], ngf * 4, ngf * 2); g3, b3 = bn(ks[5], ngf * 2)
    w4 = convT_w(ks[6], ngf * 2, ngf);     g4, b4 = bn(ks[7], ngf)
    w5 = convT_w(ks[8], ngf, nc)
    return ((w1, g1, b1), (w2, g2, b2), (w3, g3, b3), (w4, g4, b4), w5)


if __name__ == "__main__":
    nz, ngf, nc = 16, 8, 3
    batch = 2

    key = jax.random.PRNGKey(0)
    k_in, k_par = jax.random.split(key)
    x = jax.random.normal(k_in, (batch, nz, 1, 1), jnp.float32)
    params = init_params(k_par, nz, ngf, nc)

    prepped = prepare_params(params)            # one-time weight prep (eager)
    fwd = jax.jit(lambda inp: generator_forward(inp, prepped))

    out = jax.block_until_ready(fwd(x))
    assert out.shape == (batch, nc, 64, 64), out.shape

    ref = jax.block_until_ready(generator_reference(x, params))
    np.testing.assert_allclose(np.asarray(out), np.asarray(ref),
                               rtol=1e-2, atol=1e-2)

    print("KERNEL_OK")
</pallas_src>

<mosaic_0001>
module attributes {stable_mosaic.version = 11 : i64} {
  func.func @_gemm_stats_kernel(%arg0: i32, %arg1: i32, %arg2: memref<1x8x16xf32, #tpu.memory_space<vmem>>, %arg3: memref<1x16x128xf32, #tpu.memory_space<vmem>>, %arg4: memref<1x8x128xf32, #tpu.memory_space<vmem>>, %arg5: memref<1x1x2x128xf32, #tpu.memory_space<vmem>>) attributes {dimension_semantics = [#tpu.dimension_semantics<parallel>, #tpu.dimension_semantics<parallel>], iteration_bounds = array<i64: 16, 1>, scalar_prefetch = 0 : i64, scratch_operands = 0 : i64, tpu.core_type = #tpu.core_type<tc>, window_params = [{transform_indices = @transform_0, window_bounds = array<i64: 1, 8, 16>}, {transform_indices = @transform_1, window_bounds = array<i64: 1, 16, 128>}, {transform_indices = @transform_2, window_bounds = array<i64: 1, 8, 128>}, {transform_indices = @transform_3, window_bounds = array<i64: 1, 1, 2, 128>}]} {
    %c0 = arith.constant 0 : index
    %c0_0 = arith.constant 0 : index
    %c0_1 = arith.constant 0 : index
    %0 = vector.load %arg2[%c0, %c0_0, %c0_1] : memref<1x8x16xf32, #tpu.memory_space<vmem>>, vector<1x8x16xf32>
    %1 = vector.shape_cast %0 : vector<1x8x16xf32> to vector<8x16xf32>
    %c0_2 = arith.constant 0 : index
    %c0_3 = arith.constant 0 : index
    %c0_4 = arith.constant 0 : index
    %2 = vector.load %arg3[%c0_2, %c0_3, %c0_4] : memref<1x16x128xf32, #tpu.memory_space<vmem>>, vector<1x16x128xf32>
    %3 = vector.shape_cast %2 : vector<1x16x128xf32> to vector<16x128xf32>
    %cst = arith.constant dense<0.000000e+00> : vector<8x128xf32>
    %4 = tpu.matmul %1, %3, %cst {dimension_numbers = #tpu.dot_dimension_numbers<[1], [0], [0], [1], [0, 0, 1, 1], [], []>} : vector<8x16xf32>, vector<16x128xf32>, vector<8x128xf32> -> vector<8x128xf32>
    %c0_5 = arith.constant 0 : index
    %c0_6 = arith.constant 0 : index
    %c0_7 = arith.constant 0 : index
    %5 = vector.load %arg4[%c0_5, %c0_6, %c0_7] : memref<1x8x128xf32, #tpu.memory_space<vmem>>, vector<1x8x128xf32>
    %6 = vector.shape_cast %5 : vector<1x8x128xf32> to vector<8x128xf32>
    %7 = vector.shape_cast %4 : vector<8x128xf32> to vector<1x8x128xf32>
    tpu.vector_store %arg4[%c0_5, %c0_6, %c0_7], %7 {strides = array<i32>} : memref<1x8x128xf32, #tpu.memory_space<vmem>>, vector<1x8x128xf32>,
    %cst_8 = arith.constant dense<0.000000e+00> : vector<128xf32>
    %8 = vector.multi_reduction <add>, %4, %cst_8 [0] : vector<8x128xf32> to vector<128xf32>
    %9 = vector.shape_cast %8 : vector<128xf32> to vector<1x128xf32>
    %c0_9 = arith.constant 0 : index
    %c0_10 = arith.constant 0 : index
    %c0_11 = arith.constant 0 : index
    %c0_12 = arith.constant 0 : index
    %10 = vector.load %arg5[%c0_9, %c0_10, %c0_11, %c0_12] : memref<1x1x2x128xf32, #tpu.memory_space<vmem>>, vector<1x1x1x128xf32>
    %11 = vector.shape_cast %10 : vector<1x1x1x128xf32> to vector<1x128xf32>
    %12 = vector.shape_cast %9 : vector<1x128xf32> to vector<1x1x1x128xf32>
    tpu.vector_store %arg5[%c0_9, %c0_10, %c0_11, %c0_12], %12 {strides = array<i32>} : memref<1x1x2x128xf32, #tpu.memory_space<vmem>>, vector<1x1x1x128xf32>,
    %13 = arith.mulf %4, %4 : vector<8x128xf32>
    %cst_13 = arith.constant dense<0.000000e+00> : vector<128xf32>
    %14 = vector.multi_reduction <add>, %13, %cst_13 [0] : vector<8x128xf32> to vector<128xf32>
    %15 = vector.shape_cast %14 : vector<128xf32> to vector<1x128xf32>
    %c0_14 = arith.constant 0 : index
    %c0_15 = arith.constant 0 : index
    %c1 = arith.constant 1 : index
    %c0_16 = arith.constant 0 : index
    %16 = vector.load %arg5[%c0_14, %c0_15, %c1, %c0_16] : memref<1x1x2x128xf32, #tpu.memory_space<vmem>>, vector<1x1x1x128xf32>
    %17 = vector.shape_cast %16 : vector<1x1x1x128xf32> to vector<1x128xf32>
    %18 = vector.shape_cast %15 : vector<1x128xf32> to vector<1x1x1x128xf32>
    tpu.vector_store %arg5[%c0_14, %c0_15, %c1, %c0_16], %18 {strides = array<i32>} : memref<1x1x2x128xf32, #tpu.memory_space<vmem>>, vector<1x1x1x128xf32>,
    return
  }
  func.func @transform_0(%arg0: i32, %arg1: i32) -> (i32, i32, i32) {
    %c0_i32 = arith.constant 0 : i32
    %c0_i32_0 = arith.constant 0 : i32
    return %arg0, %arg1, %c0_i32 : i32, i32, i32
  }
  func.func @transform_1(%arg0: i32, %arg1: i32) -> (i32, i32, i32) {
    %c0_i32 = arith.constant 0 : i32
    %c0_i32_0 = arith.constant 0 : i32
    %c0_i32_1 = arith.constant 0 : i32
    return %arg0, %c0_i32, %c0_i32_0 : i32, i32, i32
  }
  func.func @transform_2(%arg0: i32, %arg1: i32) -> (i32, i32, i32) {
    %c0_i32 = arith.constant 0 : i32
    %c0_i32_0 = arith.constant 0 : i32
    return %arg0, %arg1, %c0_i32 : i32, i32, i32
  }
  func.func @transform_3(%arg0: i32, %arg1: i32) -> (i32, i32, i32, i32) {
    %c0_i32 = arith.constant 0 : i32
    %c0_i32_0 = arith.constant 0 : i32
    %c0_i32_1 = arith.constant 0 : i32
    return %arg0, %arg1, %c0_i32, %c0_i32_0 : i32, i32, i32, i32
  }
}

module attributes {stable_mosaic.version = 11 : i64} {
  func.func @_bn_apply_kernel(%arg0: i32, %arg1: i32, %arg2: memref<1x8x128xf32, #tpu.memory_space<vmem>>, %arg3: memref<1x128xf32, #tpu.memory_space<vmem>>, %arg4: memref<1x128xf32, #tpu.memory_space<vmem>>, %arg5: memref<1x8x128xf32, #tpu.memory_space<vmem>>) attributes {dimension_semantics = [#tpu.dimension_semantics<parallel>, #tpu.dimension_semantics<parallel>], iteration_bounds = array<i64: 16, 1>, scalar_prefetch = 0 : i64, scratch_operands = 0 : i64, tpu.core_type = #tpu.core_type<tc>, window_params = [{transform_indices = @transform_0, window_bounds = array<i64: 1, 8, 128>}, {pipeline_mode = #tpu.pipeline_mode<synchronous>, transform_indices = @transform_1, window_bounds = array<i64: 1, 128>}, {pipeline_mode = #tpu.pipeline_mode<synchronous>, transform_indices = @transform_2, window_bounds = array<i64: 1, 128>}, {transform_indices = @transform_3, window_bounds = array<i64: 1, 8, 128>}]} {
    %c0 = arith.constant 0 : index
    %c0_0 = arith.constant 0 : index
    %c0_1 = arith.constant 0 : index
    %0 = vector.load %arg2[%c0, %c0_0, %c0_1] : memref<1x8x128xf32, #tpu.memory_space<vmem>>, vector<1x8x128xf32>
    %1 = vector.shape_cast %0 : vector<1x8x128xf32> to vector<8x128xf32>
    %c0_2 = arith.constant 0 : index
    %c0_3 = arith.constant 0 : index
    %2 = vector.load %arg3[%c0_2, %c0_3] : memref<1x128xf32, #tpu.memory_space<vmem>>, vector<1x128xf32>
    %3 = vector.broadcast %2 : vector<1x128xf32> to vector<8x128xf32>
    %4 = arith.mulf %1, %3 : vector<8x128xf32>
    %c0_4 = arith.constant 0 : index
    %c0_5 = arith.constant 0 : index
    %5 = vector.load %arg4[%c0_4, %c0_5] : memref<1x128xf32, #tpu.memory_space<vmem>>, vector<1x128xf32>
    %6 = vector.broadcast %5 : vector<1x128xf32> to vector<8x128xf32>
    %7 = arith.addf %4, %6 : vector<8x128xf32>
    %cst = arith.constant 0.000000e+00 : f32
    %8 = vector.broadcast %cst : f32 to vector<8x128xf32>
    %9 = arith.maximumf %7, %8 : vector<8x128xf32>
    %c0_6 = arith.constant 0 : index
    %c0_7 = arith.constant 0 : index
    %c0_8 = arith.constant 0 : index
    %10 = vector.load %arg5[%c0_6, %c0_7, %c0_8] : memref<1x8x128xf32, #tpu.memory_space<vmem>>, vector<1x8x128xf32>
    %11 = vector.shape_cast %10 : vector<1x8x128xf32> to vector<8x128xf32>
    %12 = vector.shape_cast %9 : vector<8x128xf32> to vector<1x8x128xf32>
    tpu.vector_store %arg5[%c0_6, %c0_7, %c0_8], %12 {strides = array<i32>} : memref<1x8x128xf32, #tpu.memory_space<vmem>>, vector<1x8x128xf32>,
    return
  }
  func.func @transform_0(%arg0: i32, %arg1: i32) -> (i32, i32, i32) {
    %c0_i32 = arith.constant 0 : i32
    %c0_i32_0 = arith.constant 0 : i32
    return %arg0, %arg1, %c0_i32 : i32, i32, i32
  }
  func.func @transform_1(%arg0: i32, %arg1: i32) -> (i32, i32) {
    %c0_i32 = arith.constant 0 : i32
    %c0_i32_0 = arith.constant 0 : i32
    %c0_i32_1 = arith.constant 0 : i32
    return %c0_i32, %c0_i32_0 : i32, i32
  }
  func.func @transform_2(%arg0: i32, %arg1: i32) -> (i32, i32) {
    %c0_i32 = arith.constant 0 : i32
    %c0_i32_0 = arith.constant 0 : i32
    %c0_i32_1 = arith.constant 0 : i32
    return %c0_i32, %c0_i32_0 : i32, i32
  }
  func.func @transform_3(%arg0: i32, %arg1: i32) -> (i32, i32, i32) {
    %c0_i32 = arith.constant 0 : i32
    %c0_i32_0 = arith.constant 0 : i32
    return %arg0, %arg1, %c0_i32 : i32, i32, i32
  }
}

module attributes {stable_mosaic.version = 11 : i64} {
  func.func @_gemm_stats_kernel(%arg0: i32, %arg1: i32, %arg2: memref<1x32x256xf32, #tpu.memory_space<vmem>>, %arg3: memref<1x256x128xf32, #tpu.memory_space<vmem>>, %arg4: memref<1x32x128xf32, #tpu.memory_space<vmem>>, %arg5: memref<1x1x2x128xf32, #tpu.memory_space<vmem>>) attributes {dimension_semantics = [#tpu.dimension_semantics<parallel>, #tpu.dimension_semantics<parallel>], iteration_bounds = array<i64: 4, 1>, scalar_prefetch = 0 : i64, scratch_operands = 0 : i64, tpu.core_type = #tpu.core_type<tc>, window_params = [{transform_indices = @transform_0, window_bounds = array<i64: 1, 32, 256>}, {transform_indices = @transform_1, window_bounds = array<i64: 1, 256, 128>}, {transform_indices = @transform_2, window_bounds = array<i64: 1, 32, 128>}, {transform_indices = @transform_3, window_bounds = array<i64: 1, 1, 2, 128>}]} {
    %c0 = arith.constant 0 : index
    %c0_0 = arith.constant 0 : index
    %c0_1 = arith.constant 0 : index
    %0 = vector.load %arg2[%c0, %c0_0, %c0_1] : memref<1x32x256xf32, #tpu.memory_space<vmem>>, vector<1x32x256xf32>
    %1 = vector.shape_cast %0 : vector<1x32x256xf32> to vector<32x256xf32>
    %c0_2 = arith.constant 0 : index
    %c0_3 = arith.constant 0 : index
    %c0_4 = arith.constant 0 : index
    %2 = vector.load %arg3[%c0_2, %c0_3, %c0_4] : memref<1x256x128xf32, #tpu.memory_space<vmem>>, vector<1x256x128xf32>
    %3 = vector.shape_cast %2 : vector<1x256x128xf32> to vector<256x128xf32>
    %cst = arith.constant dense<0.000000e+00> : vector<32x128xf32>
    %4 = tpu.matmul %1, %3, %cst {dimension_numbers = #tpu.dot_dimension_numbers<[1], [0], [0], [1], [0, 0, 1, 1], [], []>} : vector<32x256xf32>, vector<256x128xf32>, vector<32x128xf32> -> vector<32x128xf32>
    %c0_5 = arith.constant 0 : index
    %c0_6 = arith.constant 0 : index
    %c0_7 = arith.constant 0 : index
    %5 = vector.load %arg4[%c0_5, %c0_6, %c0_7] : memref<1x32x128xf32, #tpu.memory_space<vmem>>, vector<1x32x128xf32>
    %6 = vector.shape_cast %5 : vector<1x32x128xf32> to vector<32x128xf32>
    %7 = vector.shape_cast %4 : vector<32x128xf32> to vector<1x32x128xf32>
    tpu.vector_store %arg4[%c0_5, %c0_6, %c0_7], %7 {strides = array<i32>} : memref<1x32x128xf32, #tpu.memory_space<vmem>>, vector<1x32x128xf32>,
    %cst_8 = arith.constant dense<0.000000e+00> : vector<128xf32>
    %8 = vector.multi_reduction <add>, %4, %cst_8 [0] : vector<32x128xf32> to vector<128xf32>
    %9 = vector.shape_cast %8 : vector<128xf32> to vector<1x128xf32>
    %c0_9 = arith.constant 0 : index
    %c0_10 = arith.constant 0 : index
    %c0_11 = arith.constant 0 : index
    %c0_12 = arith.constant 0 : index
    %10 = vector.load %arg5[%c0_9, %c0_10, %c0_11, %c0_12] : memref<1x1x2x128xf32, #tpu.memory_space<vmem>>, vector<1x1x1x128xf32>
    %11 = vector.shape_cast %10 : vector<1x1x1x128xf32> to vector<1x128xf32>
    %12 = vector.shape_cast %9 : vector<1x128xf32> to vector<1x1x1x128xf32>
    tpu.vector_store %arg5[%c0_9, %c0_10, %c0_11, %c0_12], %12 {strides = array<i32>} : memref<1x1x2x128xf32, #tpu.memory_space<vmem>>, vector<1x1x1x128xf32>,
    %13 = arith.mulf %4, %4 : vector<32x128xf32>
    %cst_13 = arith.constant dense<0.000000e+00> : vector<128xf32>
    %14 = vector.multi_reduction <add>, %13, %cst_13 [0] : vector<32x128xf32> to vector<128xf32>
    %15 = vector.shape_cast %14 : vector<128xf32> to vector<1x128xf32>
    %c0_14 = arith.constant 0 : index
    %c0_15 = arith.constant 0 : index
    %c1 = arith.constant 1 : index
    %c0_16 = arith.constant 0 : index
    %16 = vector.load %arg5[%c0_14, %c0_15, %c1, %c0_16] : memref<1x1x2x128xf32, #tpu.memory_space<vmem>>, vector<1x1x1x128xf32>
    %17 = vector.shape_cast %16 : vector<1x1x1x128xf32> to vector<1x128xf32>
    %18 = vector.shape_cast %15 : vector<1x128xf32> to vector<1x1x1x128xf32>
    tpu.vector_store %arg5[%c0_14, %c0_15, %c1, %c0_16], %18 {strides = array<i32>} : memref<1x1x2x128xf32, #tpu.memory_space<vmem>>, vector<1x1x1x128xf32>,
    return
  }
  func.func @transform_0(%arg0: i32, %arg1: i32) -> (i32, i32, i32) {
    %c0_i32 = arith.constant 0 : i32
    %c0_i32_0 = arith.constant 0 : i32
    return %arg0, %arg1, %c0_i32 : i32, i32, i32
  }
  func.func @transform_1(%arg0: i32, %arg1: i32) -> (i32, i32, i32) {
    %c0_i32 = arith.constant 0 : i32
    %c0_i32_0 = arith.constant 0 : i32
    %c0_i32_1 = arith.constant 0 : i32
    return %arg0, %c0_i32, %c0_i32_0 : i32, i32, i32
  }
  func.func @transform_2(%arg0: i32, %arg1: i32) -> (i32, i32, i32) {
    %c0_i32 = arith.constant 0 : i32
    %c0_i32_0 = arith.constant 0 : i32
    return %arg0, %arg1, %c0_i32 : i32, i32, i32
  }
  func.func @transform_3(%arg0: i32, %arg1: i32) -> (i32, i32, i32, i32) {
    %c0_i32 = arith.constant 0 : i32
    %c0_i32_0 = arith.constant 0 : i32
    %c0_i32_1 = arith.constant 0 : i32
    return %arg0, %arg1, %c0_i32, %c0_i32_0 : i32, i32, i32, i32
  }
}

module attributes {stable_mosaic.version = 11 : i64} {
  func.func @_bn_apply_kernel(%arg0: i32, %arg1: i32, %arg2: memref<1x32x128xf32, #tpu.memory_space<vmem>>, %arg3: memref<1x128xf32, #tpu.memory_space<vmem>>, %arg4: memref<1x128xf32, #tpu.memory_space<vmem>>, %arg5: memref<1x32x128xf32, #tpu.memory_space<vmem>>) attributes {dimension_semantics = [#tpu.dimension_semantics<parallel>, #tpu.dimension_semantics<parallel>], iteration_bounds = array<i64: 4, 1>, scalar_prefetch = 0 : i64, scratch_operands = 0 : i64, tpu.core_type = #tpu.core_type<tc>, window_params = [{transform_indices = @transform_0, window_bounds = array<i64: 1, 32, 128>}, {pipeline_mode = #tpu.pipeline_mode<synchronous>, transform_indices = @transform_1, window_bounds = array<i64: 1, 128>}, {pipeline_mode = #tpu.pipeline_mode<synchronous>, transform_indices = @transform_2, window_bounds = array<i64: 1, 128>}, {transform_indices = @transform_3, window_bounds = array<i64: 1, 32, 128>}]} {
    %c0 = arith.constant 0 : index
    %c0_0 = arith.constant 0 : index
    %c0_1 = arith.constant 0 : index
    %0 = vector.load %arg2[%c0, %c0_0, %c0_1] : memref<1x32x128xf32, #tpu.memory_space<vmem>>, vector<1x32x128xf32>
    %1 = vector.shape_cast %0 : vector<1x32x128xf32> to vector<32x128xf32>
    %c0_2 = arith.constant 0 : index
    %c0_3 = arith.constant 0 : index
    %2 = vector.load %arg3[%c0_2, %c0_3] : memref<1x128xf32, #tpu.memory_space<vmem>>, vector<1x128xf32>
    %3 = vector.broadcast %2 : vector<1x128xf32> to vector<32x128xf32>
    %4 = arith.mulf %1, %3 : vector<32x128xf32>
    %c0_4 = arith.constant 0 : index
    %c0_5 = arith.constant 0 : index
    %5 = vector.load %arg4[%c0_4, %c0_5] : memref<1x128xf32, #tpu.memory_space<vmem>>, vector<1x128xf32>
    %6 = vector.broadcast %5 : vector<1x128xf32> to vector<32x128xf32>
    %7 = arith.addf %4, %6 : vector<32x128xf32>
    %cst = arith.constant 0.000000e+00 : f32
    %8 = vector.broadcast %cst : f32 to vector<32x128xf32>
    %9 = arith.maximumf %7, %8 : vector<32x128xf32>
    %c0_6 = arith.constant 0 : index
    %c0_7 = arith.constant 0 : index
    %c0_8 = arith.constant 0 : index
    %10 = vector.load %arg5[%c0_6, %c0_7, %c0_8] : memref<1x32x128xf32, #tpu.memory_space<vmem>>, vector<1x32x128xf32>
    %11 = vector.shape_cast %10 : vector<1x32x128xf32> to vector<32x128xf32>
    %12 = vector.shape_cast %9 : vector<32x128xf32> to vector<1x32x128xf32>
    tpu.vector_store %arg5[%c0_6, %c0_7, %c0_8], %12 {strides = array<i32>} : memref<1x32x128xf32, #tpu.memory_space<vmem>>, vector<1x32x128xf32>,
    return
  }
  func.func @transform_0(%arg0: i32, %arg1: i32) -> (i32, i32, i32) {
    %c0_i32 = arith.constant 0 : i32
    %c0_i32_0 = arith.constant 0 : i32
    return %arg0, %arg1, %c0_i32 : i32, i32, i32
  }
  func.func @transform_1(%arg0: i32, %arg1: i32) -> (i32, i32) {
    %c0_i32 = arith.constant 0 : i32
    %c0_i32_0 = arith.constant 0 : i32
    %c0_i32_1 = arith.constant 0 : i32
    return %c0_i32, %c0_i32_0 : i32, i32
  }
  func.func @transform_2(%arg0: i32, %arg1: i32) -> (i32, i32) {
    %c0_i32 = arith.constant 0 : i32
    %c0_i32_0 = arith.constant 0 : i32
    %c0_i32_1 = arith.constant 0 : i32
    return %c0_i32, %c0_i32_0 : i32, i32
  }
  func.func @transform_3(%arg0: i32, %arg1: i32) -> (i32, i32, i32) {
    %c0_i32 = arith.constant 0 : i32
    %c0_i32_0 = arith.constant 0 : i32
    return %arg0, %arg1, %c0_i32 : i32, i32, i32
  }
}

module attributes {stable_mosaic.version = 11 : i64} {
  func.func @_gemm_stats_kernel(%arg0: i32, %arg1: i32, %arg2: memref<1x128x128xf32, #tpu.memory_space<vmem>>, %arg3: memref<1x128x128xf32, #tpu.memory_space<vmem>>, %arg4: memref<1x128x128xf32, #tpu.memory_space<vmem>>, %arg5: memref<1x1x2x128xf32, #tpu.memory_space<vmem>>) attributes {dimension_semantics = [#tpu.dimension_semantics<parallel>, #tpu.dimension_semantics<parallel>], iteration_bounds = array<i64: 4, 1>, scalar_prefetch = 0 : i64, scratch_operands = 0 : i64, tpu.core_type = #tpu.core_type<tc>, window_params = [{transform_indices = @transform_0, window_bounds = array<i64: 1, 128, 128>}, {transform_indices = @transform_1, window_bounds = array<i64: 1, 128, 128>}, {transform_indices = @transform_2, window_bounds = array<i64: 1, 128, 128>}, {transform_indices = @transform_3, window_bounds = array<i64: 1, 1, 2, 128>}]} {
    %c0 = arith.constant 0 : index
    %c0_0 = arith.constant 0 : index
    %c0_1 = arith.constant 0 : index
    %0 = vector.load %arg2[%c0, %c0_0, %c0_1] : memref<1x128x128xf32, #tpu.memory_space<vmem>>, vector<1x128x128xf32>
    %1 = vector.shape_cast %0 : vector<1x128x128xf32> to vector<128x128xf32>
    %c0_2 = arith.constant 0 : index
    %c0_3 = arith.constant 0 : index
    %c0_4 = arith.constant 0 : index
    %2 = vector.load %arg3[%c0_2, %c0_3, %c0_4] : memref<1x128x128xf32, #tpu.memory_space<vmem>>, vector<1x128x128xf32>
    %3 = vector.shape_cast %2 : vector<1x128x128xf32> to vector<128x128xf32>
    %cst = arith.constant dense<0.000000e+00> : vector<128x128xf32>
    %4 = tpu.matmul %1, %3, %cst {dimension_numbers = #tpu.dot_dimension_numbers<[1], [0], [0], [1], [0, 0, 1, 1], [], []>} : vector<128x128xf32>, vector<128x128xf32>, vector<128x128xf32> -> vector<128x128xf32>
    %c0_5 = arith.constant 0 : index
    %c0_6 = arith.constant 0 : index
    %c0_7 = arith.constant 0 : index
    %5 = vector.load %arg4[%c0_5, %c0_6, %c0_7] : memref<1x128x128xf32, #tpu.memory_space<vmem>>, vector<1x128x128xf32>
    %6 = vector.shape_cast %5 : vector<1x128x128xf32> to vector<128x128xf32>
    %7 = vector.shape_cast %4 : vector<128x128xf32> to vector<1x128x128xf32>
    tpu.vector_store %arg4[%c0_5, %c0_6, %c0_7], %7 {strides = array<i32>} : memref<1x128x128xf32, #tpu.memory_space<vmem>>, vector<1x128x128xf32>,
    %cst_8 = arith.constant dense<0.000000e+00> : vector<128xf32>
    %8 = vector.multi_reduction <add>, %4, %cst_8 [0] : vector<128x128xf32> to vector<128xf32>
    %9 = vector.shape_cast %8 : vector<128xf32> to vector<1x128xf32>
    %c0_9 = arith.constant 0 : index
    %c0_10 = arith.constant 0 : index
    %c0_11 = arith.constant 0 : index
    %c0_12 = arith.constant 0 : index
    %10 = vector.load %arg5[%c0_9, %c0_10, %c0_11, %c0_12] : memref<1x1x2x128xf32, #tpu.memory_space<vmem>>, vector<1x1x1x128xf32>
    %11 = vector.shape_cast %10 : vector<1x1x1x128xf32> to vector<1x128xf32>
    %12 = vector.shape_cast %9 : vector<1x128xf32> to vector<1x1x1x128xf32>
    tpu.vector_store %arg5[%c0_9, %c0_10, %c0_11, %c0_12], %12 {strides = array<i32>} : memref<1x1x2x128xf32, #tpu.memory_space<vmem>>, vector<1x1x1x128xf32>,
    %13 = arith.mulf %4, %4 : vector<128x128xf32>
    %cst_13 = arith.constant dense<0.000000e+00> : vector<128xf32>
    %14 = vector.multi_reduction <add>, %13, %cst_13 [0] : vector<128x128xf32> to vector<128xf32>
    %15 = vector.shape_cast %14 : vector<128xf32> to vector<1x128xf32>
    %c0_14 = arith.constant 0 : index
    %c0_15 = arith.constant 0 : index
    %c1 = arith.constant 1 : index
    %c0_16 = arith.constant 0 : index
    %16 = vector.load %arg5[%c0_14, %c0_15, %c1, %c0_16] : memref<1x1x2x128xf32, #tpu.memory_space<vmem>>, vector<1x1x1x128xf32>
    %17 = vector.shape_cast %16 : vector<1x1x1x128xf32> to vector<1x128xf32>
    %18 = vector.shape_cast %15 : vector<1x128xf32> to vector<1x1x1x128xf32>
    tpu.vector_store %arg5[%c0_14, %c0_15, %c1, %c0_16], %18 {strides = array<i32>} : memref<1x1x2x128xf32, #tpu.memory_space<vmem>>, vector<1x1x1x128xf32>,
    return
  }
  func.func @transform_0(%arg0: i32, %arg1: i32) -> (i32, i32, i32) {
    %c0_i32 = arith.constant 0 : i32
    %c0_i32_0 = arith.constant 0 : i32
    return %arg0, %arg1, %c0_i32 : i32, i32, i32
  }
  func.func @transform_1(%arg0: i32, %arg1: i32) -> (i32, i32, i32) {
    %c0_i32 = arith.constant 0 : i32
    %c0_i32_0 = arith.constant 0 : i32
    %c0_i32_1 = arith.constant 0 : i32
    return %arg0, %c0_i32, %c0_i32_0 : i32, i32, i32
  }
  func.func @transform_2(%arg0: i32, %arg1: i32) -> (i32, i32, i32) {
    %c0_i32 = arith.constant 0 : i32
    %c0_i32_0 = arith.constant 0 : i32
    return %arg0, %arg1, %c0_i32 : i32, i32, i32
  }
  func.func @transform_3(%arg0: i32, %arg1: i32) -> (i32, i32, i32, i32) {
    %c0_i32 = arith.constant 0 : i32
    %c0_i32_0 = arith.constant 0 : i32
    %c0_i32_1 = arith.constant 0 : i32
    return %arg0, %arg1, %c0_i32, %c0_i32_0 : i32, i32, i32, i32
  }
}

module attributes {stable_mosaic.version = 11 : i64} {
  func.func @_bn_apply_kernel(%arg0: i32, %arg1: i32, %arg2: memref<1x128x128xf32, #tpu.memory_space<vmem>>, %arg3: memref<1x128xf32, #tpu.memory_space<vmem>>, %arg4: memref<1x128xf32, #tpu.memory_space<vmem>>, %arg5: memref<1x128x128xf32, #tpu.memory_space<vmem>>) attributes {dimension_semantics = [#tpu.dimension_semantics<parallel>, #tpu.dimension_semantics<parallel>], iteration_bounds = array<i64: 4, 1>, scalar_prefetch = 0 : i64, scratch_operands = 0 : i64, tpu.core_type = #tpu.core_type<tc>, window_params = [{transform_indices = @transform_0, window_bounds = array<i64: 1, 128, 128>}, {pipeline_mode = #tpu.pipeline_mode<synchronous>, transform_indices = @transform_1, window_bounds = array<i64: 1, 128>}, {pipeline_mode = #tpu.pipeline_mode<synchronous>, transform_indices = @transform_2, window_bounds = array<i64: 1, 128>}, {transform_indices = @transform_3, window_bounds = array<i64: 1, 128, 128>}]} {
    %c0 = arith.constant 0 : index
    %c0_0 = arith.constant 0 : index
    %c0_1 = arith.constant 0 : index
    %0 = vector.load %arg2[%c0, %c0_0, %c0_1] : memref<1x128x128xf32, #tpu.memory_space<vmem>>, vector<1x128x128xf32>
    %1 = vector.shape_cast %0 : vector<1x128x128xf32> to vector<128x128xf32>
    %c0_2 = arith.constant 0 : index
    %c0_3 = arith.constant 0 : index
    %2 = vector.load %arg3[%c0_2, %c0_3] : memref<1x128xf32, #tpu.memory_space<vmem>>, vector<1x128xf32>
    %3 = vector.broadcast %2 : vector<1x128xf32> to vector<128x128xf32>
    %4 = arith.mulf %1, %3 : vector<128x128xf32>
    %c0_4 = arith.constant 0 : index
    %c0_5 = arith.constant 0 : index
    %5 = vector.load %arg4[%c0_4, %c0_5] : memref<1x128xf32, #tpu.memory_space<vmem>>, vector<1x128xf32>
    %6 = vector.broadcast %5 : vector<1x128xf32> to vector<128x128xf32>
    %7 = arith.addf %4, %6 : vector<128x128xf32>
    %cst = arith.constant 0.000000e+00 : f32
    %8 = vector.broadcast %cst : f32 to vector<128x128xf32>
    %9 = arith.maximumf %7, %8 : vector<128x128xf32>
    %c0_6 = arith.constant 0 : index
    %c0_7 = arith.constant 0 : index
    %c0_8 = arith.constant 0 : index
    %10 = vector.load %arg5[%c0_6, %c0_7, %c0_8] : memref<1x128x128xf32, #tpu.memory_space<vmem>>, vector<1x128x128xf32>
    %11 = vector.shape_cast %10 : vector<1x128x128xf32> to vector<128x128xf32>
    %12 = vector.shape_cast %9 : vector<128x128xf32> to vector<1x128x128xf32>
    tpu.vector_store %arg5[%c0_6, %c0_7, %c0_8], %12 {strides = array<i32>} : memref<1x128x128xf32, #tpu.memory_space<vmem>>, vector<1x128x128xf32>,
    return
  }
  func.func @transform_0(%arg0: i32, %arg1: i32) -> (i32, i32, i32) {
    %c0_i32 = arith.constant 0 : i32
    %c0_i32_0 = arith.constant 0 : i32
    return %arg0, %arg1, %c0_i32 : i32, i32, i32
  }
  func.func @transform_1(%arg0: i32, %arg1: i32) -> (i32, i32) {
    %c0_i32 = arith.constant 0 : i32
    %c0_i32_0 = arith.constant 0 : i32
    %c0_i32_1 = arith.constant 0 : i32
    return %c0_i32, %c0_i32_0 : i32, i32
  }
  func.func @transform_2(%arg0: i32, %arg1: i32) -> (i32, i32) {
    %c0_i32 = arith.constant 0 : i32
    %c0_i32_0 = arith.constant 0 : i32
    %c0_i32_1 = arith.constant 0 : i32
    return %c0_i32, %c0_i32_0 : i32, i32
  }
  func.func @transform_3(%arg0: i32, %arg1: i32) -> (i32, i32, i32) {
    %c0_i32 = arith.constant 0 : i32
    %c0_i32_0 = arith.constant 0 : i32
    return %arg0, %arg1, %c0_i32 : i32, i32, i32
  }
}

module attributes {stable_mosaic.version = 11 : i64} {
  func.func @_gemm_stats_kernel(%arg0: i32, %arg1: i32, %arg2: memref<1x512x64xf32, #tpu.memory_space<vmem>>, %arg3: memref<1x64x128xf32, #tpu.memory_space<vmem>>, %arg4: memref<1x512x128xf32, #tpu.memory_space<vmem>>, %arg5: memref<1x1x2x128xf32, #tpu.memory_space<vmem>>) attributes {dimension_semantics = [#tpu.dimension_semantics<parallel>, #tpu.dimension_semantics<parallel>], iteration_bounds = array<i64: 4, 1>, scalar_prefetch = 0 : i64, scratch_operands = 0 : i64, tpu.core_type = #tpu.core_type<tc>, window_params = [{transform_indices = @transform_0, window_bounds = array<i64: 1, 512, 64>}, {transform_indices = @transform_1, window_bounds = array<i64: 1, 64, 128>}, {transform_indices = @transform_2, window_bounds = array<i64: 1, 512, 128>}, {transform_indices = @transform_3, window_bounds = array<i64: 1, 1, 2, 128>}]} {
    %c0 = arith.constant 0 : index
    %c0_0 = arith.constant 0 : index
    %c0_1 = arith.constant 0 : index
    %0 = vector.load %arg2[%c0, %c0_0, %c0_1] : memref<1x512x64xf32, #tpu.memory_space<vmem>>, vector<1x512x64xf32>
    %1 = vector.shape_cast %0 : vector<1x512x64xf32> to vector<512x64xf32>
    %c0_2 = arith.constant 0 : index
    %c0_3 = arith.constant 0 : index
    %c0_4 = arith.constant 0 : index
    %2 = vector.load %arg3[%c0_2, %c0_3, %c0_4] : memref<1x64x128xf32, #tpu.memory_space<vmem>>, vector<1x64x128xf32>
    %3 = vector.shape_cast %2 : vector<1x64x128xf32> to vector<64x128xf32>
    %cst = arith.constant dense<0.000000e+00> : vector<512x128xf32>
    %4 = tpu.matmul %1, %3, %cst {dimension_numbers = #tpu.dot_dimension_numbers<[1], [0], [0], [1], [0, 0, 1, 1], [], []>} : vector<512x64xf32>, vector<64x128xf32>, vector<512x128xf32> -> vector<512x128xf32>
    %c0_5 = arith.constant 0 : index
    %c0_6 = arith.constant 0 : index
    %c0_7 = arith.constant 0 : index
    %5 = vector.load %arg4[%c0_5, %c0_6, %c0_7] : memref<1x512x128xf32, #tpu.memory_space<vmem>>, vector<1x512x128xf32>
    %6 = vector.shape_cast %5 : vector<1x512x128xf32> to vector<512x128xf32>
    %7 = vector.shape_cast %4 : vector<512x128xf32> to vector<1x512x128xf32>
    tpu.vector_store %arg4[%c0_5, %c0_6, %c0_7], %7 {strides = array<i32>} : memref<1x512x128xf32, #tpu.memory_space<vmem>>, vector<1x512x128xf32>,
    %cst_8 = arith.constant dense<0.000000e+00> : vector<128xf32>
    %8 = vector.multi_reduction <add>, %4, %cst_8 [0] : vector<512x128xf32> to vector<128xf32>
    %9 = vector.shape_cast %8 : vector<128xf32> to vector<1x128xf32>
    %c0_9 = arith.constant 0 : index
    %c0_10 = arith.constant 0 : index
    %c0_11 = arith.constant 0 : index
    %c0_12 = arith.constant 0 : index
    %10 = vector.load %arg5[%c0_9, %c0_10, %c0_11, %c0_12] : memref<1x1x2x128xf32, #tpu.memory_space<vmem>>, vector<1x1x1x128xf32>
    %11 = vector.shape_cast %10 : vector<1x1x1x128xf32> to vector<1x128xf32>
    %12 = vector.shape_cast %9 : vector<1x128xf32> to vector<1x1x1x128xf32>
    tpu.vector_store %arg5[%c0_9, %c0_10, %c0_11, %c0_12], %12 {strides = array<i32>} : memref<1x1x2x128xf32, #tpu.memory_space<vmem>>, vector<1x1x1x128xf32>,
    %13 = arith.mulf %4, %4 : vector<512x128xf32>
    %cst_13 = arith.constant dense<0.000000e+00> : vector<128xf32>
    %14 = vector.multi_reduction <add>, %13, %cst_13 [0] : vector<512x128xf32> to vector<128xf32>
    %15 = vector.shape_cast %14 : vector<128xf32> to vector<1x128xf32>
    %c0_14 = arith.constant 0 : index
    %c0_15 = arith.constant 0 : index
    %c1 = arith.constant 1 : index
    %c0_16 = arith.constant 0 : index
    %16 = vector.load %arg5[%c0_14, %c0_15, %c1, %c0_16] : memref<1x1x2x128xf32, #tpu.memory_space<vmem>>, vector<1x1x1x128xf32>
    %17 = vector.shape_cast %16 : vector<1x1x1x128xf32> to vector<1x128xf32>
    %18 = vector.shape_cast %15 : vector<1x128xf32> to vector<1x1x1x128xf32>
    tpu.vector_store %arg5[%c0_14, %c0_15, %c1, %c0_16], %18 {strides = array<i32>} : memref<1x1x2x128xf32, #tpu.memory_space<vmem>>, vector<1x1x1x128xf32>,
    return
  }
  func.func @transform_0(%arg0: i32, %arg1: i32) -> (i32, i32, i32) {
    %c0_i32 = arith.constant 0 : i32
    %c0_i32_0 = arith.constant 0 : i32
    return %arg0, %arg1, %c0_i32 : i32, i32, i32
  }
  func.func @transform_1(%arg0: i32, %arg1: i32) -> (i32, i32, i32) {
    %c0_i32 = arith.constant 0 : i32
    %c0_i32_0 = arith.constant 0 : i32
    %c0_i32_1 = arith.constant 0 : i32
    return %arg0, %c0_i32, %c0_i32_0 : i32, i32, i32
  }
  func.func @transform_2(%arg0: i32, %arg1: i32) -> (i32, i32, i32) {
    %c0_i32 = arith.constant 0 : i32
    %c0_i32_0 = arith.constant 0 : i32
    return %arg0, %arg1, %c0_i32 : i32, i32, i32
  }
  func.func @transform_3(%arg0: i32, %arg1: i32) -> (i32, i32, i32, i32) {
    %c0_i32 = arith.constant 0 : i32
    %c0_i32_0 = arith.constant 0 : i32
    %c0_i32_1 = arith.constant 0 : i32
    return %arg0, %arg1, %c0_i32, %c0_i32_0 : i32, i32, i32, i32
  }
}

module attributes {stable_mosaic.version = 11 : i64} {
  func.func @_bn_apply_kernel(%arg0: i32, %arg1: i32, %arg2: memref<1x512x128xf32, #tpu.memory_space<vmem>>, %arg3: memref<1x128xf32, #tpu.memory_space<vmem>>, %arg4: memref<1x128xf32, #tpu.memory_space<vmem>>, %arg5: memref<1x512x128xf32, #tpu.memory_space<vmem>>) attributes {dimension_semantics = [#tpu.dimension_semantics<parallel>, #tpu.dimension_semantics<parallel>], iteration_bounds = array<i64: 4, 1>, scalar_prefetch = 0 : i64, scratch_operands = 0 : i64, tpu.core_type = #tpu.core_type<tc>, window_params = [{transform_indices = @transform_0, window_bounds = array<i64: 1, 512, 128>}, {pipeline_mode = #tpu.pipeline_mode<synchronous>, transform_indices = @transform_1, window_bounds = array<i64: 1, 128>}, {pipeline_mode = #tpu.pipeline_mode<synchronous>, transform_indices = @transform_2, window_bounds = array<i64: 1, 128>}, {transform_indices = @transform_3, window_bounds = array<i64: 1, 512, 128>}]} {
    %c0 = arith.constant 0 : index
    %c0_0 = arith.constant 0 : index
    %c0_1 = arith.constant 0 : index
    %0 = vector.load %arg2[%c0, %c0_0, %c0_1] : memref<1x512x128xf32, #tpu.memory_space<vmem>>, vector<1x512x128xf32>
    %1 = vector.shape_cast %0 : vector<1x512x128xf32> to vector<512x128xf32>
    %c0_2 = arith.constant 0 : index
    %c0_3 = arith.constant 0 : index
    %2 = vector.load %arg3[%c0_2, %c0_3] : memref<1x128xf32, #tpu.memory_space<vmem>>, vector<1x128xf32>
    %3 = vector.broadcast %2 : vector<1x128xf32> to vector<512x128xf32>
    %4 = arith.mulf %1, %3 : vector<512x128xf32>
    %c0_4 = arith.constant 0 : index
    %c0_5 = arith.constant 0 : index
    %5 = vector.load %arg4[%c0_4, %c0_5] : memref<1x128xf32, #tpu.memory_space<vmem>>, vector<1x128xf32>
    %6 = vector.broadcast %5 : vector<1x128xf32> to vector<512x128xf32>
    %7 = arith.addf %4, %6 : vector<512x128xf32>
    %cst = arith.constant 0.000000e+00 : f32
    %8 = vector.broadcast %cst : f32 to vector<512x128xf32>
    %9 = arith.maximumf %7, %8 : vector<512x128xf32>
    %c0_6 = arith.constant 0 : index
    %c0_7 = arith.constant 0 : index
    %c0_8 = arith.constant 0 : index
    %10 = vector.load %arg5[%c0_6, %c0_7, %c0_8] : memref<1x512x128xf32, #tpu.memory_space<vmem>>, vector<1x512x128xf32>
    %11 = vector.shape_cast %10 : vector<1x512x128xf32> to vector<512x128xf32>
    %12 = vector.shape_cast %9 : vector<512x128xf32> to vector<1x512x128xf32>
    tpu.vector_store %arg5[%c0_6, %c0_7, %c0_8], %12 {strides = array<i32>} : memref<1x512x128xf32, #tpu.memory_space<vmem>>, vector<1x512x128xf32>,
    return
  }
  func.func @transform_0(%arg0: i32, %arg1: i32) -> (i32, i32, i32) {
    %c0_i32 = arith.constant 0 : i32
    %c0_i32_0 = arith.constant 0 : i32
    return %arg0, %arg1, %c0_i32 : i32, i32, i32
  }
  func.func @transform_1(%arg0: i32, %arg1: i32) -> (i32, i32) {
    %c0_i32 = arith.constant 0 : i32
    %c0_i32_0 = arith.constant 0 : i32
    %c0_i32_1 = arith.constant 0 : i32
    return %c0_i32, %c0_i32_0 : i32, i32
  }
  func.func @transform_2(%arg0: i32, %arg1: i32) -> (i32, i32) {
    %c0_i32 = arith.constant 0 : i32
    %c0_i32_0 = arith.constant 0 : i32
    %c0_i32_1 = arith.constant 0 : i32
    return %c0_i32, %c0_i32_0 : i32, i32
  }
  func.func @transform_3(%arg0: i32, %arg1: i32) -> (i32, i32, i32) {
    %c0_i32 = arith.constant 0 : i32
    %c0_i32_0 = arith.constant 0 : i32
    return %arg0, %arg1, %c0_i32 : i32, i32, i32
  }
}

module attributes {stable_mosaic.version = 11 : i64} {
  func.func @_gemm_tanh_kernel(%arg0: i32, %arg1: i32, %arg2: memref<1x512x32xf32, #tpu.memory_space<vmem>>, %arg3: memref<1x32x128xf32, #tpu.memory_space<vmem>>, %arg4: memref<1x512x128xf32, #tpu.memory_space<vmem>>) attributes {dimension_semantics = [#tpu.dimension_semantics<parallel>, #tpu.dimension_semantics<parallel>], iteration_bounds = array<i64: 4, 4>, scalar_prefetch = 0 : i64, scratch_operands = 0 : i64, tpu.core_type = #tpu.core_type<tc>, window_params = [{transform_indices = @transform_0, window_bounds = array<i64: 1, 512, 32>}, {transform_indices = @transform_1, window_bounds = array<i64: 1, 32, 128>}, {transform_indices = @transform_2, window_bounds = array<i64: 1, 512, 128>}]} {
    %c0 = arith.constant 0 : index
    %c0_0 = arith.constant 0 : index
    %c0_1 = arith.constant 0 : index
    %0 = vector.load %arg2[%c0, %c0_0, %c0_1] : memref<1x512x32xf32, #tpu.memory_space<vmem>>, vector<1x512x32xf32>
    %1 = vector.shape_cast %0 : vector<1x512x32xf32> to vector<512x32xf32>
    %c0_2 = arith.constant 0 : index
    %c0_3 = arith.constant 0 : index
    %c0_4 = arith.constant 0 : index
    %2 = vector.load %arg3[%c0_2, %c0_3, %c0_4] : memref<1x32x128xf32, #tpu.memory_space<vmem>>, vector<1x32x128xf32>
    %3 = vector.shape_cast %2 : vector<1x32x128xf32> to vector<32x128xf32>
    %cst = arith.constant dense<0.000000e+00> : vector<512x128xf32>
    %4 = tpu.matmul %1, %3, %cst {dimension_numbers = #tpu.dot_dimension_numbers<[1], [0], [0], [1], [0, 0, 1, 1], [], []>} : vector<512x32xf32>, vector<32x128xf32>, vector<512x128xf32> -> vector<512x128xf32>
    %5 = math.tanh %4 : vector<512x128xf32>
    %c0_5 = arith.constant 0 : index
    %c0_6 = arith.constant 0 : index
    %c0_7 = arith.constant 0 : index
    %6 = vector.load %arg4[%c0_5, %c0_6, %c0_7] : memref<1x512x128xf32, #tpu.memory_space<vmem>>, vector<1x512x128xf32>
    %7 = vector.shape_cast %6 : vector<1x512x128xf32> to vector<512x128xf32>
    %8 = vector.shape_cast %5 : vector<512x128xf32> to vector<1x512x128xf32>
    tpu.vector_store %arg4[%c0_5, %c0_6, %c0_7], %8 {strides = array<i32>} : memref<1x512x128xf32, #tpu.memory_space<vmem>>, vector<1x512x128xf32>,
    return
  }
  func.func @transform_0(%arg0: i32, %arg1: i32) -> (i32, i32, i32) {
    %c0_i32 = arith.constant 0 : i32
    %c0_i32_0 = arith.constant 0 : i32
    return %arg0, %arg1, %c0_i32 : i32, i32, i32
  }
  func.func @transform_1(%arg0: i32, %arg1: i32) -> (i32, i32, i32) {
    %c0_i32 = arith.constant 0 : i32
    %c0_i32_0 = arith.constant 0 : i32
    %c0_i32_1 = arith.constant 0 : i32
    return %arg0, %c0_i32, %c0_i32_0 : i32, i32, i32
  }
  func.func @transform_2(%arg0: i32, %arg1: i32) -> (i32, i32, i32) {
    %c0_i32 = arith.constant 0 : i32
    %c0_i32_0 = arith.constant 0 : i32
    return %arg0, %arg1, %c0_i32 : i32, i32, i32
  }
}

</mosaic_0001>

<bundles_post_ra>
// kernel: _lambda_.10
= control target key start
LH: loop header
LB: loop body
LE: loop exit
PB: predicated region body
PF: predicated region fallthrough
CT: control target
= control target key end

     0   :  { %s369_s12 = smov 0   ;;  %s371_s13 = smov 0   ;;  %s396_s0 = inlined_call_operand.vmem [shape: f32[16,8,128], index: 0, kind: input, shape index: {}]   ;;  %s397_s1 = inlined_call_operand.vmem [shape: f32[1,128], index: 1, kind: input, shape index: {}]   ;;  %s398_s2 = inlined_call_operand.vmem [shape: f32[1,128], index: 2, kind: input, shape index: {}]   ;;  %s399_s3 = inlined_call_operand.vmem [shape: f32[16,8,128], index: 3, kind: output, shape index: {}]  }
   0x1   :  { %s373_s14 = smov 0  }
   0x2 LB: > { %s25_s15 = sadd.s32 1, %s343_s13  ;;  %p294_p0 = scmp.ge.s32.totalorder %s347_s14, 1  ;;  %s347_s14 = sphi %s373_s14, %s13_s14   ;;  %s343_s13 = sphi %s371_s13, %s401_s13   ;;  %s339_s12 = sphi %s369_s12, %s400_s12  }
   0x3   : > { %p27_p1 = scmp.ge.s32.totalorder %s25_s15, 16  ;;  %p155_p2 = scmp.lt.s32.totalorder %s347_s14, 17 }
   0x5   : > { %s403_s15 = smov (%p27_p1, %s25_s15), 0  ;;  %p156_p3 = pnand %p294_p0, %p155_p2 }
   0x6   : > { %p183_p4 = scmp.lt.s32.totalorder (!%p156_p3), %s339_s12, 15  ;;  %v297_v0 = vld [vmem:[%s397_s1] ss:$0 sm:$0xff] (!%p156_p3) }
   0x7   : > { %159 = sbr.rel (%p156_p3) target bundleno = 25 (0x19), region = 32  ;;  %v298_v2 = vld [vmem:[%s398_s2] ss:$0 sm:$0xff] (!%p156_p3) }
   0xe   : > { %s405_s12 = smov (!%p183_p4, %s339_s12), 15 }
   0xf   : > { %s295_s16 = sshll.u32 %s405_s12, 3 }
  0x10   : > { %s189_s21 = scalar_lea.vmem %s396_s0, %s295_s16  ;;  %s196_s26 = scalar_lea.vmem %s399_s3, %s295_s16 }
  0x11   : > { %v197_v1 = vld [vmem:[%s189_s21] sm:$0xff] }
  0x12   : > { %v205_v3 = vmul.f32 %v297_v0, %v197_v1 }
  0x14   : > { %v213_v4 = vadd.f32 %v298_v2, %v205_v3 }
  0x16   : > { %v214_v5 = vmax.f32 %v213_v4, 0.0 }
  0x18   : > { %215 = vst [vmem:[%s196_s26] sm:$0xff] %v214_v5 }
  0x19 PF: > { %s13_s14 = sadd.s32 1, %s347_s14   ;;  %s400_s12 = smov %s343_s13 }
  0x1a   : > { %p10_p5 = scmp.ge.s32.totalorder %s13_s14, 18   ;;  %s401_s13 = smov %s403_s15 }
  0x1c   :  { %12 = sbr.rel (!%p10_p5) target bundleno = 2 (0x2), region = 62 }

// kernel: _lambda_.9
= control target key start
LH: loop header
LB: loop body
LE: loop exit
PB: predicated region body
PF: predicated region fallthrough
CT: control target
= control target key end

     0   :  { %9 = vsyncpa [#allocation3], 0  ;;  %s815_s0 = inlined_call_operand.vmem [shape: f32[16,8,16], index: 0, kind: input, shape index: {}]   ;;  %s816_s1 = inlined_call_operand.hbm [shape: f32[16,16,128], index: 1, kind: input, shape index: {}]   ;;  %s817_s2 = inlined_call_operand.vmem [shape: f32[16,8,128], index: 2, kind: output, shape index: {0}]   ;;  %s818_s3 = inlined_call_operand.vmem [shape: f32[16,1,2,128], index: 3, kind: output, shape index: {1}]  }
   0x1   :  { %11 = vsyncpa [#allocation3 + $0x1], 0  ;;  %s685_s12 = smov 0   ;;  %s687_s13 = smov 0  }
   0x2   :  { %s689_s14 = smov 0   ;;  %s691_s15 = smov 0  }
   0x3   :  { %s693_s16 = smov 0   ;;  %s695_s17 = smov 0  }
   0x4 LB: > { %s488_s18 = sadd.s32 4294967295, %s657_s17   ;;  %s29_s19 = sadd.s32 1, %s653_s16  ;;  %s657_s17 = sphi %s695_s17, %s17_s17   ;;  %s653_s16 = sphi %s693_s16, %s826_s16   ;;  %s649_s15 = sphi %s691_s15, %s825_s15   ;;  %s645_s14 = sphi %s689_s14, %s824_s14   ;;  %s641_s13 = sphi %s687_s13, %s823_s13   ;;  %s637_s12 = sphi %s685_s12, %s822_s12  }
   0x5   : > { %p31_p0 = scmp.ge.s32.totalorder %s29_s19, 16  ;;  %s64_s20 = sadd.s32 1, %s645_s14 }
   0x6   : > { %p71_p1 = scmp.ne.s32.totalorder %s645_s14, %s641_s13  ;;  %p72_p2 = scmp.eq.s32.totalorder %s657_s17, 0 }
   0x7   : > { %s828_s19 = smov (%p31_p0, %s29_s19), 0  ;;  %p77_p4 = scmp.ne.s32.totalorder %s641_s13, %s637_s12 }
   0x8   : > { %p721_p3 = por %p72_p2, %p71_p1  ;;  %s61_s22 = ssub.s32 %s653_s16, %s828_s19 }
   0x9   : > { %p78_p5 = scmp.eq.s32.totalorder %s488_s18, 0  ;;  %p62_p6 = scmp.eq.s32.totalorder %s61_s22, 0 }
   0xa   : > { %p523_p8 = scmp.lt.s32.totalorder %s657_s17, 16  ;;  %s167_s25 = sand.u32 1, %s645_s14  }
   0xb   : > { %p728_p7 = por %p78_p5, %p77_p4  ;;  %s503_s26 = sshll.u32 %s653_s16, 8 }
   0xc   : > { %s734_s24 = scalar_select %p62_p6, %s645_s14, %s64_s20  }
   0xd   : > { %s492_s27 = sshll.u32 %s167_s25, 4  ;;  %s741_s30 = scalar_lea.hbm %s816_s1, %s503_s26 }
   0xe   : > { %s171_s4 = scalar_lea.vmem [#allocation2], %s492_s27  ;;  %p745_p9 = pnand %p523_p8, %p721_p3 }
   0xf   : > { %s178_s5 = sshll.u32 %s171_s4, 4  ;;  %s751_s7 = scalar_lea.sflag [#allocation3], %s167_s25  ;;  %s749_s5 = int_to_ptr.vmem [resolvable:$true] %s178_s5 }
  0x10   : > { %s577_s8 = scalar_lea.hbm %s741_s30, 256  ;;  %p579_p11 = pneg %p745_p9 }
  0x11   : > { %p578_p10 = scmp.ne.s32.totalorder %s741_s30, %s577_s8  ;;  %s582_s11 = scalar_lea.hbm %s816_s1, 4096 }
  0x12   : > { %p583_p0 = scmp.lt.u32.totalorder %s741_s30, %s816_s1  ;;  %p584_p1 = scmp.lt.u32.totalorder %s582_s11, %s577_s8 }
  0x13   : > { %p580_p12 = pnand %p579_p11, %p578_p10  ;;  %p586_p3 = scmp.lt.u32.totalorder %s577_s8, %s741_s30 }
  0x14   : > { %p585_p2 = por %p584_p1, %p583_p0 }
  0x15   : > { %p581_p13 = pneg %p580_p12 }
  0x16   : > { %p587_p4 = por %p586_p3, %p585_p2 }
  0x18   : > { %p588_p5 = pnand %p587_p4, %p581_p13 }
  0x1a   : > { %591 = shalt.err (!%p588_p5)
}
  0x1b   : > { %s592_s20 = scalar_lea.vmem %s749_s5, 256  ;;  %s659_s21 = smov [#allocation2]  }
  0x1c   : > { %p593_p6 = scmp.ne.s32.totalorder %s749_s5, %s592_s20  ;;  %s597_s22 = sshll.u32 %s659_s21, 4  ;;  %s598_s22 = int_to_ptr.vmem [resolvable:$false] %s597_s22 }
  0x1d   : > { %s599_s25 = scalar_lea.vmem %s598_s22, 512  ;;  %p600_p12 = scmp.lt.s32.totalorder %s749_s5, %s598_s22 }
  0x1e   : > { %p595_p8 = pnand %p593_p6, %p579_p11  ;;  %p601_p0 = scmp.lt.s32.totalorder %s599_s25, %s592_s20 }
  0x20   : > { %p596_p10 = pneg %p595_p8  ;;  %p602_p1 = por %p601_p0, %p600_p12 }
  0x22   : > { %p603_p2 = pnand %p602_p1, %p596_p10 }
  0x24   : > { %606 = shalt.err (!%p603_p2)
}
  0x25   : > { %s660_s26 = smov 128   ;;  %s661_s27 = smov 8  }
  0x26   : > { %522 = dma.hbm_to_vmem [thread:$0]  (!%p745_p9), %s741_s30, 256, %s749_s5, %s751_s7, %s660_s26, %s660_s26, %s661_s27  }
  0x27   : > { %p495_p11 = scmp.ge.s32.totalorder %s657_s17, 1  ;;  %p186_p13 = scmp.lt.s32.totalorder %s657_s17, 17 }
  0x29   : > { %p187_p3 = pnand %p495_p11, %p186_p13 }
  0x2a   : > { %s192_s28 = sand.u32 (!%p187_p3), 1, %s641_s13  }
  0x2b   : > { %190 = sbr.rel (%p187_p3) target bundleno = 285 (0x11d), region = 28  ;;  %s496_s29 = sshll.u32 (!%p187_p3), %s192_s28, 4 }
  0x2c   : > { %s193_s4 = scalar_lea.sflag (!%p187_p3), [#allocation3], %s192_s28  ;;  %s196_s8 = scalar_lea.vmem (!%p187_p3), [#allocation2], %s496_s29 }
  0x32   : > { %632 = dma.done.wait (%p728_p7), %s193_s4, 256  }
  0x33   : > { %634 = vsyncadd (%p728_p7), %s193_s4, 4294967040  ;;  %p235_p4 = scmp.lt.s32.totalorder %s649_s15, 15  ;;  %v662_v0 = vmov 0.0|0.0   ;;  %vm663_vm0 = vmmov 0   ;;  %v664_v1 = vmov 0.0   ;;  %v257_v2 = vld [vmem:[%s196_s8] sm:$0xff] }
  0x34   : > { %514 = vmatprep.subr.bf16.mxu0 %v662_v0  ;;  %511 = vmatprep.mubr.msk.f32.mxu0 %vm663_vm0, %v664_v1  ;;  %v258_v3 = vld [vmem:[%s196_s8 + $0x8] sm:$0xff]  ;;  %vm259_vm1 = vcmask 130048  }
  0x35   : > { %s830_s15 = smov (!%p235_p4, %s649_s15), 15  ;;  %v515_v4 = vpack.c.bf16 %v258_v3, %v257_v2 }
  0x36   : > { %s497_s30 = sshll.u32 %s830_s15, 3  ;;  %s499_s11 = sshll.u32 %s830_s15, 1 }
  0x37   : > { %s241_s7 = scalar_lea.vmem %s815_s0, %s497_s30  ;;  %516 = vmatpush3.bf16.msra.mxu0 %v515_v4  ;;  %s248_s10 = scalar_lea.vmem %s817_s2, %s497_s30 }
  0x38   : > { %v256_v5 = vld [vmem:[%s241_s7] sm:$0xff]  ;;  %s255_s20 = scalar_lea.vmem %s818_s3, %s499_s11 }
  0x3a   : > { %512 = vmatmul.mubr.msk.f32.vlgmr.msra.gmra.mrb[0].mxu0 %vm259_vm1, %v256_v5 }
 0x10d   : > { %v329_v6 = vpop.f32.mrb[0].mxu0 }
 0x10e   : > { %333 = vst [vmem:[%s248_s10] sm:$0xff] %v329_v6  ;;  %v334_v7 = vrot.slane %v329_v6, 4  ;;  %v341_v8 = vmul.f32 %v329_v6, %v329_v6  ;;  %v513_v9 = vpop.f32.mrb[1].mxu0 }
 0x110   : > { %v335_v10 = vadd.f32 %v334_v7, %v329_v6  ;;  %v342_v11 = vrot.slane %v341_v8, 4 }
 0x112   : > { %v336_v12 = vrot.slane %v335_v10, 2  ;;  %v343_v13 = vadd.f32 %v342_v11, %v341_v8 }
 0x114   : > { %v337_v14 = vadd.f32 %v336_v12, %v335_v10  ;;  %v344_v15 = vrot.slane %v343_v13, 2 }
 0x116   : > { %v338_v16 = vrot.slane %v337_v14, 1  ;;  %v345_v17 = vadd.f32 %v344_v15, %v343_v13 }
 0x118   : > { %v339_v18 = vadd.f32 %v338_v16, %v337_v14  ;;  %v346_v19 = vrot.slane %v345_v17, 1 }
 0x11a   : > { %340 = vst [vmem:[%s255_s20] sm:$0x1] %v339_v18  ;;  %v347_v20 = vadd.f32 %v346_v19, %v345_v17 }
 0x11c   : > { %348 = vst [vmem:[%s255_s20 + $0x1] sm:$0x1] %v347_v20 }
 0x11d PF: > { %s17_s17 = sadd.s32 1, %s657_s17   ;;  %s822_s12 = smov %s641_s13 }
 0x11e   : > { %p14_p7 = scmp.ge.s32.totalorder %s17_s17, 18   ;;  %s823_s13 = smov %s645_s14 }
 0x11f   : > { %s824_s14 = smov %s734_s24  ;;  %s825_s15 = smov %s653_s16 }
 0x120   : > { %s826_s16 = smov %s828_s19  ;;  %16 = sbr.rel (!%p14_p7) target bundleno = 4 (0x4), region = 83 }
 0x127   :  { %394 = vsyncpa [#allocation3], 1 }
 0x128   :  { %396 = vsyncpa [#allocation3 + $0x1], 1 }

// kernel: _lambda_.11
= control target key start
LH: loop header
LB: loop body
LE: loop exit
PB: predicated region body
PF: predicated region fallthrough
CT: control target
= control target key end

     0   :  { %9 = vsyncpa [#allocation3], 0  ;;  %s1031_s0 = inlined_call_operand.vmem [shape: f32[4,32,256], index: 0, kind: input, shape index: {}]   ;;  %s1032_s1 = inlined_call_operand.hbm [shape: f32[4,256,128], index: 1, kind: input, shape index: {}]   ;;  %s1033_s2 = inlined_call_operand.vmem [shape: f32[4,32,128], index: 2, kind: output, shape index: {0}]   ;;  %s1034_s3 = inlined_call_operand.vmem [shape: f32[4,1,2,128], index: 3, kind: output, shape index: {1}]  }
   0x1   :  { %11 = vsyncpa [#allocation3 + $0x1], 0  ;;  %s852_s12 = smov 0   ;;  %s854_s13 = smov 0  }
   0x2   :  { %s856_s14 = smov 0   ;;  %s858_s15 = smov 0  }
   0x3   :  { %s860_s16 = smov 0   ;;  %s862_s17 = smov 0  }
   0x4 LB: > { %s579_s18 = sadd.s32 4294967295, %s827_s17   ;;  %s29_s19 = sadd.s32 1, %s823_s16  ;;  %s827_s17 = sphi %s862_s17, %s17_s17   ;;  %s823_s16 = sphi %s860_s16, %s1042_s16   ;;  %s819_s15 = sphi %s858_s15, %s1041_s15   ;;  %s815_s14 = sphi %s856_s14, %s1040_s14   ;;  %s811_s13 = sphi %s854_s13, %s1039_s13   ;;  %s807_s12 = sphi %s852_s12, %s1038_s12  }
   0x5   : > { %p31_p0 = scmp.ge.s32.totalorder %s29_s19, 4  ;;  %s64_s20 = sadd.s32 1, %s815_s14 }
   0x6   : > { %p71_p1 = scmp.ne.s32.totalorder %s815_s14, %s811_s13  ;;  %p72_p2 = scmp.eq.s32.totalorder %s827_s17, 0 }
   0x7   : > { %s1044_s19 = smov (%p31_p0, %s29_s19), 0  ;;  %p77_p4 = scmp.ne.s32.totalorder %s811_s13, %s807_s12 }
   0x8   : > { %p888_p3 = por %p72_p2, %p71_p1  ;;  %s61_s22 = ssub.s32 %s823_s16, %s1044_s19 }
   0x9   : > { %p78_p5 = scmp.eq.s32.totalorder %s579_s18, 0  ;;  %p62_p6 = scmp.eq.s32.totalorder %s61_s22, 0 }
   0xa   : > { %p696_p8 = scmp.lt.s32.totalorder %s827_s17, 4  ;;  %s171_s25 = sand.u32 1, %s815_s14  }
   0xb   : > { %p895_p7 = por %p78_p5, %p77_p4  ;;  %s595_s26 = sshll.u32 %s823_s16, 12 }
   0xc   : > { %s901_s24 = scalar_select %p62_p6, %s815_s14, %s64_s20  }
   0xd   : > { %s583_s27 = sshll.u32 %s171_s25, 8  ;;  %s908_s30 = scalar_lea.hbm %s1032_s1, %s595_s26 }
   0xe   : > { %s175_s4 = scalar_lea.vmem [#allocation2], %s583_s27  ;;  %p912_p9 = pnand %p696_p8, %p888_p3 }
   0xf   : > { %s182_s5 = sshll.u32 %s175_s4, 4  ;;  %s918_s7 = scalar_lea.sflag [#allocation3], %s171_s25  ;;  %s916_s5 = int_to_ptr.vmem [resolvable:$true] %s182_s5 }
  0x10   : > { %s747_s8 = scalar_lea.hbm %s908_s30, 4096  ;;  %p749_p11 = pneg %p912_p9 }
  0x11   : > { %p748_p10 = scmp.ne.s32.totalorder %s908_s30, %s747_s8  ;;  %s752_s11 = scalar_lea.hbm %s1032_s1, 16384 }
  0x12   : > { %p753_p0 = scmp.lt.u32.totalorder %s908_s30, %s1032_s1  ;;  %p754_p1 = scmp.lt.u32.totalorder %s752_s11, %s747_s8 }
  0x13   : > { %p750_p12 = pnand %p749_p11, %p748_p10  ;;  %p756_p3 = scmp.lt.u32.totalorder %s747_s8, %s908_s30 }
  0x14   : > { %p755_p2 = por %p754_p1, %p753_p0 }
  0x15   : > { %p751_p13 = pneg %p750_p12 }
  0x16   : > { %p757_p4 = por %p756_p3, %p755_p2 }
  0x18   : > { %p758_p5 = pnand %p757_p4, %p751_p13 }
  0x1a   : > { %761 = shalt.err (!%p758_p5)
}
  0x1b   : > { %s762_s20 = scalar_lea.vmem %s916_s5, 4096  ;;  %s829_s21 = smov [#allocation2]  }
  0x1c   : > { %p763_p6 = scmp.ne.s32.totalorder %s916_s5, %s762_s20  ;;  %s767_s22 = sshll.u32 %s829_s21, 4  ;;  %s768_s22 = int_to_ptr.vmem [resolvable:$false] %s767_s22 }
  0x1d   : > { %s769_s25 = scalar_lea.vmem %s768_s22, 8192  ;;  %p770_p12 = scmp.lt.s32.totalorder %s916_s5, %s768_s22 }
  0x1e   : > { %p765_p8 = pnand %p763_p6, %p749_p11  ;;  %p771_p0 = scmp.lt.s32.totalorder %s769_s25, %s762_s20 }
  0x20   : > { %p766_p10 = pneg %p765_p8  ;;  %p772_p1 = por %p771_p0, %p770_p12 }
  0x22   : > { %p773_p2 = pnand %p772_p1, %p766_p10 }
  0x24   : > { %776 = shalt.err (!%p773_p2)
}
  0x25   : > { %s830_s26 = smov 128   ;;  %s831_s27 = smov 8  }
  0x26   : > { %695 = dma.hbm_to_vmem [thread:$0]  (!%p912_p9), %s908_s30, 4096, %s916_s5, %s918_s7, %s830_s26, %s830_s26, %s831_s27  }
  0x27   : > { %p586_p11 = scmp.ge.s32.totalorder %s827_s17, 1  ;;  %p190_p13 = scmp.lt.s32.totalorder %s827_s17, 5 }
  0x29   : > { %p191_p3 = pnand %p586_p11, %p190_p13 }
  0x2a   : > { %s196_s28 = sand.u32 (!%p191_p3), 1, %s811_s13  }
  0x2b   : > { %194 = sbr.rel (%p191_p3) target bundleno = 326 (0x146), region = 28  ;;  %s587_s29 = sshll.u32 (!%p191_p3), %s196_s28, 8 }
  0x2c   : > { %s197_s4 = scalar_lea.sflag (!%p191_p3), [#allocation3], %s196_s28  ;;  %s949_s8 = scalar_lea.vmem (!%p191_p3), [#allocation2], %s587_s29 }
  0x32   : > { %802 = dma.done.wait (%p895_p7), %s197_s4, 4096  }
  0x33   : > { %804 = vsyncadd (%p895_p7), %s197_s4, 4294963200  ;;  %p245_p9 = scmp.lt.s32.totalorder %s819_s15, 3  ;;  %v296_v0 = vld [vmem:[%s949_s8 + $0x80] sm:$0xff]  ;;  %v297_v1 = vld [vmem:[%s949_s8 + $0x88] sm:$0xff] }
  0x34   : > { %v280_v2 = vld [vmem:[%s949_s8] sm:$0xff]  ;;  %v642_v3 = vpack.c.bf16 %v297_v1, %v296_v0  ;;  %v281_v4 = vld [vmem:[%s949_s8 + $0x8] sm:$0xff]  ;;  %v298_v5 = vld [vmem:[%s949_s8 + $0x90] sm:$0xff] }
  0x35   : > { %s1046_s15 = smov (!%p245_p9, %s819_s15), 3  ;;  %v299_v6 = vld [vmem:[%s949_s8 + $0x98] sm:$0xff]  ;;  %v644_v7 = vpack.c.bf16 %v281_v4, %v280_v2  ;;  %v282_v9 = vld [vmem:[%s949_s8 + $0x10] sm:$0xff]  ;;  %v300_v11 = vld [vmem:[%s949_s8 + $0xa0] sm:$0xff] }
  0x36   : > { %v646_v8 = vpack.c.bf16 %v299_v6, %v298_v5  ;;  %v283_v10 = vld [vmem:[%s949_s8 + $0x18] sm:$0xff]  ;;  %643 = vmatprep.subr.bf16.mxu0 %v642_v3  ;;  %674 = vmatprep.subr.bf16.mxu1 %v642_v3  ;;  %v301_v12 = vld [vmem:[%s949_s8 + $0xa8] sm:$0xff]  ;;  %s596_s23 = sshll.u32 %s1046_s15, 6  ;;  %v284_v15 = vld [vmem:[%s949_s8 + $0x20] sm:$0xff]  ;;  %s597_s7 = sshll.u32 %s1046_s15, 5 }
  0x37   : > { %645 = vmatpush3.bf16.msra.mxu0 %v644_v7  ;;  %682 = vmatpush3.bf16.msra.mxu1 %v644_v7  ;;  %v648_v13 = vpack.c.bf16 %v283_v10, %v282_v9  ;;  %v650_v14 = vpack.c.bf16 %v301_v12, %v300_v11  ;;  %v285_v16 = vld [vmem:[%s949_s8 + $0x28] sm:$0xff]  ;;  %v302_v17 = vld [vmem:[%s949_s8 + $0xb0] sm:$0xff]  ;;  %v303_v18 = vld [vmem:[%s949_s8 + $0xb8] sm:$0xff]  ;;  %s977_s6 = scalar_lea.vmem %s1031_s0, %s596_s23  ;;  %s263_s11 = scalar_lea.vmem %s1033_s2, %s597_s7 }
  0x38   : > { %647 = vmatprep.subr.bf16.mxu0 %v646_v8  ;;  %675 = vmatprep.subr.bf16.mxu1 %v646_v8  ;;  %v652_v19 = vpack.c.bf16 %v285_v16, %v284_v15  ;;  %v654_v20 = vpack.c.bf16 %v303_v18, %v302_v17  ;;  %v286_v21 = vld [vmem:[%s949_s8 + $0x30] sm:$0xff]  ;;  %v287_v22 = vld [vmem:[%s949_s8 + $0x38] sm:$0xff]  ;;  %v304_v23 = vld [vmem:[%s949_s8 + $0xc0] sm:$0xff]  ;;  %s592_s12 = sshll.u32 %s1046_s15, 1 }
  0x39   : > { %v305_v24 = vld [vmem:[%s949_s8 + $0xc8] sm:$0xff]  ;;  %v656_v27 = vpack.c.bf16 %v287_v22, %v286_v21  ;;  %v288_v29 = vld [vmem:[%s949_s8 + $0x40] sm:$0xff]  ;;  %v306_v31 = vld [vmem:[%s949_s8 + $0xd0] sm:$0xff]  ;;  %s271_s21 = scalar_lea.vmem %s1034_s3, %s592_s12 }
  0x3a   : > { %v273_v25 = vld [vmem:[%s977_s6 + $0x8] sm:$0xff]  ;;  %v658_v28 = vpack.c.bf16 %v305_v24, %v304_v23  ;;  %v307_v32 = vld [vmem:[%s949_s8 + $0xd8] sm:$0xff]  ;;  %v290_v35 = vld [vmem:[%s949_s8 + $0x50] sm:$0xff] }
  0x3b   : > { %649 = vmatpush3.bf16.msra.mxu0 %v648_v13  ;;  %683 = vmatpush3.bf16.msra.mxu1 %v648_v13  ;;  %v277_v26 = vld [vmem:[%s977_s6 + $0x28] sm:$0xff]  ;;  %v662_v34 = vpack.c.bf16 %v307_v32, %v306_v31  ;;  %v291_v36 = vld [vmem:[%s949_s8 + $0x58] sm:$0xff]  ;;  %v308_v37 = vld [vmem:[%s949_s8 + $0xe0] sm:$0xff] }
  0x3c   : > { %651 = vmatprep.subr.bf16.mxu0 %v650_v14  ;;  %676 = vmatprep.subr.bf16.mxu1 %v650_v14  ;;  %v289_v30 = vld [vmem:[%s949_s8 + $0x48] sm:$0xff]  ;;  %v664_v39 = vpack.c.bf16 %v291_v36, %v290_v35  ;;  %v292_v41 = vld [vmem:[%s949_s8 + $0x60] sm:$0xff]  ;;  %v310_v43 = vld [vmem:[%s949_s8 + $0xf0] sm:$0xff] }
  0x3d   : > { %376 = vmatprep.mubr.f32.mxu0 %v273_v25  ;;  %386 = vmatprep.mubr.f32.mxu1 %v277_v26  ;;  %v660_v33 = vpack.c.bf16 %v289_v30, %v288_v29  ;;  %v309_v38 = vld [vmem:[%s949_s8 + $0xe8] sm:$0xff]  ;;  %v311_v44 = vld [vmem:[%s949_s8 + $0xf8] sm:$0xff]  ;;  %v294_v47 = vld [vmem:[%s949_s8 + $0x70] sm:$0xff] }
  0x3e   : > { %v666_v40 = vpack.c.bf16 %v309_v38, %v308_v37  ;;  %v293_v42 = vld [vmem:[%s949_s8 + $0x68] sm:$0xff]  ;;  %v670_v46 = vpack.c.bf16 %v311_v44, %v310_v43  ;;  %v295_v48 = vld [vmem:[%s949_s8 + $0x78] sm:$0xff]  ;;  %v272_v50 = vld [vmem:[%s977_s6] sm:$0xff] }
  0x3f   : > { %653 = vmatpush3.bf16.msra.mxu0 %v652_v19  ;;  %684 = vmatpush3.bf16.msra.mxu1 %v652_v19  ;;  %v668_v45 = vpack.c.bf16 %v293_v42, %v292_v41  ;;  %v672_v49 = vpack.c.bf16 %v295_v48, %v294_v47  ;;  %v276_v51 = vld [vmem:[%s977_s6 + $0x20] sm:$0xff]  ;;  %v275_v52 = vld [vmem:[%s977_s6 + $0x18] sm:$0xff]  ;;  %v274_v54 = vld [vmem:[%s977_s6 + $0x10] sm:$0xff] }
  0x40   : > { %655 = vmatprep.subr.bf16.mxu0 %v654_v20  ;;  %677 = vmatprep.subr.bf16.mxu1 %v654_v20  ;;  %v279_v53 = vld [vmem:[%s977_s6 + $0x38] sm:$0xff]  ;;  %v278_v55 = vld [vmem:[%s977_s6 + $0x30] sm:$0xff] }
  0x43   : > { %657 = vmatpush3.bf16.msra.mxu0 %v656_v27  ;;  %685 = vmatpush3.bf16.msra.mxu1 %v656_v27 }
  0x44   : > { %659 = vmatprep.subr.bf16.mxu0 %v658_v28  ;;  %678 = vmatprep.subr.bf16.mxu1 %v658_v28 }
  0x47   : > { %661 = vmatpush3.bf16.msra.mxu0 %v660_v33  ;;  %686 = vmatpush3.bf16.msra.mxu1 %v660_v33 }
  0x48   : > { %663 = vmatprep.subr.bf16.mxu0 %v662_v34  ;;  %679 = vmatprep.subr.bf16.mxu1 %v662_v34 }
  0x4b   : > { %665 = vmatpush3.bf16.msra.mxu0 %v664_v39  ;;  %687 = vmatpush3.bf16.msra.mxu1 %v664_v39 }
  0x4c   : > { %667 = vmatprep.subr.bf16.mxu0 %v666_v40  ;;  %680 = vmatprep.subr.bf16.mxu1 %v666_v40 }
  0x4f   : > { %669 = vmatpush3.bf16.msra.mxu0 %v668_v45  ;;  %688 = vmatpush3.bf16.msra.mxu1 %v668_v45 }
  0x50   : > { %671 = vmatprep.subr.bf16.mxu0 %v670_v46  ;;  %681 = vmatprep.subr.bf16.mxu1 %v670_v46 }
  0x53   : > { %673 = vmatpush3.bf16.msra.mxu0 %v672_v49  ;;  %689 = vmatpush3.bf16.msra.mxu1 %v672_v49 }
  0x56   : > { %377 = vmatmul.mubr.f32.vlgmr.msra.gmra.mrb[0].mxu0 %v272_v50  ;;  %387 = vmatmul.mubr.f32.vlgmr.msra.gmra.mrb[0].mxu1 %v276_v51 }
  0x57   : > { %381 = vmatprep.mubr.f32.mxu0 %v275_v52  ;;  %391 = vmatprep.mubr.f32.mxu1 %v279_v53 }
  0x5a   : > { %382 = vmatmul.mubr.f32.gmra.mrb[2].mxu0 %v274_v54  ;;  %392 = vmatmul.mubr.f32.gmra.mrb[2].mxu1 %v278_v55 }
 0x129   : > { %v630_v56 = vpop.f32.mrb[0].mxu0  ;;  %v636_v57 = vpop.f32.mrb[0].mxu1 }
 0x12a   : > { %v631_v58 = vpop.f32.mrb[1].mxu0  ;;  %v637_v59 = vpop.f32.mrb[1].mxu1 }
 0x12b   : > { %v632_v60 = vadd.f32 %v631_v58, %v630_v56  ;;  %v638_v61 = vadd.f32 %v637_v59, %v636_v57 }
 0x12d   : > { %397 = vst [vmem:[%s263_s11] sm:$0xff] %v632_v60  ;;  %v633_v62 = vpop.f32.mrb[2].mxu0  ;;  %399 = vst [vmem:[%s263_s11 + $0x10] sm:$0xff] %v638_v61  ;;  %v639_v63 = vpop.f32.mrb[2].mxu1  ;;  %v411_v4 = vmul.f32 %v632_v60, %v632_v60  ;;  %v413_v7 = vmul.f32 %v638_v61, %v638_v61 }
 0x12e   : > { %v634_v0 = vpop.f32.mrb[3].mxu0  ;;  %v640_v1 = vpop.f32.mrb[3].mxu1 }
 0x12f   : > { %v635_v2 = vadd.f32 %v634_v0, %v633_v62  ;;  %v641_v3 = vadd.f32 %v640_v1, %v639_v63 }
 0x131   : > { %398 = vst [vmem:[%s263_s11 + $0x8] sm:$0xff] %v635_v2  ;;  %v401_v5 = vadd.f32 %v635_v2, %v632_v60  ;;  %v412_v6 = vmul.f32 %v635_v2, %v635_v2  ;;  %400 = vst [vmem:[%s263_s11 + $0x18] sm:$0xff] %v641_v3  ;;  %v414_v10 = vmul.f32 %v641_v3, %v641_v3 }
 0x133   : > { %v415_v8 = vadd.f32 %v412_v6, %v411_v4  ;;  %v402_v9 = vadd.f32 %v638_v61, %v401_v5 }
 0x135   : > { %v403_v11 = vadd.f32 %v641_v3, %v402_v9  ;;  %v416_v12 = vadd.f32 %v415_v8, %v413_v7 }
 0x137   : > { %v404_v13 = vrot.slane %v403_v11, 4  ;;  %v417_v14 = vadd.f32 %v416_v12, %v414_v10 }
 0x139   : > { %v405_v15 = vadd.f32 %v404_v13, %v403_v11  ;;  %v418_v16 = vrot.slane %v417_v14, 4 }
 0x13b   : > { %v406_v17 = vrot.slane %v405_v15, 2  ;;  %v419_v18 = vadd.f32 %v418_v16, %v417_v14 }
 0x13d   : > { %v407_v19 = vadd.f32 %v406_v17, %v405_v15  ;;  %v420_v20 = vrot.slane %v419_v18, 2 }
 0x13f   : > { %v408_v21 = vrot.slane %v407_v19, 1  ;;  %v421_v22 = vadd.f32 %v420_v20, %v419_v18 }
 0x141   : > { %v409_v23 = vadd.f32 %v408_v21, %v407_v19  ;;  %v422_v24 = vrot.slane %v421_v22, 1 }
 0x143   : > { %410 = vst [vmem:[%s271_s21] sm:$0x1] %v409_v23  ;;  %v423_v25 = vadd.f32 %v422_v24, %v421_v22 }
 0x145   : > { %424 = vst [vmem:[%s271_s21 + $0x1] sm:$0x1] %v423_v25 }
 0x146 PF: > { %s17_s17 = sadd.s32 1, %s827_s17   ;;  %s1038_s12 = smov %s811_s13 }
 0x147   : > { %p14_p7 = scmp.ge.s32.totalorder %s17_s17, 6   ;;  %s1039_s13 = smov %s815_s14 }
 0x148   : > { %s1040_s14 = smov %s901_s24  ;;  %s1041_s15 = smov %s823_s16 }
 0x149   : > { %s1042_s16 = smov %s1044_s19  ;;  %16 = sbr.rel (!%p14_p7) target bundleno = 4 (0x4), region = 83 }
 0x150   :  { %475 = vsyncpa [#allocation3], 1 }
 0x151   :  { %477 = vsyncpa [#allocation3 + $0x1], 1 }

// kernel: _lambda_.12
= control target key start
LH: loop header
LB: loop body
LE: loop exit
PB: predicated region body
PF: predicated region fallthrough
CT: control target
= control target key end

     0   :  { %s414_s12 = smov 0   ;;  %s416_s13 = smov 0   ;;  %s453_s0 = inlined_call_operand.vmem [shape: f32[4,32,128], index: 0, kind: input, shape index: {}]   ;;  %s454_s1 = inlined_call_operand.vmem [shape: f32[1,128], index: 1, kind: input, shape index: {}]   ;;  %s455_s2 = inlined_call_operand.vmem [shape: f32[1,128], index: 2, kind: input, shape index: {}]   ;;  %s456_s3 = inlined_call_operand.vmem [shape: f32[4,32,128], index: 3, kind: output, shape index: {}]  }
   0x1   :  { %s418_s14 = smov 0  }
   0x2 LB: > { %s25_s15 = sadd.s32 1, %s388_s13  ;;  %p335_p0 = scmp.ge.s32.totalorder %s392_s14, 1  ;;  %s392_s14 = sphi %s418_s14, %s13_s14   ;;  %s388_s13 = sphi %s416_s13, %s458_s13   ;;  %s384_s12 = sphi %s414_s12, %s457_s12  }
   0x3   : > { %p27_p1 = scmp.ge.s32.totalorder %s25_s15, 4  ;;  %p158_p2 = scmp.lt.s32.totalorder %s392_s14, 5 }
   0x5   : > { %s460_s15 = smov (%p27_p1, %s25_s15), 0  ;;  %p159_p3 = pnand %p335_p0, %p158_p2 }
   0x6   : > { %p191_p4 = scmp.lt.s32.totalorder (!%p159_p3), %s384_s12, 3  ;;  %v340_v0 = vld [vmem:[%s454_s1] ss:$0 sm:$0xff] (!%p159_p3) }
   0x7   : > { %162 = sbr.rel (%p159_p3) target bundleno = 26 (0x1a), region = 32  ;;  %v341_v1 = vld [vmem:[%s455_s2] ss:$0 sm:$0xff] (!%p159_p3) }
   0xe   : > { %s462_s12 = smov (!%p191_p4, %s384_s12), 3 }
   0xf   : > { %s344_s16 = sshll.u32 %s462_s12, 5 }
  0x10   : > { %s198_s21 = scalar_lea.vmem %s453_s0, %s344_s16  ;;  %s208_s26 = scalar_lea.vmem %s456_s3, %s344_s16 }
  0x11   : > { %v210_v2 = vld [vmem:[%s198_s21] sm:$0xff]  ;;  %v211_v3 = vld [vmem:[%s198_s21 + $0x8] sm:$0xff]  ;;  %v212_v4 = vld [vmem:[%s198_s21 + $0x10] sm:$0xff] }
  0x12   : > { %v221_v5 = vmul.f32 %v340_v0, %v210_v2  ;;  %v222_v6 = vmul.f32 %v340_v0, %v211_v3  ;;  %v223_v7 = vmul.f32 %v340_v0, %v212_v4  ;;  %v213_v8 = vld [vmem:[%s198_s21 + $0x18] sm:$0xff] }
  0x13   : > { %v224_v9 = vmul.f32 %v340_v0, %v213_v8 }
  0x14   : > { %v232_v10 = vadd.f32 %v341_v1, %v221_v5  ;;  %v233_v11 = vadd.f32 %v341_v1, %v222_v6  ;;  %v234_v12 = vadd.f32 %v341_v1, %v223_v7 }
  0x15   : > { %v235_v13 = vadd.f32 %v341_v1, %v224_v9 }
  0x16   : > { %v236_v14 = vmax.f32 %v232_v10, 0.0  ;;  %v237_v15 = vmax.f32 %v233_v11, 0.0  ;;  %v238_v16 = vmax.f32 %v234_v12, 0.0 }
  0x17   : > { %v239_v17 = vmax.f32 %v235_v13, 0.0 }
  0x18   : > { %240 = vst [vmem:[%s208_s26] sm:$0xff] %v236_v14  ;;  %241 = vst [vmem:[%s208_s26 + $0x8] sm:$0xff] %v237_v15 }
  0x19   : > { %242 = vst [vmem:[%s208_s26 + $0x10] sm:$0xff] %v238_v16  ;;  %243 = vst [vmem:[%s208_s26 + $0x18] sm:$0xff] %v239_v17 }
  0x1a PF: > { %s13_s14 = sadd.s32 1, %s392_s14   ;;  %s457_s12 = smov %s388_s13 }
  0x1b   : > { %p10_p5 = scmp.ge.s32.totalorder %s13_s14, 6   ;;  %s458_s13 = smov %s460_s15 }
  0x1d   :  { %12 = sbr.rel (!%p10_p5) target bundleno = 2 (0x2), region = 62 }

// kernel: _lambda_.14
= control target key start
LH: loop header
LB: loop body
LE: loop exit
PB: predicated region body
PF: predicated region fallthrough
CT: control target
= control target key end

     0   :  { %s474_s12 = smov 0   ;;  %s476_s13 = smov 0   ;;  %s585_s0 = inlined_call_operand.vmem [shape: f32[4,128,128], index: 0, kind: input, shape index: {}]   ;;  %s586_s1 = inlined_call_operand.vmem [shape: f32[1,128], index: 1, kind: input, shape index: {}]   ;;  %s587_s2 = inlined_call_operand.vmem [shape: f32[1,128], index: 2, kind: input, shape index: {}]   ;;  %s588_s3 = inlined_call_operand.vmem [shape: f32[4,128,128], index: 3, kind: output, shape index: {}]  }
   0x1   :  { %s478_s14 = smov 0  }
   0x2 LB: > { %s25_s15 = sadd.s32 1, %s448_s13  ;;  %p395_p0 = scmp.ge.s32.totalorder %s452_s14, 1  ;;  %s452_s14 = sphi %s478_s14, %s13_s14   ;;  %s448_s13 = sphi %s476_s13, %s590_s13   ;;  %s444_s12 = sphi %s474_s12, %s589_s12  }
   0x3   : > { %p27_p1 = scmp.ge.s32.totalorder %s25_s15, 4  ;;  %p158_p2 = scmp.lt.s32.totalorder %s452_s14, 5 }
   0x5   : > { %s592_s15 = smov (%p27_p1, %s25_s15), 0  ;;  %p159_p3 = pnand %p395_p0, %p158_p2 }
   0x6   : > { %p191_p4 = scmp.lt.s32.totalorder (!%p159_p3), %s444_s12, 3  ;;  %v495_v0 = vld [vmem:[%s586_s1] ss:$0 sm:$0xff] (!%p159_p3) }
   0x7   : > { %162 = sbr.rel (%p159_p3) target bundleno = 35 (0x23), region = 32  ;;  %v505_v1 = vld [vmem:[%s587_s2] ss:$0 sm:$0xff] (!%p159_p3) }
   0xe   : > { %s594_s12 = smov (!%p191_p4, %s444_s12), 3 }
   0xf   : > { %s404_s16 = sshll.u32 %s594_s12, 7 }
  0x10   : > { %s500_s21 = scalar_lea.vmem %s585_s0, %s404_s16  ;;  %s528_s26 = scalar_lea.vmem %s588_s3, %s404_s16 }
  0x11   : > { %v210_v2 = vld [vmem:[%s500_s21] sm:$0xff]  ;;  %v211_v3 = vld [vmem:[%s500_s21 + $0x8] sm:$0xff]  ;;  %v212_v4 = vld [vmem:[%s500_s21 + $0x10] sm:$0xff] }
  0x12   : > { %v233_v5 = vmul.f32 %v495_v0, %v210_v2  ;;  %v234_v6 = vmul.f32 %v495_v0, %v211_v3  ;;  %v235_v7 = vmul.f32 %v495_v0, %v212_v4  ;;  %v213_v8 = vld [vmem:[%s500_s21 + $0x18] sm:$0xff]  ;;  %v214_v9 = vld [vmem:[%s500_s21 + $0x20] sm:$0xff]  ;;  %v215_v10 = vld [vmem:[%s500_s21 + $0x28] sm:$0xff] }
  0x13   : > { %v236_v11 = vmul.f32 %v495_v0, %v213_v8  ;;  %v237_v12 = vmul.f32 %v495_v0, %v214_v9  ;;  %v238_v13 = vmul.f32 %v495_v0, %v215_v10  ;;  %v216_v14 = vld [vmem:[%s500_s21 + $0x30] sm:$0xff]  ;;  %v217_v15 = vld [vmem:[%s500_s21 + $0x38] sm:$0xff]  ;;  %v218_v24 = vld [vmem:[%s500_s21 + $0x40] sm:$0xff] }
  0x14   : > { %v256_v16 = vadd.f32 %v505_v1, %v233_v5  ;;  %v257_v17 = vadd.f32 %v505_v1, %v234_v6  ;;  %v258_v18 = vadd.f32 %v505_v1, %v235_v7  ;;  %v239_v19 = vmul.f32 %v495_v0, %v216_v14  ;;  %v219_v25 = vld [vmem:[%s500_s21 + $0x48] sm:$0xff]  ;;  %v220_v26 = vld [vmem:[%s500_s21 + $0x50] sm:$0xff]  ;;  %v221_v31 = vld [vmem:[%s500_s21 + $0x58] sm:$0xff] }
  0x15   : > { %v259_v20 = vadd.f32 %v505_v1, %v236_v11  ;;  %v260_v21 = vadd.f32 %v505_v1, %v237_v12  ;;  %v261_v22 = vadd.f32 %v505_v1, %v238_v13  ;;  %v240_v23 = vmul.f32 %v495_v0, %v217_v15  ;;  %v222_v32 = vld [vmem:[%s500_s21 + $0x60] sm:$0xff]  ;;  %v223_v33 = vld [vmem:[%s500_s21 + $0x68] sm:$0xff]  ;;  %v224_v38 = vld [vmem:[%s500_s21 + $0x70] sm:$0xff] }
  0x16   : > { %v272_v27 = vmax.f32 %v256_v16, 0.0  ;;  %v273_v28 = vmax.f32 %v257_v17, 0.0  ;;  %v274_v29 = vmax.f32 %v258_v18, 0.0  ;;  %v262_v30 = vadd.f32 %v505_v1, %v239_v19  ;;  %v225_v43 = vld [vmem:[%s500_s21 + $0x78] sm:$0xff] }
  0x17   : > { %v275_v34 = vmax.f32 %v259_v20, 0.0  ;;  %v276_v35 = vmax.f32 %v260_v21, 0.0  ;;  %v277_v36 = vmax.f32 %v261_v22, 0.0  ;;  %v263_v37 = vadd.f32 %v505_v1, %v240_v23 }
  0x18   : > { %288 = vst [vmem:[%s528_s26] sm:$0xff] %v272_v27  ;;  %289 = vst [vmem:[%s528_s26 + $0x8] sm:$0xff] %v273_v28  ;;  %v278_v39 = vmax.f32 %v262_v30, 0.0  ;;  %v241_v40 = vmul.f32 %v495_v0, %v218_v24  ;;  %v242_v41 = vmul.f32 %v495_v0, %v219_v25  ;;  %v243_v42 = vmul.f32 %v495_v0, %v220_v26 }
  0x19   : > { %290 = vst [vmem:[%s528_s26 + $0x10] sm:$0xff] %v274_v29  ;;  %291 = vst [vmem:[%s528_s26 + $0x18] sm:$0xff] %v275_v34  ;;  %v279_v44 = vmax.f32 %v263_v37, 0.0  ;;  %v244_v45 = vmul.f32 %v495_v0, %v221_v31  ;;  %v245_v46 = vmul.f32 %v495_v0, %v222_v32  ;;  %v246_v47 = vmul.f32 %v495_v0, %v223_v33 }
  0x1a   : > { %292 = vst [vmem:[%s528_s26 + $0x20] sm:$0xff] %v276_v35  ;;  %293 = vst [vmem:[%s528_s26 + $0x28] sm:$0xff] %v277_v36  ;;  %v264_v48 = vadd.f32 %v505_v1, %v241_v40  ;;  %v265_v49 = vadd.f32 %v505_v1, %v242_v41  ;;  %v266_v50 = vadd.f32 %v505_v1, %v243_v42 }
  0x1b   : > { %294 = vst [vmem:[%s528_s26 + $0x30] sm:$0xff] %v278_v39  ;;  %v247_v51 = vmul.f32 %v495_v0, %v224_v38  ;;  %295 = vst [vmem:[%s528_s26 + $0x38] sm:$0xff] %v279_v44  ;;  %v267_v52 = vadd.f32 %v505_v1, %v244_v45  ;;  %v268_v53 = vadd.f32 %v505_v1, %v245_v46 }
  0x1c   : > { %v269_v54 = vadd.f32 %v505_v1, %v246_v47  ;;  %v248_v55 = vmul.f32 %v495_v0, %v225_v43  ;;  %v280_v56 = vmax.f32 %v264_v48, 0.0  ;;  %v281_v57 = vmax.f32 %v265_v49, 0.0 }
  0x1d   : > { %v282_v58 = vmax.f32 %v266_v50, 0.0  ;;  %v270_v59 = vadd.f32 %v505_v1, %v247_v51  ;;  %v283_v60 = vmax.f32 %v267_v52, 0.0  ;;  %v284_v61 = vmax.f32 %v268_v53, 0.0 }
  0x1e   : > { %v285_v62 = vmax.f32 %v269_v54, 0.0  ;;  %v271_v63 = vadd.f32 %v505_v1, %v248_v55  ;;  %296 = vst [vmem:[%s528_s26 + $0x40] sm:$0xff] %v280_v56  ;;  %297 = vst [vmem:[%s528_s26 + $0x48] sm:$0xff] %v281_v57 }
  0x1f   : > { %298 = vst [vmem:[%s528_s26 + $0x50] sm:$0xff] %v282_v58  ;;  %v286_v2 = vmax.f32 %v270_v59, 0.0  ;;  %299 = vst [vmem:[%s528_s26 + $0x58] sm:$0xff] %v283_v60 }
  0x20   : > { %300 = vst [vmem:[%s528_s26 + $0x60] sm:$0xff] %v284_v61  ;;  %301 = vst [vmem:[%s528_s26 + $0x68] sm:$0xff] %v285_v62  ;;  %v287_v0 = vmax.f32 %v271_v63, 0.0 }
  0x21   : > { %302 = vst [vmem:[%s528_s26 + $0x70] sm:$0xff] %v286_v2 }
  0x22   : > { %303 = vst [vmem:[%s528_s26 + $0x78] sm:$0xff] %v287_v0 }
  0x23 PF: > { %s13_s14 = sadd.s32 1, %s452_s14   ;;  %s589_s12 = smov %s448_s13 }
  0x24   : > { %p10_p5 = scmp.ge.s32.totalorder %s13_s14, 6   ;;  %s590_s13 = smov %s592_s15 }
  0x26   :  { %12 = sbr.rel (!%p10_p5) target bundleno = 2 (0x2), region = 62 }

// kernel: _lambda_.13
= control target key start
LH: loop header
LB: loop body
LE: loop exit
PB: predicated region body
PF: predicated region fallthrough
CT: control target
= control target key end

     0   :  { %s863_s12 = smov 0   ;;  %s865_s13 = smov 0   ;;  %s965_s0 = inlined_call_operand.vmem [shape: f32[4,128,128], index: 0, kind: input, shape index: {}]   ;;  %s966_s1 = inlined_call_operand.vmem [shape: f32[4,128,128], index: 1, kind: input, shape index: {}]   ;;  %s967_s2 = inlined_call_operand.vmem [shape: f32[4,128,128], index: 2, kind: output, shape index: {0}]   ;;  %s968_s3 = inlined_call_operand.vmem [shape: f32[4,1,2,128], index: 3, kind: output, shape index: {1}]  }
   0x1   :  { %s867_s14 = smov 0  }
   0x2 LB: > { %s26_s15 = sadd.s32 1, %s837_s13  ;;  %p646_p0 = scmp.ge.s32.totalorder %s841_s14, 1  ;;  %s841_s14 = sphi %s867_s14, %s14_s14   ;;  %s837_s13 = sphi %s865_s13, %s970_s13   ;;  %s833_s12 = sphi %s863_s12, %s969_s12  }
   0x3   : > { %p28_p1 = scmp.ge.s32.totalorder %s26_s15, 4  ;;  %p173_p2 = scmp.lt.s32.totalorder %s841_s14, 5 }
   0x5   : > { %s972_s15 = smov (%p28_p1, %s26_s15), 0  ;;  %p174_p3 = pnand %p646_p0, %p173_p2 }
   0x6   : > { %p218_p4 = scmp.lt.s32.totalorder (!%p174_p3), %s833_s12, 3 }
   0x7   : > { %177 = sbr.rel (%p174_p3) target bundleno = 312 (0x138), region = 28 }
   0xe   : > { %s974_s12 = smov (!%p218_p4, %s833_s12), 3 }
   0xf   : > { %s884_s16 = sshll.u32 %s974_s12, 7  ;;  %s653_s26 = sshll.u32 %s974_s12, 1 }
  0x10   : > { %s890_s19 = scalar_lea.vmem %s966_s1, %s884_s16  ;;  %s902_s22 = scalar_lea.vmem %s965_s0, %s884_s16 }
  0x11   : > { %v265_v0 = vld [vmem:[%s890_s19] sm:$0xff]  ;;  %v266_v1 = vld [vmem:[%s890_s19 + $0x8] sm:$0xff]  ;;  %v267_v2 = vld [vmem:[%s890_s19 + $0x10] sm:$0xff]  ;;  %s934_s25 = scalar_lea.vmem %s967_s2, %s884_s16  ;;  %s248_s29 = scalar_lea.vmem %s968_s3, %s653_s26 }
  0x12   : > { %v747_v3 = vpack.c.bf16 %v266_v1, %v265_v0  ;;  %v268_v4 = vld [vmem:[%s890_s19 + $0x18] sm:$0xff]  ;;  %v269_v6 = vld [vmem:[%s890_s19 + $0x20] sm:$0xff]  ;;  %v270_v7 = vld [vmem:[%s890_s19 + $0x28] sm:$0xff] }
  0x13   : > { %v751_v5 = vpack.c.bf16 %v268_v4, %v267_v2  ;;  %v755_v8 = vpack.c.bf16 %v270_v7, %v269_v6  ;;  %v249_v9 = vld [vmem:[%s902_s22] sm:$0xff]  ;;  %v271_v10 = vld [vmem:[%s890_s19 + $0x30] sm:$0xff]  ;;  %v272_v11 = vld [vmem:[%s890_s19 + $0x38] sm:$0xff] }
  0x14   : > { %748 = vmatprep.subr.bf16.mxu0 %v747_v3  ;;  %779 = vmatprep.subr.bf16.mxu1 %v747_v3  ;;  %v257_v12 = vld [vmem:[%s902_s22 + $0x40] sm:$0xff]  ;;  %v759_v13 = vpack.c.bf16 %v272_v11, %v271_v10  ;;  %v274_v15 = vld [vmem:[%s890_s19 + $0x48] sm:$0xff]  ;;  %v275_v17 = vld [vmem:[%s890_s19 + $0x50] sm:$0xff] }
  0x15   : > { %750 = vmatpush3.bf16.msra.mxu0 %v747_v3  ;;  %787 = vmatpush3.bf16.msra.mxu1 %v747_v3  ;;  %v273_v14 = vld [vmem:[%s890_s19 + $0x40] sm:$0xff]  ;;  %v276_v18 = vld [vmem:[%s890_s19 + $0x58] sm:$0xff]  ;;  %v278_v21 = vld [vmem:[%s890_s19 + $0x68] sm:$0xff] }
  0x16   : > { %752 = vmatprep.subr.bf16.mxu0 %v751_v5  ;;  %780 = vmatprep.subr.bf16.mxu1 %v751_v5  ;;  %v763_v16 = vpack.c.bf16 %v274_v15, %v273_v14  ;;  %v767_v19 = vpack.c.bf16 %v276_v18, %v275_v17  ;;  %v277_v20 = vld [vmem:[%s890_s19 + $0x60] sm:$0xff]  ;;  %v279_v23 = vld [vmem:[%s890_s19 + $0x70] sm:$0xff]  ;;  %v280_v24 = vld [vmem:[%s890_s19 + $0x78] sm:$0xff] }
  0x17   : > { %723 = vmatprep.mubr.f32.mxu0 %v249_v9  ;;  %735 = vmatprep.mubr.f32.mxu1 %v257_v12  ;;  %v771_v22 = vpack.c.bf16 %v278_v21, %v277_v20  ;;  %v775_v25 = vpack.c.bf16 %v280_v24, %v279_v23  ;;  %v250_v26 = vld [vmem:[%s902_s22 + $0x8] sm:$0xff]  ;;  %v251_v28 = vld [vmem:[%s902_s22 + $0x10] sm:$0xff]  ;;  %v252_v30 = vld [vmem:[%s902_s22 + $0x18] sm:$0xff] }
  0x18   : > { %v258_v27 = vld [vmem:[%s902_s22 + $0x48] sm:$0xff]  ;;  %v259_v29 = vld [vmem:[%s902_s22 + $0x50] sm:$0xff]  ;;  %v260_v31 = vld [vmem:[%s902_s22 + $0x58] sm:$0xff] }
  0x19   : > { %754 = vmatpush3.bf16.msra.mxu0 %v751_v5  ;;  %788 = vmatpush3.bf16.msra.mxu1 %v751_v5  ;;  %v253_v32 = vld [vmem:[%s902_s22 + $0x20] sm:$0xff]  ;;  %v254_v34 = vld [vmem:[%s902_s22 + $0x28] sm:$0xff]  ;;  %v255_v36 = vld [vmem:[%s902_s22 + $0x30] sm:$0xff] }
  0x1a   : > { %756 = vmatprep.subr.bf16.mxu0 %v755_v8  ;;  %781 = vmatprep.subr.bf16.mxu1 %v755_v8  ;;  %v261_v33 = vld [vmem:[%s902_s22 + $0x60] sm:$0xff]  ;;  %v262_v35 = vld [vmem:[%s902_s22 + $0x68] sm:$0xff]  ;;  %v263_v37 = vld [vmem:[%s902_s22 + $0x70] sm:$0xff] }
  0x1b   : > { %v256_v38 = vld [vmem:[%s902_s22 + $0x38] sm:$0xff] }
  0x1c   : > { %v264_v39 = vld [vmem:[%s902_s22 + $0x78] sm:$0xff] }
  0x1d   : > { %758 = vmatpush3.bf16.msra.mxu0 %v755_v8  ;;  %789 = vmatpush3.bf16.msra.mxu1 %v755_v8 }
  0x1e   : > { %760 = vmatprep.subr.bf16.mxu0 %v759_v13  ;;  %782 = vmatprep.subr.bf16.mxu1 %v759_v13 }
  0x21   : > { %762 = vmatpush3.bf16.msra.mxu0 %v759_v13  ;;  %790 = vmatpush3.bf16.msra.mxu1 %v759_v13 }
  0x22   : > { %764 = vmatprep.subr.bf16.mxu0 %v763_v16  ;;  %783 = vmatprep.subr.bf16.mxu1 %v763_v16 }
  0x25   : > { %766 = vmatpush3.bf16.msra.mxu0 %v763_v16  ;;  %791 = vmatpush3.bf16.msra.mxu1 %v763_v16 }
  0x26   : > { %768 = vmatprep.subr.bf16.mxu0 %v767_v19  ;;  %784 = vmatprep.subr.bf16.mxu1 %v767_v19 }
  0x29   : > { %770 = vmatpush3.bf16.msra.mxu0 %v767_v19  ;;  %792 = vmatpush3.bf16.msra.mxu1 %v767_v19 }
  0x2a   : > { %772 = vmatprep.subr.bf16.mxu0 %v771_v22  ;;  %785 = vmatprep.subr.bf16.mxu1 %v771_v22 }
  0x2d   : > { %774 = vmatpush3.bf16.msra.mxu0 %v771_v22  ;;  %793 = vmatpush3.bf16.msra.mxu1 %v771_v22 }
  0x2e   : > { %776 = vmatprep.subr.bf16.mxu0 %v775_v25  ;;  %786 = vmatprep.subr.bf16.mxu1 %v775_v25 }
  0x31   : > { %778 = vmatpush3.bf16.msra.mxu0 %v775_v25  ;;  %794 = vmatpush3.bf16.msra.mxu1 %v775_v25 }
  0x34   : > { %724 = vmatmul.mubr.f32.vlgmr.msra.gmra.mrb[0].mxu0 %v250_v26  ;;  %736 = vmatmul.mubr.f32.vlgmr.msra.gmra.mrb[0].mxu1 %v258_v27 }
  0x35   : > { %726 = vmatprep.mubr.f32.mxu0 %v251_v28  ;;  %738 = vmatprep.mubr.f32.mxu1 %v259_v29 }
  0x38   : > { %727 = vmatmul.mubr.f32.gmra.mrb[2].mxu0 %v252_v30  ;;  %739 = vmatmul.mubr.f32.gmra.mrb[2].mxu1 %v260_v31 }
  0x39   : > { %729 = vmatprep.mubr.f32.mxu0 %v253_v32  ;;  %741 = vmatprep.mubr.f32.mxu1 %v261_v33 }
  0x3c   : > { %730 = vmatmul.mubr.f32.gmra.mrb[4].mxu0 %v254_v34  ;;  %742 = vmatmul.mubr.f32.gmra.mrb[4].mxu1 %v262_v35 }
  0x3d   : > { %732 = vmatprep.mubr.f32.mxu0 %v255_v36  ;;  %744 = vmatprep.mubr.f32.mxu1 %v263_v37 }
  0x40   : > { %733 = vmatmul.mubr.f32.gmra.mrb[6].mxu0 %v256_v38  ;;  %745 = vmatmul.mubr.f32.gmra.mrb[6].mxu1 %v264_v39 }
 0x107   : > { %v725_v40 = vpop.f32.mrb[0].mxu0  ;;  %v737_v41 = vpop.f32.mrb[0].mxu1 }
 0x108   : > { %427 = vst [vmem:[%s934_s25 + $0x8] sm:$0xff] %v725_v40  ;;  %v465_v42 = vmul.f32 %v725_v40, %v725_v40  ;;  %v347_v43 = vpop.f32.mrb[1].mxu0  ;;  %435 = vst [vmem:[%s934_s25 + $0x48] sm:$0xff] %v737_v41  ;;  %v387_v44 = vpop.f32.mrb[1].mxu1  ;;  %v473_v16 = vmul.f32 %v737_v41, %v737_v41 }
 0x109   : > { %426 = vst [vmem:[%s934_s25] sm:$0xff] %v347_v43  ;;  %v442_v45 = vadd.f32 %v725_v40, %v347_v43  ;;  %v464_v46 = vmul.f32 %v347_v43, %v347_v43  ;;  %434 = vst [vmem:[%s934_s25 + $0x40] sm:$0xff] %v387_v44  ;;  %v472_v13 = vmul.f32 %v387_v44, %v387_v44 }
 0x10b   : > { %v480_v47 = vadd.f32 %v465_v42, %v464_v46  ;;  %v728_v48 = vpop.f32.mrb[2].mxu0  ;;  %v740_v49 = vpop.f32.mrb[2].mxu1 }
 0x10c   : > { %429 = vst [vmem:[%s934_s25 + $0x18] sm:$0xff] %v728_v48  ;;  %v357_v50 = vpop.f32.mrb[3].mxu0  ;;  %437 = vst [vmem:[%s934_s25 + $0x58] sm:$0xff] %v740_v49  ;;  %v397_v51 = vpop.f32.mrb[3].mxu1  ;;  %v467_v54 = vmul.f32 %v728_v48, %v728_v48  ;;  %v475_v22 = vmul.f32 %v740_v49, %v740_v49 }
 0x10d   : > { %428 = vst [vmem:[%s934_s25 + $0x10] sm:$0xff] %v357_v50  ;;  %v443_v52 = vadd.f32 %v442_v45, %v357_v50  ;;  %v466_v53 = vmul.f32 %v357_v50, %v357_v50  ;;  %436 = vst [vmem:[%s934_s25 + $0x50] sm:$0xff] %v397_v51  ;;  %v474_v19 = vmul.f32 %v397_v51, %v397_v51 }
 0x10f   : > { %v481_v55 = vadd.f32 %v480_v47, %v466_v53  ;;  %v731_v56 = vpop.f32.mrb[4].mxu0  ;;  %v444_v57 = vadd.f32 %v728_v48, %v443_v52  ;;  %v743_v58 = vpop.f32.mrb[4].mxu1 }
 0x110   : > { %431 = vst [vmem:[%s934_s25 + $0x28] sm:$0xff] %v731_v56  ;;  %v367_v59 = vpop.f32.mrb[5].mxu0  ;;  %439 = vst [vmem:[%s934_s25 + $0x68] sm:$0xff] %v743_v58  ;;  %v407_v60 = vpop.f32.mrb[5].mxu1  ;;  %v469_v0 = vmul.f32 %v731_v56, %v731_v56  ;;  %v477_v28 = vmul.f32 %v743_v58, %v743_v58 }
 0x111   : > { %430 = vst [vmem:[%s934_s25 + $0x20] sm:$0xff] %v367_v59  ;;  %v445_v61 = vadd.f32 %v444_v57, %v367_v59  ;;  %v468_v62 = vmul.f32 %v367_v59, %v367_v59  ;;  %v482_v63 = vadd.f32 %v481_v55, %v467_v54  ;;  %438 = vst [vmem:[%s934_s25 + $0x60] sm:$0xff] %v407_v60 }
 0x112   : > { %v476_v25 = vmul.f32 %v407_v60, %v407_v60 }
 0x113   : > { %v483_v1 = vadd.f32 %v482_v63, %v468_v62  ;;  %v734_v2 = vpop.f32.mrb[6].mxu0  ;;  %v446_v3 = vadd.f32 %v731_v56, %v445_v61  ;;  %v746_v4 = vpop.f32.mrb[6].mxu1 }
 0x114   : > { %433 = vst [vmem:[%s934_s25 + $0x38] sm:$0xff] %v734_v2  ;;  %v377_v5 = vpop.f32.mrb[7].mxu0  ;;  %441 = vst [vmem:[%s934_s25 + $0x78] sm:$0xff] %v746_v4  ;;  %v417_v6 = vpop.f32.mrb[7].mxu1  ;;  %v471_v10 = vmul.f32 %v734_v2, %v734_v2  ;;  %v479_v34 = vmul.f32 %v746_v4, %v746_v4 }
 0x115   : > { %432 = vst [vmem:[%s934_s25 + $0x30] sm:$0xff] %v377_v5  ;;  %v447_v7 = vadd.f32 %v446_v3, %v377_v5  ;;  %v470_v8 = vmul.f32 %v377_v5, %v377_v5  ;;  %v484_v9 = vadd.f32 %v483_v1, %v469_v0  ;;  %440 = vst [vmem:[%s934_s25 + $0x70] sm:$0xff] %v417_v6 }
 0x116   : > { %v478_v31 = vmul.f32 %v417_v6, %v417_v6 }
 0x117   : > { %v448_v11 = vadd.f32 %v734_v2, %v447_v7  ;;  %v485_v12 = vadd.f32 %v484_v9, %v470_v8 }
 0x119   : > { %v486_v14 = vadd.f32 %v485_v12, %v471_v10  ;;  %v449_v15 = vadd.f32 %v448_v11, %v387_v44 }
 0x11b   : > { %v487_v17 = vadd.f32 %v486_v14, %v472_v13  ;;  %v450_v18 = vadd.f32 %v737_v41, %v449_v15 }
 0x11d   : > { %v451_v20 = vadd.f32 %v450_v18, %v397_v51  ;;  %v488_v21 = vadd.f32 %v487_v17, %v473_v16 }
 0x11f   : > { %v489_v23 = vadd.f32 %v488_v21, %v474_v19  ;;  %v452_v24 = vadd.f32 %v740_v49, %v451_v20 }
 0x121   : > { %v453_v26 = vadd.f32 %v452_v24, %v407_v60  ;;  %v490_v27 = vadd.f32 %v489_v23, %v475_v22 }
 0x123   : > { %v491_v29 = vadd.f32 %v490_v27, %v476_v25  ;;  %v454_v30 = vadd.f32 %v743_v58, %v453_v26 }
 0x125   : > { %v455_v32 = vadd.f32 %v454_v30, %v417_v6  ;;  %v492_v33 = vadd.f32 %v491_v29, %v477_v28 }
 0x127   : > { %v456_v35 = vadd.f32 %v746_v4, %v455_v32  ;;  %v493_v36 = vadd.f32 %v492_v33, %v478_v31 }
 0x129   : > { %v457_v37 = vrot.slane %v456_v35, 4  ;;  %v494_v38 = vadd.f32 %v493_v36, %v479_v34 }
 0x12b   : > { %v458_v39 = vadd.f32 %v457_v37, %v456_v35  ;;  %v495_v40 = vrot.slane %v494_v38, 4 }
 0x12d   : > { %v459_v41 = vrot.slane %v458_v39, 2  ;;  %v496_v42 = vadd.f32 %v495_v40, %v494_v38 }
 0x12f   : > { %v460_v43 = vadd.f32 %v459_v41, %v458_v39  ;;  %v497_v44 = vrot.slane %v496_v42, 2 }
 0x131   : > { %v461_v45 = vrot.slane %v460_v43, 1  ;;  %v498_v46 = vadd.f32 %v497_v44, %v496_v42 }
 0x133   : > { %v462_v47 = vadd.f32 %v461_v45, %v460_v43  ;;  %v499_v48 = vrot.slane %v498_v46, 1 }
 0x135   : > { %463 = vst [vmem:[%s248_s29] sm:$0x1] %v462_v47  ;;  %v500_v49 = vadd.f32 %v499_v48, %v498_v46 }
 0x137   : > { %501 = vst [vmem:[%s248_s29 + $0x1] sm:$0x1] %v500_v49 }
 0x138 PF: > { %s14_s14 = sadd.s32 1, %s841_s14   ;;  %s969_s12 = smov %s837_s13 }
 0x139   : > { %p11_p5 = scmp.ge.s32.totalorder %s14_s14, 6   ;;  %s970_s13 = smov %s972_s15 }
 0x13b   :  { %13 = sbr.rel (!%p11_p5) target bundleno = 2 (0x2), region = 73 }

// kernel: _lambda_.15
= control target key start
LH: loop header
LB: loop body
LE: loop exit
PB: predicated region body
PF: predicated region fallthrough
CT: control target
= control target key end

     0   :  { %s1664_s12 = smov 0   ;;  %s1666_s13 = smov 0   ;;  %s2100_s0 = inlined_call_operand.vmem [shape: f32[4,512,64], index: 0, kind: input, shape index: {}]   ;;  %s2101_s1 = inlined_call_operand.vmem [shape: f32[4,64,128], index: 1, kind: input, shape index: {}]   ;;  %s2102_s2 = inlined_call_operand.vmem [shape: f32[4,512,128], index: 2, kind: output, shape index: {0}]   ;;  %s2103_s3 = inlined_call_operand.vmem [shape: f32[4,1,2,128], index: 3, kind: output, shape index: {1}]  }
   0x1   :  { %s1668_s14 = smov 0  }
   0x2 LB: > { %s26_s15 = sadd.s32 1, %s1638_s13  ;;  %p1311_p0 = scmp.ge.s32.totalorder %s1642_s14, 1  ;;  %s1642_s14 = sphi %s1668_s14, %s14_s14   ;;  %s1638_s13 = sphi %s1666_s13, %s2105_s13   ;;  %s1634_s12 = sphi %s1664_s12, %s2104_s12  }
   0x3   : > { %p28_p1 = scmp.ge.s32.totalorder %s26_s15, 4  ;;  %p173_p2 = scmp.lt.s32.totalorder %s1642_s14, 5 }
   0x5   : > { %s2107_s15 = smov (%p28_p1, %s26_s15), 0  ;;  %p174_p3 = pnand %p1311_p0, %p173_p2 }
   0x6   : > { %p218_p4 = scmp.lt.s32.totalorder (!%p174_p3), %s1634_s12, 3  ;;  %vm321_vm0 = vcmask (!%p174_p3), 523264  }
   0x7   : > { %177 = sbr.rel (%p174_p3) target bundleno = 392 (0x188), region = 28 }
   0xe   : > { %s2109_s12 = smov (!%p218_p4, %s1634_s12), 3 }
   0xf   : > { %s1385_s16 = sshll.u32 %s2109_s12, 9  ;;  %s1386_s17 = sshll.u32 %s2109_s12, 6 }
  0x10   : > { %s1691_s20 = scalar_lea.vmem %s2100_s0, %s1385_s16  ;;  %s231_s23 = scalar_lea.vmem %s2101_s1, %s1386_s17 }
  0x11   : > { %v313_v0 = vld [vmem:[%s231_s23] sm:$0xff]  ;;  %v314_v1 = vld [vmem:[%s231_s23 + $0x8] sm:$0xff]  ;;  %v315_v2 = vld [vmem:[%s231_s23 + $0x10] sm:$0xff]  ;;  %s1829_s26 = scalar_lea.vmem %s2102_s2, %s1385_s16  ;;  %s1318_s27 = sshll.u32 %s2109_s12, 1 }
  0x12   : > { %v1572_v3 = vpack.c.bf16 %v314_v1, %v313_v0  ;;  %v316_v4 = vld [vmem:[%s231_s23 + $0x18] sm:$0xff]  ;;  %v317_v6 = vld [vmem:[%s231_s23 + $0x20] sm:$0xff]  ;;  %v318_v7 = vld [vmem:[%s231_s23 + $0x28] sm:$0xff]  ;;  %s248_s30 = scalar_lea.vmem %s2103_s3, %s1318_s27 }
  0x13   : > { %v1576_v5 = vpack.c.bf16 %v316_v4, %v315_v2  ;;  %v249_v8 = vld [vmem:[%s1691_s20] sm:$0xff]  ;;  %v1580_v9 = vpack.c.bf16 %v318_v7, %v317_v6  ;;  %v319_v10 = vld [vmem:[%s231_s23 + $0x30] sm:$0xff]  ;;  %v320_v11 = vld [vmem:[%s231_s23 + $0x38] sm:$0xff] }
  0x14   : > { %1573 = vmatprep.subr.bf16.mxu0 %v1572_v3  ;;  %1476 = vmatprep.mubr.msk.f32.mxu0 %vm321_vm0, %v249_v8  ;;  %v1584_v12 = vpack.c.bf16 %v320_v11, %v319_v10  ;;  %v281_v13 = vld [vmem:[%s1691_s20 + $0x100] sm:$0xff]  ;;  %v250_v14 = vld [vmem:[%s1691_s20 + $0x8] sm:$0xff]  ;;  %v251_v15 = vld [vmem:[%s1691_s20 + $0x10] sm:$0xff] }
  0x15   : > { %1575 = vmatpush3.bf16.msra.mxu0 %v1572_v3  ;;  %1588 = vmatprep.subr.bf16.mxu1 %v1572_v3  ;;  %v282_v16 = vld [vmem:[%s1691_s20 + $0x108] sm:$0xff]  ;;  %v283_v17 = vld [vmem:[%s1691_s20 + $0x110] sm:$0xff]  ;;  %v252_v18 = vld [vmem:[%s1691_s20 + $0x18] sm:$0xff] }
  0x16   : > { %1577 = vmatprep.subr.bf16.mxu0 %v1576_v5  ;;  %1592 = vmatpush3.bf16.msra.mxu1 %v1572_v3  ;;  %v253_v19 = vld [vmem:[%s1691_s20 + $0x20] sm:$0xff]  ;;  %v284_v20 = vld [vmem:[%s1691_s20 + $0x118] sm:$0xff]  ;;  %v254_v22 = vld [vmem:[%s1691_s20 + $0x28] sm:$0xff] }
  0x17   : > { %1589 = vmatprep.subr.bf16.mxu1 %v1576_v5  ;;  %1524 = vmatprep.mubr.msk.f32.mxu1 %vm321_vm0, %v281_v13  ;;  %v285_v21 = vld [vmem:[%s1691_s20 + $0x120] sm:$0xff]  ;;  %v255_v23 = vld [vmem:[%s1691_s20 + $0x30] sm:$0xff]  ;;  %v286_v24 = vld [vmem:[%s1691_s20 + $0x128] sm:$0xff] }
  0x18   : > { %v287_v25 = vld [vmem:[%s1691_s20 + $0x130] sm:$0xff]  ;;  %v256_v26 = vld [vmem:[%s1691_s20 + $0x38] sm:$0xff]  ;;  %v257_v27 = vld [vmem:[%s1691_s20 + $0x40] sm:$0xff] }
  0x19   : > { %1579 = vmatpush3.bf16.msra.mxu0 %v1576_v5  ;;  %v288_v28 = vld [vmem:[%s1691_s20 + $0x138] sm:$0xff]  ;;  %v289_v29 = vld [vmem:[%s1691_s20 + $0x140] sm:$0xff]  ;;  %v258_v30 = vld [vmem:[%s1691_s20 + $0x48] sm:$0xff] }
  0x1a   : > { %1581 = vmatprep.subr.bf16.mxu0 %v1580_v9  ;;  %1593 = vmatpush3.bf16.msra.mxu1 %v1576_v5  ;;  %v259_v31 = vld [vmem:[%s1691_s20 + $0x50] sm:$0xff]  ;;  %v290_v32 = vld [vmem:[%s1691_s20 + $0x148] sm:$0xff]  ;;  %v260_v34 = vld [vmem:[%s1691_s20 + $0x58] sm:$0xff] }
  0x1b   : > { %1590 = vmatprep.subr.bf16.mxu1 %v1580_v9  ;;  %v291_v33 = vld [vmem:[%s1691_s20 + $0x150] sm:$0xff]  ;;  %v261_v35 = vld [vmem:[%s1691_s20 + $0x60] sm:$0xff]  ;;  %v292_v36 = vld [vmem:[%s1691_s20 + $0x158] sm:$0xff] }
  0x1c   : > { %v293_v37 = vld [vmem:[%s1691_s20 + $0x160] sm:$0xff]  ;;  %v262_v38 = vld [vmem:[%s1691_s20 + $0x68] sm:$0xff]  ;;  %v263_v39 = vld [vmem:[%s1691_s20 + $0x70] sm:$0xff] }
  0x1d   : > { %1583 = vmatpush3.bf16.msra.mxu0 %v1580_v9  ;;  %v294_v40 = vld [vmem:[%s1691_s20 + $0x168] sm:$0xff]  ;;  %v295_v41 = vld [vmem:[%s1691_s20 + $0x170] sm:$0xff]  ;;  %v264_v42 = vld [vmem:[%s1691_s20 + $0x78] sm:$0xff] }
  0x1e   : > { %1585 = vmatprep.subr.bf16.mxu0 %v1584_v12  ;;  %1594 = vmatpush3.bf16.msra.mxu1 %v1580_v9  ;;  %v265_v43 = vld [vmem:[%s1691_s20 + $0x80] sm:$0xff]  ;;  %v296_v44 = vld [vmem:[%s1691_s20 + $0x178] sm:$0xff]  ;;  %v266_v46 = vld [vmem:[%s1691_s20 + $0x88] sm:$0xff] }
  0x1f   : > { %1591 = vmatprep.subr.bf16.mxu1 %v1584_v12  ;;  %v297_v45 = vld [vmem:[%s1691_s20 + $0x180] sm:$0xff]  ;;  %v267_v47 = vld [vmem:[%s1691_s20 + $0x90] sm:$0xff]  ;;  %v298_v48 = vld [vmem:[%s1691_s20 + $0x188] sm:$0xff] }
  0x20   : > { %v299_v49 = vld [vmem:[%s1691_s20 + $0x190] sm:$0xff]  ;;  %v268_v50 = vld [vmem:[%s1691_s20 + $0x98] sm:$0xff]  ;;  %v269_v51 = vld [vmem:[%s1691_s20 + $0xa0] sm:$0xff] }
  0x21   : > { %1587 = vmatpush3.bf16.msra.mxu0 %v1584_v12  ;;  %v300_v52 = vld [vmem:[%s1691_s20 + $0x198] sm:$0xff]  ;;  %v301_v53 = vld [vmem:[%s1691_s20 + $0x1a0] sm:$0xff]  ;;  %v270_v54 = vld [vmem:[%s1691_s20 + $0xa8] sm:$0xff] }
  0x22   : > { %1595 = vmatpush3.bf16.msra.mxu1 %v1584_v12  ;;  %v271_v55 = vld [vmem:[%s1691_s20 + $0xb0] sm:$0xff]  ;;  %v302_v56 = vld [vmem:[%s1691_s20 + $0x1a8] sm:$0xff]  ;;  %v272_v58 = vld [vmem:[%s1691_s20 + $0xb8] sm:$0xff] }
  0x23   : > { %v303_v57 = vld [vmem:[%s1691_s20 + $0x1b0] sm:$0xff]  ;;  %v273_v59 = vld [vmem:[%s1691_s20 + $0xc0] sm:$0xff]  ;;  %v304_v60 = vld [vmem:[%s1691_s20 + $0x1b8] sm:$0xff] }
  0x24   : > { %1477 = vmatmul.mubr.msk.f32.vlgmr.msra.gmra.mrb[0].mxu0 %vm321_vm0, %v250_v14  ;;  %v305_v61 = vld [vmem:[%s1691_s20 + $0x1c0] sm:$0xff]  ;;  %v274_v62 = vld [vmem:[%s1691_s20 + $0xc8] sm:$0xff]  ;;  %v275_v63 = vld [vmem:[%s1691_s20 + $0xd0] sm:$0xff] }
  0x25   : > { %1479 = vmatprep.mubr.msk.f32.mxu0 %vm321_vm0, %v251_v15  ;;  %1525 = vmatmul.mubr.msk.f32.vlgmr.msra.gmra.mrb[0].mxu1 %vm321_vm0, %v282_v16  ;;  %v306_v0 = vld [vmem:[%s1691_s20 + $0x1c8] sm:$0xff]  ;;  %v307_v1 = vld [vmem:[%s1691_s20 + $0x1d0] sm:$0xff]  ;;  %v276_v2 = vld [vmem:[%s1691_s20 + $0xd8] sm:$0xff] }
  0x26   : > { %1527 = vmatprep.mubr.msk.f32.mxu1 %vm321_vm0, %v283_v17  ;;  %v277_v3 = vld [vmem:[%s1691_s20 + $0xe0] sm:$0xff]  ;;  %v308_v4 = vld [vmem:[%s1691_s20 + $0x1d8] sm:$0xff]  ;;  %v278_v6 = vld [vmem:[%s1691_s20 + $0xe8] sm:$0xff] }
  0x27   : > { %v309_v5 = vld [vmem:[%s1691_s20 + $0x1e0] sm:$0xff]  ;;  %v279_v7 = vld [vmem:[%s1691_s20 + $0xf0] sm:$0xff]  ;;  %v310_v8 = vld [vmem:[%s1691_s20 + $0x1e8] sm:$0xff] }
  0x28   : > { %1480 = vmatmul.mubr.msk.f32.gmra.mrb[2].mxu0 %vm321_vm0, %v252_v18  ;;  %v311_v9 = vld [vmem:[%s1691_s20 + $0x1f0] sm:$0xff]  ;;  %v280_v10 = vld [vmem:[%s1691_s20 + $0xf8] sm:$0xff] }
  0x29   : > { %1482 = vmatprep.mubr.msk.f32.mxu0 %vm321_vm0, %v253_v19  ;;  %1528 = vmatmul.mubr.msk.f32.gmra.mrb[2].mxu1 %vm321_vm0, %v284_v20  ;;  %v312_v11 = vld [vmem:[%s1691_s20 + $0x1f8] sm:$0xff] }
  0x2a   : > { %1530 = vmatprep.mubr.msk.f32.mxu1 %vm321_vm0, %v285_v21 }
  0x2c   : > { %1483 = vmatmul.mubr.msk.f32.gmra.mrb[4].mxu0 %vm321_vm0, %v254_v22 }
  0x2d   : > { %1485 = vmatprep.mubr.msk.f32.mxu0 %vm321_vm0, %v255_v23  ;;  %1531 = vmatmul.mubr.msk.f32.gmra.mrb[4].mxu1 %vm321_vm0, %v286_v24 }
  0x2e   : > { %1533 = vmatprep.mubr.msk.f32.mxu1 %vm321_vm0, %v287_v25 }
  0x30   : > { %1486 = vmatmul.mubr.msk.f32.gmra.mrb[6].mxu0 %vm321_vm0, %v256_v26 }
  0x31   : > { %1488 = vmatprep.mubr.msk.f32.mxu0 %vm321_vm0, %v257_v27  ;;  %1534 = vmatmul.mubr.msk.f32.gmra.mrb[6].mxu1 %vm321_vm0, %v288_v28 }
  0x32   : > { %1536 = vmatprep.mubr.msk.f32.mxu1 %vm321_vm0, %v289_v29 }
  0x34   : > { %1489 = vmatmul.mubr.msk.f32.gmra.mrb[8].mxu0 %vm321_vm0, %v258_v30 }
  0x35   : > { %1491 = vmatprep.mubr.msk.f32.mxu0 %vm321_vm0, %v259_v31  ;;  %1537 = vmatmul.mubr.msk.f32.gmra.mrb[8].mxu1 %vm321_vm0, %v290_v32 }
  0x36   : > { %1539 = vmatprep.mubr.msk.f32.mxu1 %vm321_vm0, %v291_v33 }
  0x38   : > { %1492 = vmatmul.mubr.msk.f32.gmra.mrb[10].mxu0 %vm321_vm0, %v260_v34 }
  0x39   : > { %1494 = vmatprep.mubr.msk.f32.mxu0 %vm321_vm0, %v261_v35  ;;  %1540 = vmatmul.mubr.msk.f32.gmra.mrb[10].mxu1 %vm321_vm0, %v292_v36 }
  0x3a   : > { %1542 = vmatprep.mubr.msk.f32.mxu1 %vm321_vm0, %v293_v37 }
  0x3c   : > { %1495 = vmatmul.mubr.msk.f32.gmra.mrb[12].mxu0 %vm321_vm0, %v262_v38 }
  0x3d   : > { %1497 = vmatprep.mubr.msk.f32.mxu0 %vm321_vm0, %v263_v39  ;;  %1543 = vmatmul.mubr.msk.f32.gmra.mrb[12].mxu1 %vm321_vm0, %v294_v40 }
  0x3e   : > { %1545 = vmatprep.mubr.msk.f32.mxu1 %vm321_vm0, %v295_v41 }
  0x40   : > { %1498 = vmatmul.mubr.msk.f32.gmra.mrb[14].mxu0 %vm321_vm0, %v264_v42 }
  0x41   : > { %1500 = vmatprep.mubr.msk.f32.mxu0 %vm321_vm0, %v265_v43  ;;  %1546 = vmatmul.mubr.msk.f32.gmra.mrb[14].mxu1 %vm321_vm0, %v296_v44 }
  0x42   : > { %1548 = vmatprep.mubr.msk.f32.mxu1 %vm321_vm0, %v297_v45 }
  0x44   : > { %1501 = vmatmul.mubr.msk.f32.gmra.mrb[16].mxu0 %vm321_vm0, %v266_v46 }
  0x45   : > { %1503 = vmatprep.mubr.msk.f32.mxu0 %vm321_vm0, %v267_v47  ;;  %1549 = vmatmul.mubr.msk.f32.gmra.mrb[16].mxu1 %vm321_vm0, %v298_v48 }
  0x46   : > { %1551 = vmatprep.mubr.msk.f32.mxu1 %vm321_vm0, %v299_v49 }
  0x48   : > { %1504 = vmatmul.mubr.msk.f32.gmra.mrb[18].mxu0 %vm321_vm0, %v268_v50 }
  0x49   : > { %1506 = vmatprep.mubr.msk.f32.mxu0 %vm321_vm0, %v269_v51  ;;  %1552 = vmatmul.mubr.msk.f32.gmra.mrb[18].mxu1 %vm321_vm0, %v300_v52 }
  0x4a   : > { %1554 = vmatprep.mubr.msk.f32.mxu1 %vm321_vm0, %v301_v53 }
  0x4c   : > { %1507 = vmatmul.mubr.msk.f32.gmra.mrb[20].mxu0 %vm321_vm0, %v270_v54 }
  0x4d   : > { %1509 = vmatprep.mubr.msk.f32.mxu0 %vm321_vm0, %v271_v55  ;;  %1555 = vmatmul.mubr.msk.f32.gmra.mrb[20].mxu1 %vm321_vm0, %v302_v56 }
  0x4e   : > { %1557 = vmatprep.mubr.msk.f32.mxu1 %vm321_vm0, %v303_v57 }
  0x50   : > { %1510 = vmatmul.mubr.msk.f32.gmra.mrb[22].mxu0 %vm321_vm0, %v272_v58 }
  0x51   : > { %1512 = vmatprep.mubr.msk.f32.mxu0 %vm321_vm0, %v273_v59  ;;  %1558 = vmatmul.mubr.msk.f32.gmra.mrb[22].mxu1 %vm321_vm0, %v304_v60 }
  0x52   : > { %1560 = vmatprep.mubr.msk.f32.mxu1 %vm321_vm0, %v305_v61 }
  0x54   : > { %1513 = vmatmul.mubr.msk.f32.gmra.mrb[24].mxu0 %vm321_vm0, %v274_v62 }
  0x55   : > { %1515 = vmatprep.mubr.msk.f32.mxu0 %vm321_vm0, %v275_v63  ;;  %1561 = vmatmul.mubr.msk.f32.gmra.mrb[24].mxu1 %vm321_vm0, %v306_v0 }
  0x56   : > { %1563 = vmatprep.mubr.msk.f32.mxu1 %vm321_vm0, %v307_v1 }
  0x58   : > { %1516 = vmatmul.mubr.msk.f32.gmra.mrb[26].mxu0 %vm321_vm0, %v276_v2 }
  0x59   : > { %1518 = vmatprep.mubr.msk.f32.mxu0 %vm321_vm0, %v277_v3  ;;  %1564 = vmatmul.mubr.msk.f32.gmra.mrb[26].mxu1 %vm321_vm0, %v308_v4 }
  0x5a   : > { %1566 = vmatprep.mubr.msk.f32.mxu1 %vm321_vm0, %v309_v5 }
  0x5c   : > { %1519 = vmatmul.mubr.msk.f32.gmra.mrb[28].mxu0 %vm321_vm0, %v278_v6 }
  0x5d   : > { %1521 = vmatprep.mubr.msk.f32.mxu0 %vm321_vm0, %v279_v7  ;;  %1567 = vmatmul.mubr.msk.f32.gmra.mrb[28].mxu1 %vm321_vm0, %v310_v8 }
  0x5e   : > { %1569 = vmatprep.mubr.msk.f32.mxu1 %vm321_vm0, %v311_v9 }
  0x60   : > { %1522 = vmatmul.mubr.msk.f32.gmra.mrb[30].mxu0 %vm321_vm0, %v280_v10 }
  0x61   : > { %1570 = vmatmul.mubr.msk.f32.gmra.mrb[30].mxu1 %vm321_vm0, %v312_v11 }
  0xf7   : > { %v1478_v12 = vpop.f32.mrb[0].mxu0 }
  0xf8   : > { %900 = vst [vmem:[%s1829_s26 + $0x8] sm:$0xff] %v1478_v12  ;;  %v1034_v13 = vmul.f32 %v1478_v12, %v1478_v12  ;;  %v580_v14 = vpop.f32.mrb[1].mxu0  ;;  %v1832_v15 = vpop.f32.mrb[0].mxu1 }
  0xf9   : > { %899 = vst [vmem:[%s1829_s26] sm:$0xff] %v580_v14  ;;  %v963_v16 = vadd.f32 %v1478_v12, %v580_v14  ;;  %v1033_v17 = vmul.f32 %v580_v14, %v580_v14  ;;  %932 = vst [vmem:[%s1829_s26 + $0x108] sm:$0xff] %v1832_v15  ;;  %v1837_v18 = vpop.f32.mrb[1].mxu1 }
  0xfa   : > { %931 = vst [vmem:[%s1829_s26 + $0x100] sm:$0xff] %v1837_v18 }
  0xfb   : > { %v1097_v19 = vadd.f32 %v1034_v13, %v1033_v17  ;;  %v1481_v20 = vpop.f32.mrb[2].mxu0 }
  0xfc   : > { %902 = vst [vmem:[%s1829_s26 + $0x18] sm:$0xff] %v1481_v20  ;;  %v590_v21 = vpop.f32.mrb[3].mxu0  ;;  %v1842_v22 = vpop.f32.mrb[2].mxu1  ;;  %v1036_v26 = vmul.f32 %v1481_v20, %v1481_v20 }
  0xfd   : > { %901 = vst [vmem:[%s1829_s26 + $0x10] sm:$0xff] %v590_v21  ;;  %v964_v23 = vadd.f32 %v963_v16, %v590_v21  ;;  %v1035_v24 = vmul.f32 %v590_v21, %v590_v21  ;;  %934 = vst [vmem:[%s1829_s26 + $0x118] sm:$0xff] %v1842_v22  ;;  %v1847_v25 = vpop.f32.mrb[3].mxu1 }
  0xfe   : > { %933 = vst [vmem:[%s1829_s26 + $0x110] sm:$0xff] %v1847_v25 }
  0xff   : > { %v1098_v27 = vadd.f32 %v1097_v19, %v1035_v24  ;;  %v1484_v28 = vpop.f32.mrb[4].mxu0  ;;  %v965_v29 = vadd.f32 %v1481_v20, %v964_v23 }
 0x100   : > { %904 = vst [vmem:[%s1829_s26 + $0x28] sm:$0xff] %v1484_v28  ;;  %v600_v30 = vpop.f32.mrb[5].mxu0  ;;  %v1852_v31 = vpop.f32.mrb[4].mxu1  ;;  %v1038_v36 = vmul.f32 %v1484_v28, %v1484_v28 }
 0x101   : > { %903 = vst [vmem:[%s1829_s26 + $0x20] sm:$0xff] %v600_v30  ;;  %v966_v32 = vadd.f32 %v965_v29, %v600_v30  ;;  %v1037_v33 = vmul.f32 %v600_v30, %v600_v30  ;;  %v1099_v34 = vadd.f32 %v1098_v27, %v1036_v26  ;;  %936 = vst [vmem:[%s1829_s26 + $0x128] sm:$0xff] %v1852_v31  ;;  %v1857_v35 = vpop.f32.mrb[5].mxu1 }
 0x102   : > { %935 = vst [vmem:[%s1829_s26 + $0x120] sm:$0xff] %v1857_v35 }
 0x103   : > { %v1100_v37 = vadd.f32 %v1099_v34, %v1037_v33  ;;  %v1487_v38 = vpop.f32.mrb[6].mxu0  ;;  %v967_v39 = vadd.f32 %v1484_v28, %v966_v32 }
 0x104   : > { %906 = vst [vmem:[%s1829_s26 + $0x38] sm:$0xff] %v1487_v38  ;;  %v610_v40 = vpop.f32.mrb[7].mxu0  ;;  %v1862_v41 = vpop.f32.mrb[6].mxu1  ;;  %v1040_v46 = vmul.f32 %v1487_v38, %v1487_v38 }
 0x105   : > { %905 = vst [vmem:[%s1829_s26 + $0x30] sm:$0xff] %v610_v40  ;;  %v968_v42 = vadd.f32 %v967_v39, %v610_v40  ;;  %v1039_v43 = vmul.f32 %v610_v40, %v610_v40  ;;  %v1101_v44 = vadd.f32 %v1100_v37, %v1038_v36  ;;  %938 = vst [vmem:[%s1829_s26 + $0x138] sm:$0xff] %v1862_v41  ;;  %v1867_v45 = vpop.f32.mrb[7].mxu1 }
 0x106   : > { %937 = vst [vmem:[%s1829_s26 + $0x130] sm:$0xff] %v1867_v45 }
 0x107   : > { %v1102_v47 = vadd.f32 %v1101_v44, %v1039_v43  ;;  %v1490_v48 = vpop.f32.mrb[8].mxu0  ;;  %v969_v49 = vadd.f32 %v1487_v38, %v968_v42 }
 0x108   : > { %908 = vst [vmem:[%s1829_s26 + $0x48] sm:$0xff] %v1490_v48  ;;  %v620_v50 = vpop.f32.mrb[9].mxu0  ;;  %v1872_v51 = vpop.f32.mrb[8].mxu1  ;;  %v1042_v56 = vmul.f32 %v1490_v48, %v1490_v48 }
 0x109   : > { %907 = vst [vmem:[%s1829_s26 + $0x40] sm:$0xff] %v620_v50  ;;  %v970_v52 = vadd.f32 %v969_v49, %v620_v50  ;;  %v1041_v53 = vmul.f32 %v620_v50, %v620_v50  ;;  %v1103_v54 = vadd.f32 %v1102_v47, %v1040_v46  ;;  %940 = vst [vmem:[%s1829_s26 + $0x148] sm:$0xff] %v1872_v51  ;;  %v1877_v55 = vpop.f32.mrb[9].mxu1 }
 0x10a   : > { %939 = vst [vmem:[%s1829_s26 + $0x140] sm:$0xff] %v1877_v55 }
 0x10b   : > { %v1104_v57 = vadd.f32 %v1103_v54, %v1041_v53  ;;  %v1493_v58 = vpop.f32.mrb[10].mxu0  ;;  %v971_v59 = vadd.f32 %v1490_v48, %v970_v52 }
 0x10c   : > { %910 = vst [vmem:[%s1829_s26 + $0x58] sm:$0xff] %v1493_v58  ;;  %v630_v60 = vpop.f32.mrb[11].mxu0  ;;  %v1882_v61 = vpop.f32.mrb[10].mxu1  ;;  %v1044_v2 = vmul.f32 %v1493_v58, %v1493_v58 }
 0x10d   : > { %909 = vst [vmem:[%s1829_s26 + $0x50] sm:$0xff] %v630_v60  ;;  %v972_v62 = vadd.f32 %v971_v59, %v630_v60  ;;  %v1043_v63 = vmul.f32 %v630_v60, %v630_v60  ;;  %v1105_v0 = vadd.f32 %v1104_v57, %v1042_v56  ;;  %942 = vst [vmem:[%s1829_s26 + $0x158] sm:$0xff] %v1882_v61  ;;  %v1887_v1 = vpop.f32.mrb[11].mxu1 }
 0x10e   : > { %941 = vst [vmem:[%s1829_s26 + $0x150] sm:$0xff] %v1887_v1 }
 0x10f   : > { %v1106_v3 = vadd.f32 %v1105_v0, %v1043_v63  ;;  %v1496_v4 = vpop.f32.mrb[12].mxu0  ;;  %v973_v5 = vadd.f32 %v1493_v58, %v972_v62 }
 0x110   : > { %912 = vst [vmem:[%s1829_s26 + $0x68] sm:$0xff] %v1496_v4  ;;  %v640_v6 = vpop.f32.mrb[13].mxu0  ;;  %v1892_v7 = vpop.f32.mrb[12].mxu1  ;;  %v1046_v12 = vmul.f32 %v1496_v4, %v1496_v4 }
 0x111   : > { %911 = vst [vmem:[%s1829_s26 + $0x60] sm:$0xff] %v640_v6  ;;  %v974_v8 = vadd.f32 %v973_v5, %v640_v6  ;;  %v1045_v9 = vmul.f32 %v640_v6, %v640_v6  ;;  %v1107_v10 = vadd.f32 %v1106_v3, %v1044_v2  ;;  %944 = vst [vmem:[%s1829_s26 + $0x168] sm:$0xff] %v1892_v7  ;;  %v1897_v11 = vpop.f32.mrb[13].mxu1 }
 0x112   : > { %943 = vst [vmem:[%s1829_s26 + $0x160] sm:$0xff] %v1897_v11 }
 0x113   : > { %v1108_v13 = vadd.f32 %v1107_v10, %v1045_v9  ;;  %v1499_v14 = vpop.f32.mrb[14].mxu0  ;;  %v975_v16 = vadd.f32 %v1496_v4, %v974_v8 }
 0x114   : > { %914 = vst [vmem:[%s1829_s26 + $0x78] sm:$0xff] %v1499_v14  ;;  %v650_v17 = vpop.f32.mrb[15].mxu0  ;;  %v1902_v19 = vpop.f32.mrb[14].mxu1  ;;  %v1048_v26 = vmul.f32 %v1499_v14, %v1499_v14 }
 0x115   : > { %913 = vst [vmem:[%s1829_s26 + $0x70] sm:$0xff] %v650_v17  ;;  %v976_v20 = vadd.f32 %v975_v16, %v650_v17  ;;  %v1047_v21 = vmul.f32 %v650_v17, %v650_v17  ;;  %v1109_v23 = vadd.f32 %v1108_v13, %v1046_v12  ;;  %946 = vst [vmem:[%s1829_s26 + $0x178] sm:$0xff] %v1902_v19  ;;  %v1907_v24 = vpop.f32.mrb[15].mxu1 }
 0x116   : > { %945 = vst [vmem:[%s1829_s26 + $0x170] sm:$0xff] %v1907_v24 }
 0x117   : > { %v1110_v27 = vadd.f32 %v1109_v23, %v1047_v21  ;;  %v1502_v28 = vpop.f32.mrb[16].mxu0  ;;  %v977_v29 = vadd.f32 %v1499_v14, %v976_v20 }
 0x118   : > { %916 = vst [vmem:[%s1829_s26 + $0x88] sm:$0xff] %v1502_v28  ;;  %v660_v30 = vpop.f32.mrb[17].mxu0  ;;  %v1912_v32 = vpop.f32.mrb[16].mxu1  ;;  %v1050_v38 = vmul.f32 %v1502_v28, %v1502_v28 }
 0x119   : > { %915 = vst [vmem:[%s1829_s26 + $0x80] sm:$0xff] %v660_v30  ;;  %v978_v33 = vadd.f32 %v977_v29, %v660_v30  ;;  %v1049_v34 = vmul.f32 %v660_v30, %v660_v30  ;;  %v1111_v36 = vadd.f32 %v1110_v27, %v1048_v26  ;;  %948 = vst [vmem:[%s1829_s26 + $0x188] sm:$0xff] %v1912_v32  ;;  %v1917_v37 = vpop.f32.mrb[17].mxu1 }
 0x11a   : > { %947 = vst [vmem:[%s1829_s26 + $0x180] sm:$0xff] %v1917_v37 }
 0x11b   : > { %v1112_v39 = vadd.f32 %v1111_v36, %v1049_v34  ;;  %v1505_v40 = vpop.f32.mrb[18].mxu0  ;;  %v979_v42 = vadd.f32 %v1502_v28, %v978_v33 }
 0x11c   : > { %918 = vst [vmem:[%s1829_s26 + $0x98] sm:$0xff] %v1505_v40  ;;  %v670_v43 = vpop.f32.mrb[19].mxu0  ;;  %v1922_v44 = vpop.f32.mrb[18].mxu1  ;;  %v1052_v50 = vmul.f32 %v1505_v40, %v1505_v40 }
 0x11d   : > { %917 = vst [vmem:[%s1829_s26 + $0x90] sm:$0xff] %v670_v43  ;;  %v980_v46 = vadd.f32 %v979_v42, %v670_v43  ;;  %v1051_v47 = vmul.f32 %v670_v43, %v670_v43  ;;  %v1113_v48 = vadd.f32 %v1112_v39, %v1050_v38  ;;  %950 = vst [vmem:[%s1829_s26 + $0x198] sm:$0xff] %v1922_v44  ;;  %v1927_v49 = vpop.f32.mrb[19].mxu1 }
 0x11e   : > { %949 = vst [vmem:[%s1829_s26 + $0x190] sm:$0xff] %v1927_v49 }
 0x11f   : > { %v1114_v52 = vadd.f32 %v1113_v48, %v1051_v47  ;;  %v1508_v53 = vpop.f32.mrb[20].mxu0  ;;  %v981_v54 = vadd.f32 %v1505_v40, %v980_v46 }
 0x120   : > { %920 = vst [vmem:[%s1829_s26 + $0xa8] sm:$0xff] %v1508_v53  ;;  %v680_v56 = vpop.f32.mrb[21].mxu0  ;;  %v1932_v57 = vpop.f32.mrb[20].mxu1  ;;  %v1054_v63 = vmul.f32 %v1508_v53, %v1508_v53 }
 0x121   : > { %919 = vst [vmem:[%s1829_s26 + $0xa0] sm:$0xff] %v680_v56  ;;  %v982_v58 = vadd.f32 %v981_v54, %v680_v56  ;;  %v1053_v59 = vmul.f32 %v680_v56, %v680_v56  ;;  %v1115_v60 = vadd.f32 %v1114_v52, %v1052_v50  ;;  %952 = vst [vmem:[%s1829_s26 + $0x1a8] sm:$0xff] %v1932_v57  ;;  %v1937_v62 = vpop.f32.mrb[21].mxu1 }
 0x122   : > { %951 = vst [vmem:[%s1829_s26 + $0x1a0] sm:$0xff] %v1937_v62 }
 0x123   : > { %v1116_v0 = vadd.f32 %v1115_v60, %v1053_v59  ;;  %v1511_v2 = vpop.f32.mrb[22].mxu0  ;;  %v983_v3 = vadd.f32 %v1508_v53, %v982_v58 }
 0x124   : > { %922 = vst [vmem:[%s1829_s26 + $0xb8] sm:$0xff] %v1511_v2  ;;  %v690_v4 = vpop.f32.mrb[23].mxu0  ;;  %v1942_v5 = vpop.f32.mrb[22].mxu1  ;;  %v1056_v12 = vmul.f32 %v1511_v2, %v1511_v2 }
 0x125   : > { %921 = vst [vmem:[%s1829_s26 + $0xb0] sm:$0xff] %v690_v4  ;;  %v984_v6 = vadd.f32 %v983_v3, %v690_v4  ;;  %v1055_v8 = vmul.f32 %v690_v4, %v690_v4  ;;  %v1117_v9 = vadd.f32 %v1116_v0, %v1054_v63  ;;  %954 = vst [vmem:[%s1829_s26 + $0x1b8] sm:$0xff] %v1942_v5  ;;  %v1947_v10 = vpop.f32.mrb[23].mxu1 }
 0x126   : > { %953 = vst [vmem:[%s1829_s26 + $0x1b0] sm:$0xff] %v1947_v10 }
 0x127   : > { %v1118_v13 = vadd.f32 %v1117_v9, %v1055_v8  ;;  %v1514_v14 = vpop.f32.mrb[24].mxu0  ;;  %v985_v16 = vadd.f32 %v1511_v2, %v984_v6 }
 0x128   : > { %924 = vst [vmem:[%s1829_s26 + $0xc8] sm:$0xff] %v1514_v14  ;;  %v700_v17 = vpop.f32.mrb[25].mxu0  ;;  %v1952_v20 = vpop.f32.mrb[24].mxu1  ;;  %v1058_v28 = vmul.f32 %v1514_v14, %v1514_v14 }
 0x129   : > { %923 = vst [vmem:[%s1829_s26 + $0xc0] sm:$0xff] %v700_v17  ;;  %v986_v21 = vadd.f32 %v985_v16, %v700_v17  ;;  %v1057_v23 = vmul.f32 %v700_v17, %v700_v17  ;;  %v1119_v26 = vadd.f32 %v1118_v13, %v1056_v12  ;;  %956 = vst [vmem:[%s1829_s26 + $0x1c8] sm:$0xff] %v1952_v20  ;;  %v1957_v27 = vpop.f32.mrb[25].mxu1 }
 0x12a   : > { %955 = vst [vmem:[%s1829_s26 + $0x1c0] sm:$0xff] %v1957_v27  ;;  %v1065_v16 = vmul.f32 %v1837_v18, %v1837_v18 }
 0x12b   : > { %v1120_v29 = vadd.f32 %v1119_v26, %v1057_v23  ;;  %v1517_v30 = vpop.f32.mrb[26].mxu0  ;;  %v987_v33 = vadd.f32 %v1514_v14, %v986_v21  ;;  %v1066_v23 = vmul.f32 %v1832_v15, %v1832_v15 }
 0x12c   : > { %926 = vst [vmem:[%s1829_s26 + $0xd8] sm:$0xff] %v1517_v30  ;;  %v710_v34 = vpop.f32.mrb[27].mxu0  ;;  %v1962_v36 = vpop.f32.mrb[26].mxu1  ;;  %v1060_v43 = vmul.f32 %v1517_v30, %v1517_v30 }
 0x12d   : > { %925 = vst [vmem:[%s1829_s26 + $0xd0] sm:$0xff] %v710_v34  ;;  %v988_v38 = vadd.f32 %v987_v33, %v710_v34  ;;  %v1059_v39 = vmul.f32 %v710_v34, %v710_v34  ;;  %v1121_v40 = vadd.f32 %v1120_v29, %v1058_v28  ;;  %958 = vst [vmem:[%s1829_s26 + $0x1d8] sm:$0xff] %v1962_v36  ;;  %v1967_v42 = vpop.f32.mrb[27].mxu1 }
 0x12e   : > { %957 = vst [vmem:[%s1829_s26 + $0x1d0] sm:$0xff] %v1967_v42  ;;  %v1067_v29 = vmul.f32 %v1847_v25, %v1847_v25  ;;  %v1068_v34 = vmul.f32 %v1842_v22, %v1842_v22 }
 0x12f   : > { %v1122_v46 = vadd.f32 %v1121_v40, %v1059_v39  ;;  %v1520_v47 = vpop.f32.mrb[28].mxu0  ;;  %v989_v48 = vadd.f32 %v1517_v30, %v988_v38 }
 0x130   : > { %928 = vst [vmem:[%s1829_s26 + $0xe8] sm:$0xff] %v1520_v47  ;;  %v720_v50 = vpop.f32.mrb[29].mxu0  ;;  %v1972_v52 = vpop.f32.mrb[28].mxu1  ;;  %v1062_v59 = vmul.f32 %v1520_v47, %v1520_v47 }
 0x131   : > { %927 = vst [vmem:[%s1829_s26 + $0xe0] sm:$0xff] %v720_v50  ;;  %v990_v53 = vadd.f32 %v989_v48, %v720_v50  ;;  %v1061_v54 = vmul.f32 %v720_v50, %v720_v50  ;;  %v1123_v56 = vadd.f32 %v1122_v46, %v1060_v43  ;;  %960 = vst [vmem:[%s1829_s26 + $0x1e8] sm:$0xff] %v1972_v52  ;;  %v1977_v58 = vpop.f32.mrb[29].mxu1 }
 0x132   : > { %959 = vst [vmem:[%s1829_s26 + $0x1e0] sm:$0xff] %v1977_v58 }
 0x133   : > { %v1124_v60 = vadd.f32 %v1123_v56, %v1061_v54  ;;  %v1523_v63 = vpop.f32.mrb[30].mxu0  ;;  %v991_v0 = vadd.f32 %v1520_v47, %v990_v53 }
 0x134   : > { %930 = vst [vmem:[%s1829_s26 + $0xf8] sm:$0xff] %v1523_v63  ;;  %v730_v2 = vpop.f32.mrb[31].mxu0  ;;  %v1982_v3 = vpop.f32.mrb[30].mxu1  ;;  %v1064_v12 = vmul.f32 %v1523_v63, %v1523_v63 }
 0x135   : > { %929 = vst [vmem:[%s1829_s26 + $0xf0] sm:$0xff] %v730_v2  ;;  %v992_v4 = vadd.f32 %v991_v0, %v730_v2  ;;  %v1063_v6 = vmul.f32 %v730_v2, %v730_v2  ;;  %v1125_v8 = vadd.f32 %v1124_v60, %v1062_v59  ;;  %962 = vst [vmem:[%s1829_s26 + $0x1f8] sm:$0xff] %v1982_v3  ;;  %v1987_v9 = vpop.f32.mrb[31].mxu1 }
 0x136   : > { %961 = vst [vmem:[%s1829_s26 + $0x1f0] sm:$0xff] %v1987_v9 }
 0x137   : > { %v993_v13 = vadd.f32 %v1523_v63, %v992_v4  ;;  %v1126_v14 = vadd.f32 %v1125_v8, %v1063_v6 }
 0x139   : > { %v1127_v17 = vadd.f32 %v1126_v14, %v1064_v12  ;;  %v994_v21 = vadd.f32 %v993_v13, %v1837_v18  ;;  %v1069_v18 = vmul.f32 %v1857_v35, %v1857_v35 }
 0x13b   : > { %v1128_v26 = vadd.f32 %v1127_v17, %v1065_v16  ;;  %v995_v28 = vadd.f32 %v1832_v15, %v994_v21  ;;  %v1070_v15 = vmul.f32 %v1852_v31, %v1852_v31 }
 0x13d   : > { %v996_v30 = vadd.f32 %v995_v28, %v1847_v25  ;;  %v1129_v33 = vadd.f32 %v1128_v26, %v1066_v23  ;;  %v1071_v25 = vmul.f32 %v1867_v45, %v1867_v45 }
 0x13f   : > { %v1130_v38 = vadd.f32 %v1129_v33, %v1067_v29  ;;  %v997_v39 = vadd.f32 %v1842_v22, %v996_v30  ;;  %v1072_v22 = vmul.f32 %v1862_v41, %v1862_v41 }
 0x141   : > { %v998_v40 = vadd.f32 %v997_v39, %v1857_v35  ;;  %v1131_v43 = vadd.f32 %v1130_v38, %v1068_v34  ;;  %v1073_v35 = vmul.f32 %v1877_v55, %v1877_v55 }
 0x143   : > { %v1132_v46 = vadd.f32 %v1131_v43, %v1069_v18  ;;  %v999_v47 = vadd.f32 %v1852_v31, %v998_v40  ;;  %v1074_v31 = vmul.f32 %v1872_v51, %v1872_v51 }
 0x145   : > { %v1000_v48 = vadd.f32 %v999_v47, %v1867_v45  ;;  %v1133_v50 = vadd.f32 %v1132_v46, %v1070_v15  ;;  %v1075_v45 = vmul.f32 %v1887_v1, %v1887_v1 }
 0x147   : > { %v1134_v53 = vadd.f32 %v1133_v50, %v1071_v25  ;;  %v1001_v54 = vadd.f32 %v1862_v41, %v1000_v48  ;;  %v1076_v41 = vmul.f32 %v1882_v61, %v1882_v61 }
 0x149   : > { %v1002_v56 = vadd.f32 %v1001_v54, %v1877_v55  ;;  %v1135_v59 = vadd.f32 %v1134_v53, %v1072_v22  ;;  %v1077_v55 = vmul.f32 %v1897_v11, %v1897_v11 }
 0x14b   : > { %v1136_v60 = vadd.f32 %v1135_v59, %v1073_v35  ;;  %v1003_v63 = vadd.f32 %v1872_v51, %v1002_v56  ;;  %v1078_v51 = vmul.f32 %v1892_v7, %v1892_v7 }
 0x14d   : > { %v1004_v0 = vadd.f32 %v1003_v63, %v1887_v1  ;;  %v1137_v2 = vadd.f32 %v1136_v60, %v1074_v31  ;;  %v1079_v1 = vmul.f32 %v1907_v24, %v1907_v24 }
 0x14f   : > { %v1138_v4 = vadd.f32 %v1137_v2, %v1075_v45  ;;  %v1005_v6 = vadd.f32 %v1882_v61, %v1004_v0  ;;  %v1080_v61 = vmul.f32 %v1902_v19, %v1902_v19  ;;  %v1095_v0 = vmul.f32 %v1987_v9, %v1987_v9 }
 0x151   : > { %v1006_v8 = vadd.f32 %v1005_v6, %v1897_v11  ;;  %v1139_v12 = vadd.f32 %v1138_v4, %v1076_v41  ;;  %v1081_v11 = vmul.f32 %v1917_v37, %v1917_v37 }
 0x153   : > { %v1140_v13 = vadd.f32 %v1139_v12, %v1077_v55  ;;  %v1007_v14 = vadd.f32 %v1892_v7, %v1006_v8  ;;  %v1082_v7 = vmul.f32 %v1912_v32, %v1912_v32 }
 0x155   : > { %v1008_v16 = vadd.f32 %v1007_v14, %v1907_v24  ;;  %v1141_v17 = vadd.f32 %v1140_v13, %v1078_v51  ;;  %v1083_v24 = vmul.f32 %v1927_v49, %v1927_v49 }
 0x157   : > { %v1142_v21 = vadd.f32 %v1141_v17, %v1079_v1  ;;  %v1009_v23 = vadd.f32 %v1902_v19, %v1008_v16  ;;  %v1084_v19 = vmul.f32 %v1922_v44, %v1922_v44 }
 0x159   : > { %v1010_v26 = vadd.f32 %v1009_v23, %v1917_v37  ;;  %v1143_v28 = vadd.f32 %v1142_v21, %v1080_v61  ;;  %v1085_v37 = vmul.f32 %v1937_v62, %v1937_v62 }
 0x15b   : > { %v1144_v29 = vadd.f32 %v1143_v28, %v1081_v11  ;;  %v1011_v30 = vadd.f32 %v1912_v32, %v1010_v26  ;;  %v1086_v32 = vmul.f32 %v1932_v57, %v1932_v57 }
 0x15d   : > { %v1012_v33 = vadd.f32 %v1011_v30, %v1927_v49  ;;  %v1145_v34 = vadd.f32 %v1144_v29, %v1082_v7  ;;  %v1087_v49 = vmul.f32 %v1947_v10, %v1947_v10 }
 0x15f   : > { %v1146_v38 = vadd.f32 %v1145_v34, %v1083_v24  ;;  %v1013_v39 = vadd.f32 %v1922_v44, %v1012_v33  ;;  %v1088_v44 = vmul.f32 %v1942_v5, %v1942_v5 }
 0x161   : > { %v1014_v18 = vadd.f32 %v1013_v39, %v1937_v62  ;;  %v1147_v40 = vadd.f32 %v1146_v38, %v1084_v19  ;;  %v1089_v62 = vmul.f32 %v1957_v27, %v1957_v27 }
 0x163   : > { %v1148_v43 = vadd.f32 %v1147_v40, %v1085_v37  ;;  %v1015_v15 = vadd.f32 %v1932_v57, %v1014_v18  ;;  %v1090_v57 = vmul.f32 %v1952_v20, %v1952_v20 }
 0x165   : > { %v1016_v46 = vadd.f32 %v1015_v15, %v1947_v10  ;;  %v1149_v47 = vadd.f32 %v1148_v43, %v1086_v32  ;;  %v1091_v10 = vmul.f32 %v1967_v42, %v1967_v42 }
 0x167   : > { %v1150_v25 = vadd.f32 %v1149_v47, %v1087_v49  ;;  %v1017_v48 = vadd.f32 %v1942_v5, %v1016_v46  ;;  %v1092_v5 = vmul.f32 %v1962_v36, %v1962_v36 }
 0x169   : > { %v1018_v50 = vadd.f32 %v1017_v48, %v1957_v27  ;;  %v1151_v22 = vadd.f32 %v1150_v25, %v1088_v44  ;;  %v1093_v27 = vmul.f32 %v1977_v58, %v1977_v58 }
 0x16b   : > { %v1152_v53 = vadd.f32 %v1151_v22, %v1089_v62  ;;  %v1019_v54 = vadd.f32 %v1952_v20, %v1018_v50  ;;  %v1094_v20 = vmul.f32 %v1972_v52, %v1972_v52 }
 0x16d   : > { %v1020_v35 = vadd.f32 %v1019_v54, %v1967_v42  ;;  %v1153_v56 = vadd.f32 %v1152_v53, %v1090_v57 }
 0x16f   : > { %v1154_v59 = vadd.f32 %v1153_v56, %v1091_v10  ;;  %v1021_v31 = vadd.f32 %v1962_v36, %v1020_v35  ;;  %v1096_v36 = vmul.f32 %v1982_v3, %v1982_v3 }
 0x171   : > { %v1022_v60 = vadd.f32 %v1021_v31, %v1977_v58  ;;  %v1155_v63 = vadd.f32 %v1154_v59, %v1092_v5 }
 0x173   : > { %v1156_v45 = vadd.f32 %v1155_v63, %v1093_v27  ;;  %v1023_v42 = vadd.f32 %v1972_v52, %v1022_v60 }
 0x175   : > { %v1024_v2 = vadd.f32 %v1023_v42, %v1987_v9  ;;  %v1157_v41 = vadd.f32 %v1156_v45, %v1094_v20 }
 0x177   : > { %v1025_v4 = vadd.f32 %v1982_v3, %v1024_v2  ;;  %v1158_v58 = vadd.f32 %v1157_v41, %v1095_v0 }
 0x179   : > { %v1026_v6 = vrot.slane %v1025_v4, 4  ;;  %v1159_v55 = vadd.f32 %v1158_v58, %v1096_v36 }
 0x17b   : > { %v1027_v8 = vadd.f32 %v1026_v6, %v1025_v4  ;;  %v1160_v12 = vrot.slane %v1159_v55, 4 }
 0x17d   : > { %v1028_v51 = vrot.slane %v1027_v8, 2  ;;  %v1161_v13 = vadd.f32 %v1160_v12, %v1159_v55 }
 0x17f   : > { %v1029_v52 = vadd.f32 %v1028_v51, %v1027_v8  ;;  %v1162_v14 = vrot.slane %v1161_v13, 2 }
 0x181   : > { %v1030_v1 = vrot.slane %v1029_v52, 1  ;;  %v1163_v16 = vadd.f32 %v1162_v14, %v1161_v13 }
 0x183   : > { %v1031_v9 = vadd.f32 %v1030_v1, %v1029_v52  ;;  %v1164_v17 = vrot.slane %v1163_v16, 1 }
 0x185   : > { %1032 = vst [vmem:[%s248_s30] sm:$0x1] %v1031_v9  ;;  %v1165_v3 = vadd.f32 %v1164_v17, %v1163_v16 }
 0x187   : > { %1166 = vst [vmem:[%s248_s30 + $0x1] sm:$0x1] %v1165_v3 }
 0x188 PF: > { %s14_s14 = sadd.s32 1, %s1642_s14   ;;  %s2104_s12 = smov %s1638_s13 }
 0x189   : > { %p11_p5 = scmp.ge.s32.totalorder %s14_s14, 6   ;;  %s2105_s13 = smov %s2107_s15 }
 0x18b   :  { %13 = sbr.rel (!%p11_p5) target bundleno = 2 (0x2), region = 73 }

// kernel: _lambda_.16
= control target key start
LH: loop header
LB: loop body
LE: loop exit
PB: predicated region body
PF: predicated region fallthrough
CT: control target
= control target key end

     0   :  { %s714_s12 = smov 0   ;;  %s716_s13 = smov 0   ;;  %s1017_s0 = inlined_call_operand.vmem [shape: f32[4,512,128], index: 0, kind: input, shape index: {}]   ;;  %s1018_s1 = inlined_call_operand.vmem [shape: f32[1,128], index: 1, kind: input, shape index: {}]   ;;  %s1019_s2 = inlined_call_operand.vmem [shape: f32[1,128], index: 2, kind: input, shape index: {}]   ;;  %s1020_s3 = inlined_call_operand.vmem [shape: f32[4,512,128], index: 3, kind: output, shape index: {}]  }
   0x1   :  { %s718_s14 = smov 0  }
   0x2 LB: > { %s25_s15 = sadd.s32 1, %s688_s13  ;;  %p635_p0 = scmp.ge.s32.totalorder %s692_s14, 1  ;;  %s692_s14 = sphi %s718_s14, %s13_s14   ;;  %s688_s13 = sphi %s716_s13, %s1022_s13   ;;  %s684_s12 = sphi %s714_s12, %s1021_s12  }
   0x3   : > { %p27_p1 = scmp.ge.s32.totalorder %s25_s15, 4  ;;  %p158_p2 = scmp.lt.s32.totalorder %s692_s14, 5 }
   0x5   : > { %s1024_s15 = smov (%p27_p1, %s25_s15), 0  ;;  %p159_p3 = pnand %p635_p0, %p158_p2 }
   0x6   : > { %p191_p4 = scmp.lt.s32.totalorder (!%p159_p3), %s684_s12, 3  ;;  %v735_v0 = vld [vmem:[%s1018_s1] ss:$0 sm:$0xff] (!%p159_p3) }
   0x7   : > { %162 = sbr.rel (%p159_p3) target bundleno = 71 (0x47), region = 32  ;;  %v745_v1 = vld [vmem:[%s1019_s2] ss:$0 sm:$0xff] (!%p159_p3) }
   0xe   : > { %s1026_s12 = smov (!%p191_p4, %s684_s12), 3 }
   0xf   : > { %s644_s16 = sshll.u32 %s1026_s12, 9 }
  0x10   : > { %s740_s21 = scalar_lea.vmem %s1017_s0, %s644_s16  ;;  %s768_s26 = scalar_lea.vmem %s1020_s3, %s644_s16 }
  0x11   : > { %v210_v2 = vld [vmem:[%s740_s21] sm:$0xff]  ;;  %v211_v3 = vld [vmem:[%s740_s21 + $0x8] sm:$0xff]  ;;  %v212_v4 = vld [vmem:[%s740_s21 + $0x10] sm:$0xff] }
  0x12   : > { %v281_v5 = vmul.f32 %v735_v0, %v210_v2  ;;  %v282_v6 = vmul.f32 %v735_v0, %v211_v3  ;;  %v283_v7 = vmul.f32 %v735_v0, %v212_v4  ;;  %v213_v8 = vld [vmem:[%s740_s21 + $0x18] sm:$0xff]  ;;  %v214_v9 = vld [vmem:[%s740_s21 + $0x20] sm:$0xff]  ;;  %v215_v10 = vld [vmem:[%s740_s21 + $0x28] sm:$0xff] }
  0x13   : > { %v284_v11 = vmul.f32 %v735_v0, %v213_v8  ;;  %v285_v12 = vmul.f32 %v735_v0, %v214_v9  ;;  %v286_v13 = vmul.f32 %v735_v0, %v215_v10  ;;  %v216_v14 = vld [vmem:[%s740_s21 + $0x30] sm:$0xff]  ;;  %v217_v15 = vld [vmem:[%s740_s21 + $0x38] sm:$0xff]  ;;  %v218_v24 = vld [vmem:[%s740_s21 + $0x40] sm:$0xff] }
  0x14   : > { %v352_v16 = vadd.f32 %v745_v1, %v281_v5  ;;  %v353_v17 = vadd.f32 %v745_v1, %v282_v6  ;;  %v354_v18 = vadd.f32 %v745_v1, %v283_v7  ;;  %v287_v19 = vmul.f32 %v735_v0, %v216_v14  ;;  %v219_v25 = vld [vmem:[%s740_s21 + $0x48] sm:$0xff]  ;;  %v220_v26 = vld [vmem:[%s740_s21 + $0x50] sm:$0xff]  ;;  %v221_v31 = vld [vmem:[%s740_s21 + $0x58] sm:$0xff] }
  0x15   : > { %v355_v20 = vadd.f32 %v745_v1, %v284_v11  ;;  %v356_v21 = vadd.f32 %v745_v1, %v285_v12  ;;  %v357_v22 = vadd.f32 %v745_v1, %v286_v13  ;;  %v288_v23 = vmul.f32 %v735_v0, %v217_v15  ;;  %v222_v32 = vld [vmem:[%s740_s21 + $0x60] sm:$0xff]  ;;  %v223_v33 = vld [vmem:[%s740_s21 + $0x68] sm:$0xff]  ;;  %v224_v38 = vld [vmem:[%s740_s21 + $0x70] sm:$0xff] }
  0x16   : > { %v416_v27 = vmax.f32 %v352_v16, 0.0  ;;  %v417_v28 = vmax.f32 %v353_v17, 0.0  ;;  %v418_v29 = vmax.f32 %v354_v18, 0.0  ;;  %v358_v30 = vadd.f32 %v745_v1, %v287_v19  ;;  %v225_v43 = vld [vmem:[%s740_s21 + $0x78] sm:$0xff]  ;;  %v226_v56 = vld [vmem:[%s740_s21 + $0x80] sm:$0xff]  ;;  %v227_v57 = vld [vmem:[%s740_s21 + $0x88] sm:$0xff] }
  0x17   : > { %v419_v34 = vmax.f32 %v355_v20, 0.0  ;;  %v420_v35 = vmax.f32 %v356_v21, 0.0  ;;  %v421_v36 = vmax.f32 %v357_v22, 0.0  ;;  %v359_v37 = vadd.f32 %v745_v1, %v288_v23  ;;  %v228_v58 = vld [vmem:[%s740_s21 + $0x90] sm:$0xff]  ;;  %v229_v63 = vld [vmem:[%s740_s21 + $0x98] sm:$0xff]  ;;  %v230_v2 = vld [vmem:[%s740_s21 + $0xa0] sm:$0xff] }
  0x18   : > { %480 = vst [vmem:[%s768_s26] sm:$0xff] %v416_v27  ;;  %481 = vst [vmem:[%s768_s26 + $0x8] sm:$0xff] %v417_v28  ;;  %v422_v39 = vmax.f32 %v358_v30, 0.0  ;;  %v289_v40 = vmul.f32 %v735_v0, %v218_v24  ;;  %v290_v41 = vmul.f32 %v735_v0, %v219_v25  ;;  %v291_v42 = vmul.f32 %v735_v0, %v220_v26  ;;  %v231_v3 = vld [vmem:[%s740_s21 + $0xa8] sm:$0xff]  ;;  %v232_v8 = vld [vmem:[%s740_s21 + $0xb0] sm:$0xff] }
  0x19   : > { %482 = vst [vmem:[%s768_s26 + $0x10] sm:$0xff] %v418_v29  ;;  %483 = vst [vmem:[%s768_s26 + $0x18] sm:$0xff] %v419_v34  ;;  %v423_v44 = vmax.f32 %v359_v37, 0.0  ;;  %v292_v45 = vmul.f32 %v735_v0, %v221_v31  ;;  %v293_v46 = vmul.f32 %v735_v0, %v222_v32  ;;  %v294_v47 = vmul.f32 %v735_v0, %v223_v33  ;;  %v233_v13 = vld [vmem:[%s740_s21 + $0xb8] sm:$0xff]  ;;  %v234_v26 = vld [vmem:[%s740_s21 + $0xc0] sm:$0xff] }
  0x1a   : > { %484 = vst [vmem:[%s768_s26 + $0x20] sm:$0xff] %v420_v35  ;;  %485 = vst [vmem:[%s768_s26 + $0x28] sm:$0xff] %v421_v36  ;;  %v360_v48 = vadd.f32 %v745_v1, %v289_v40  ;;  %v361_v49 = vadd.f32 %v745_v1, %v290_v41  ;;  %v362_v50 = vadd.f32 %v745_v1, %v291_v42  ;;  %v235_v27 = vld [vmem:[%s740_s21 + $0xc8] sm:$0xff]  ;;  %v236_v28 = vld [vmem:[%s740_s21 + $0xd0] sm:$0xff] }
  0x1b   : > { %486 = vst [vmem:[%s768_s26 + $0x30] sm:$0xff] %v422_v39  ;;  %v295_v51 = vmul.f32 %v735_v0, %v224_v38  ;;  %487 = vst [vmem:[%s768_s26 + $0x38] sm:$0xff] %v423_v44  ;;  %v363_v52 = vadd.f32 %v745_v1, %v292_v45  ;;  %v364_v53 = vadd.f32 %v745_v1, %v293_v46  ;;  %v237_v33 = vld [vmem:[%s740_s21 + $0xd8] sm:$0xff]  ;;  %v238_v34 = vld [vmem:[%s740_s21 + $0xe0] sm:$0xff] }
  0x1c   : > { %v365_v54 = vadd.f32 %v745_v1, %v294_v47  ;;  %v296_v55 = vmul.f32 %v735_v0, %v225_v43  ;;  %v424_v59 = vmax.f32 %v360_v48, 0.0  ;;  %v425_v60 = vmax.f32 %v361_v49, 0.0  ;;  %v239_v35 = vld [vmem:[%s740_s21 + $0xe8] sm:$0xff]  ;;  %v240_v40 = vld [vmem:[%s740_s21 + $0xf0] sm:$0xff]  ;;  %v241_v45 = vld [vmem:[%s740_s21 + $0xf8] sm:$0xff] }
  0x1d   : > { %v426_v61 = vmax.f32 %v362_v50, 0.0  ;;  %v366_v62 = vadd.f32 %v745_v1, %v295_v51  ;;  %v427_v4 = vmax.f32 %v363_v52, 0.0  ;;  %v428_v5 = vmax.f32 %v364_v53, 0.0 }
  0x1e   : > { %v429_v6 = vmax.f32 %v365_v54, 0.0  ;;  %v367_v7 = vadd.f32 %v745_v1, %v296_v55  ;;  %488 = vst [vmem:[%s768_s26 + $0x40] sm:$0xff] %v424_v59  ;;  %489 = vst [vmem:[%s768_s26 + $0x48] sm:$0xff] %v425_v60  ;;  %v297_v10 = vmul.f32 %v735_v0, %v226_v56  ;;  %v298_v11 = vmul.f32 %v735_v0, %v227_v57  ;;  %v243_v59 = vld [vmem:[%s740_s21 + $0x108] sm:$0xff]  ;;  %v244_v60 = vld [vmem:[%s740_s21 + $0x110] sm:$0xff] }
  0x1f   : > { %490 = vst [vmem:[%s768_s26 + $0x50] sm:$0xff] %v426_v61  ;;  %v430_v9 = vmax.f32 %v366_v62, 0.0  ;;  %v299_v12 = vmul.f32 %v735_v0, %v228_v58  ;;  %491 = vst [vmem:[%s768_s26 + $0x58] sm:$0xff] %v427_v4  ;;  %v300_v15 = vmul.f32 %v735_v0, %v229_v63  ;;  %v301_v16 = vmul.f32 %v735_v0, %v230_v2  ;;  %v242_v58 = vld [vmem:[%s740_s21 + $0x100] sm:$0xff] }
  0x20   : > { %492 = vst [vmem:[%s768_s26 + $0x60] sm:$0xff] %v428_v5  ;;  %493 = vst [vmem:[%s768_s26 + $0x68] sm:$0xff] %v429_v6  ;;  %v431_v14 = vmax.f32 %v367_v7, 0.0  ;;  %v302_v17 = vmul.f32 %v735_v0, %v231_v3  ;;  %v368_v18 = vadd.f32 %v745_v1, %v297_v10  ;;  %v369_v19 = vadd.f32 %v745_v1, %v298_v11  ;;  %v245_v3 = vld [vmem:[%s740_s21 + $0x118] sm:$0xff]  ;;  %v246_v4 = vld [vmem:[%s740_s21 + $0x120] sm:$0xff] }
  0x21   : > { %494 = vst [vmem:[%s768_s26 + $0x70] sm:$0xff] %v430_v9  ;;  %v370_v20 = vadd.f32 %v745_v1, %v299_v12  ;;  %v303_v21 = vmul.f32 %v735_v0, %v232_v8  ;;  %v371_v22 = vadd.f32 %v745_v1, %v300_v15  ;;  %v372_v23 = vadd.f32 %v745_v1, %v301_v16  ;;  %v247_v5 = vld [vmem:[%s740_s21 + $0x128] sm:$0xff]  ;;  %v248_v10 = vld [vmem:[%s740_s21 + $0x130] sm:$0xff]  ;;  %v249_v15 = vld [vmem:[%s740_s21 + $0x138] sm:$0xff] }
  0x22   : > { %495 = vst [vmem:[%s768_s26 + $0x78] sm:$0xff] %v431_v14  ;;  %v373_v24 = vadd.f32 %v745_v1, %v302_v17  ;;  %v304_v25 = vmul.f32 %v735_v0, %v233_v13  ;;  %v432_v29 = vmax.f32 %v368_v18, 0.0  ;;  %v433_v30 = vmax.f32 %v369_v19, 0.0 }
  0x23   : > { %v434_v31 = vmax.f32 %v370_v20, 0.0  ;;  %v374_v32 = vadd.f32 %v745_v1, %v303_v21  ;;  %v435_v36 = vmax.f32 %v371_v22, 0.0  ;;  %v436_v37 = vmax.f32 %v372_v23, 0.0 }
  0x24   : > { %v437_v38 = vmax.f32 %v373_v24, 0.0  ;;  %v375_v39 = vadd.f32 %v745_v1, %v304_v25  ;;  %496 = vst [vmem:[%s768_s26 + $0x80] sm:$0xff] %v432_v29  ;;  %497 = vst [vmem:[%s768_s26 + $0x88] sm:$0xff] %v433_v30  ;;  %v305_v42 = vmul.f32 %v735_v0, %v234_v26  ;;  %v306_v43 = vmul.f32 %v735_v0, %v235_v27  ;;  %v251_v29 = vld [vmem:[%s740_s21 + $0x148] sm:$0xff]  ;;  %v252_v30 = vld [vmem:[%s740_s21 + $0x150] sm:$0xff] }
  0x25   : > { %498 = vst [vmem:[%s768_s26 + $0x90] sm:$0xff] %v434_v31  ;;  %v438_v41 = vmax.f32 %v374_v32, 0.0  ;;  %v307_v44 = vmul.f32 %v735_v0, %v236_v28  ;;  %499 = vst [vmem:[%s768_s26 + $0x98] sm:$0xff] %v435_v36  ;;  %v308_v47 = vmul.f32 %v735_v0, %v237_v33  ;;  %v309_v48 = vmul.f32 %v735_v0, %v238_v34  ;;  %v250_v28 = vld [vmem:[%s740_s21 + $0x140] sm:$0xff] }
  0x26   : > { %500 = vst [vmem:[%s768_s26 + $0xa0] sm:$0xff] %v436_v37  ;;  %501 = vst [vmem:[%s768_s26 + $0xa8] sm:$0xff] %v437_v38  ;;  %v439_v46 = vmax.f32 %v375_v39, 0.0  ;;  %v310_v49 = vmul.f32 %v735_v0, %v239_v35  ;;  %v376_v50 = vadd.f32 %v745_v1, %v305_v42  ;;  %v377_v51 = vadd.f32 %v745_v1, %v306_v43  ;;  %v253_v35 = vld [vmem:[%s740_s21 + $0x158] sm:$0xff]  ;;  %v254_v36 = vld [vmem:[%s740_s21 + $0x160] sm:$0xff] }
  0x27   : > { %502 = vst [vmem:[%s768_s26 + $0xb0] sm:$0xff] %v438_v41  ;;  %v378_v52 = vadd.f32 %v745_v1, %v307_v44  ;;  %v311_v53 = vmul.f32 %v735_v0, %v240_v40  ;;  %v379_v54 = vadd.f32 %v745_v1, %v308_v47  ;;  %v380_v55 = vadd.f32 %v745_v1, %v309_v48  ;;  %v255_v37 = vld [vmem:[%s740_s21 + $0x168] sm:$0xff]  ;;  %v256_v42 = vld [vmem:[%s740_s21 + $0x170] sm:$0xff]  ;;  %v257_v47 = vld [vmem:[%s740_s21 + $0x178] sm:$0xff] }
  0x28   : > { %503 = vst [vmem:[%s768_s26 + $0xb8] sm:$0xff] %v439_v46  ;;  %v381_v56 = vadd.f32 %v745_v1, %v310_v49  ;;  %v312_v57 = vmul.f32 %v735_v0, %v241_v45  ;;  %v440_v61 = vmax.f32 %v376_v50, 0.0  ;;  %v441_v62 = vmax.f32 %v377_v51, 0.0 }
  0x29   : > { %v442_v63 = vmax.f32 %v378_v52, 0.0  ;;  %v382_v2 = vadd.f32 %v745_v1, %v311_v53  ;;  %v443_v6 = vmax.f32 %v379_v54, 0.0  ;;  %v444_v7 = vmax.f32 %v380_v55, 0.0 }
  0x2a   : > { %v445_v8 = vmax.f32 %v381_v56, 0.0  ;;  %v383_v9 = vadd.f32 %v745_v1, %v312_v57  ;;  %504 = vst [vmem:[%s768_s26 + $0xc0] sm:$0xff] %v440_v61  ;;  %505 = vst [vmem:[%s768_s26 + $0xc8] sm:$0xff] %v441_v62  ;;  %v313_v12 = vmul.f32 %v735_v0, %v242_v58  ;;  %v314_v13 = vmul.f32 %v735_v0, %v243_v59  ;;  %v259_v61 = vld [vmem:[%s740_s21 + $0x188] sm:$0xff]  ;;  %v260_v62 = vld [vmem:[%s740_s21 + $0x190] sm:$0xff] }
  0x2b   : > { %506 = vst [vmem:[%s768_s26 + $0xd0] sm:$0xff] %v442_v63  ;;  %v446_v11 = vmax.f32 %v382_v2, 0.0  ;;  %v315_v14 = vmul.f32 %v735_v0, %v244_v60  ;;  %507 = vst [vmem:[%s768_s26 + $0xd8] sm:$0xff] %v443_v6  ;;  %v316_v17 = vmul.f32 %v735_v0, %v245_v3  ;;  %v317_v18 = vmul.f32 %v735_v0, %v246_v4  ;;  %v258_v60 = vld [vmem:[%s740_s21 + $0x180] sm:$0xff] }
  0x2c   : > { %508 = vst [vmem:[%s768_s26 + $0xe0] sm:$0xff] %v444_v7  ;;  %509 = vst [vmem:[%s768_s26 + $0xe8] sm:$0xff] %v445_v8  ;;  %v447_v16 = vmax.f32 %v383_v9, 0.0  ;;  %v318_v19 = vmul.f32 %v735_v0, %v247_v5  ;;  %v384_v20 = vadd.f32 %v745_v1, %v313_v12  ;;  %v385_v21 = vadd.f32 %v745_v1, %v314_v13  ;;  %v261_v5 = vld [vmem:[%s740_s21 + $0x198] sm:$0xff]  ;;  %v262_v6 = vld [vmem:[%s740_s21 + $0x1a0] sm:$0xff] }
  0x2d   : > { %510 = vst [vmem:[%s768_s26 + $0xf0] sm:$0xff] %v446_v11  ;;  %v386_v22 = vadd.f32 %v745_v1, %v315_v14  ;;  %v319_v23 = vmul.f32 %v735_v0, %v248_v10  ;;  %v387_v24 = vadd.f32 %v745_v1, %v316_v17  ;;  %v388_v25 = vadd.f32 %v745_v1, %v317_v18  ;;  %v263_v7 = vld [vmem:[%s740_s21 + $0x1a8] sm:$0xff]  ;;  %v264_v12 = vld [vmem:[%s740_s21 + $0x1b0] sm:$0xff]  ;;  %v265_v17 = vld [vmem:[%s740_s21 + $0x1b8] sm:$0xff] }
  0x2e   : > { %511 = vst [vmem:[%s768_s26 + $0xf8] sm:$0xff] %v447_v16  ;;  %v389_v26 = vadd.f32 %v745_v1, %v318_v19  ;;  %v320_v27 = vmul.f32 %v735_v0, %v249_v15  ;;  %v448_v31 = vmax.f32 %v384_v20, 0.0  ;;  %v449_v32 = vmax.f32 %v385_v21, 0.0 }
  0x2f   : > { %v450_v33 = vmax.f32 %v386_v22, 0.0  ;;  %v390_v34 = vadd.f32 %v745_v1, %v319_v23  ;;  %v451_v38 = vmax.f32 %v387_v24, 0.0  ;;  %v452_v39 = vmax.f32 %v388_v25, 0.0 }
  0x30   : > { %v453_v40 = vmax.f32 %v389_v26, 0.0  ;;  %v391_v41 = vadd.f32 %v745_v1, %v320_v27  ;;  %512 = vst [vmem:[%s768_s26 + $0x100] sm:$0xff] %v448_v31  ;;  %513 = vst [vmem:[%s768_s26 + $0x108] sm:$0xff] %v449_v32  ;;  %v321_v44 = vmul.f32 %v735_v0, %v250_v28  ;;  %v322_v45 = vmul.f32 %v735_v0, %v251_v29  ;;  %v267_v31 = vld [vmem:[%s740_s21 + $0x1c8] sm:$0xff]  ;;  %v268_v32 = vld [vmem:[%s740_s21 + $0x1d0] sm:$0xff] }
  0x31   : > { %514 = vst [vmem:[%s768_s26 + $0x110] sm:$0xff] %v450_v33  ;;  %v454_v43 = vmax.f32 %v390_v34, 0.0  ;;  %v323_v46 = vmul.f32 %v735_v0, %v252_v30  ;;  %515 = vst [vmem:[%s768_s26 + $0x118] sm:$0xff] %v451_v38  ;;  %v324_v49 = vmul.f32 %v735_v0, %v253_v35  ;;  %v325_v50 = vmul.f32 %v735_v0, %v254_v36  ;;  %v266_v30 = vld [vmem:[%s740_s21 + $0x1c0] sm:$0xff] }
  0x32   : > { %516 = vst [vmem:[%s768_s26 + $0x120] sm:$0xff] %v452_v39  ;;  %517 = vst [vmem:[%s768_s26 + $0x128] sm:$0xff] %v453_v40  ;;  %v455_v48 = vmax.f32 %v391_v41, 0.0  ;;  %v326_v51 = vmul.f32 %v735_v0, %v255_v37  ;;  %v392_v52 = vadd.f32 %v745_v1, %v321_v44  ;;  %v393_v53 = vadd.f32 %v745_v1, %v322_v45  ;;  %v269_v37 = vld [vmem:[%s740_s21 + $0x1d8] sm:$0xff]  ;;  %v270_v38 = vld [vmem:[%s740_s21 + $0x1e0] sm:$0xff] }
  0x33   : > { %518 = vst [vmem:[%s768_s26 + $0x130] sm:$0xff] %v454_v43  ;;  %v394_v54 = vadd.f32 %v745_v1, %v323_v46  ;;  %v327_v55 = vmul.f32 %v735_v0, %v256_v42  ;;  %v395_v56 = vadd.f32 %v745_v1, %v324_v49  ;;  %v396_v57 = vadd.f32 %v745_v1, %v325_v50  ;;  %v271_v39 = vld [vmem:[%s740_s21 + $0x1e8] sm:$0xff]  ;;  %v272_v44 = vld [vmem:[%s740_s21 + $0x1f0] sm:$0xff]  ;;  %v273_v49 = vld [vmem:[%s740_s21 + $0x1f8] sm:$0xff] }
  0x34   : > { %519 = vst [vmem:[%s768_s26 + $0x138] sm:$0xff] %v455_v48  ;;  %v397_v58 = vadd.f32 %v745_v1, %v326_v51  ;;  %v328_v59 = vmul.f32 %v735_v0, %v257_v47  ;;  %v456_v63 = vmax.f32 %v392_v52, 0.0  ;;  %v457_v2 = vmax.f32 %v393_v53, 0.0 }
  0x35   : > { %v458_v3 = vmax.f32 %v394_v54, 0.0  ;;  %v398_v4 = vadd.f32 %v745_v1, %v327_v55  ;;  %v459_v8 = vmax.f32 %v395_v56, 0.0  ;;  %v460_v9 = vmax.f32 %v396_v57, 0.0 }
  0x36   : > { %v461_v10 = vmax.f32 %v397_v58, 0.0  ;;  %v399_v11 = vadd.f32 %v745_v1, %v328_v59  ;;  %520 = vst [vmem:[%s768_s26 + $0x140] sm:$0xff] %v456_v63  ;;  %521 = vst [vmem:[%s768_s26 + $0x148] sm:$0xff] %v457_v2  ;;  %v329_v14 = vmul.f32 %v735_v0, %v258_v60  ;;  %v330_v15 = vmul.f32 %v735_v0, %v259_v61 }
  0x37   : > { %522 = vst [vmem:[%s768_s26 + $0x150] sm:$0xff] %v458_v3  ;;  %v462_v13 = vmax.f32 %v398_v4, 0.0  ;;  %v331_v16 = vmul.f32 %v735_v0, %v260_v62  ;;  %523 = vst [vmem:[%s768_s26 + $0x158] sm:$0xff] %v459_v8  ;;  %v332_v19 = vmul.f32 %v735_v0, %v261_v5  ;;  %v333_v20 = vmul.f32 %v735_v0, %v262_v6 }
  0x38   : > { %524 = vst [vmem:[%s768_s26 + $0x160] sm:$0xff] %v460_v9  ;;  %525 = vst [vmem:[%s768_s26 + $0x168] sm:$0xff] %v461_v10  ;;  %v463_v18 = vmax.f32 %v399_v11, 0.0  ;;  %v334_v21 = vmul.f32 %v735_v0, %v263_v7  ;;  %v400_v22 = vadd.f32 %v745_v1, %v329_v14  ;;  %v401_v23 = vadd.f32 %v745_v1, %v330_v15 }
  0x39   : > { %526 = vst [vmem:[%s768_s26 + $0x170] sm:$0xff] %v462_v13  ;;  %v402_v24 = vadd.f32 %v745_v1, %v331_v16  ;;  %v335_v25 = vmul.f32 %v735_v0, %v264_v12  ;;  %v403_v26 = vadd.f32 %v745_v1, %v332_v19  ;;  %v404_v27 = vadd.f32 %v745_v1, %v333_v20 }
  0x3a   : > { %527 = vst [vmem:[%s768_s26 + $0x178] sm:$0xff] %v463_v18  ;;  %v405_v28 = vadd.f32 %v745_v1, %v334_v21  ;;  %v336_v29 = vmul.f32 %v735_v0, %v265_v17  ;;  %v464_v33 = vmax.f32 %v400_v22, 0.0  ;;  %v465_v34 = vmax.f32 %v401_v23, 0.0 }
  0x3b   : > { %v466_v35 = vmax.f32 %v402_v24, 0.0  ;;  %v406_v36 = vadd.f32 %v745_v1, %v335_v25  ;;  %v467_v40 = vmax.f32 %v403_v26, 0.0  ;;  %v468_v41 = vmax.f32 %v404_v27, 0.0 }
  0x3c   : > { %v469_v42 = vmax.f32 %v405_v28, 0.0  ;;  %v407_v43 = vadd.f32 %v745_v1, %v336_v29  ;;  %528 = vst [vmem:[%s768_s26 + $0x180] sm:$0xff] %v464_v33  ;;  %529 = vst [vmem:[%s768_s26 + $0x188] sm:$0xff] %v465_v34  ;;  %v337_v46 = vmul.f32 %v735_v0, %v266_v30  ;;  %v338_v47 = vmul.f32 %v735_v0, %v267_v31 }
  0x3d   : > { %530 = vst [vmem:[%s768_s26 + $0x190] sm:$0xff] %v466_v35  ;;  %v470_v45 = vmax.f32 %v406_v36, 0.0  ;;  %v339_v48 = vmul.f32 %v735_v0, %v268_v32  ;;  %531 = vst [vmem:[%s768_s26 + $0x198] sm:$0xff] %v467_v40  ;;  %v340_v51 = vmul.f32 %v735_v0, %v269_v37  ;;  %v341_v52 = vmul.f32 %v735_v0, %v270_v38 }
  0x3e   : > { %532 = vst [vmem:[%s768_s26 + $0x1a0] sm:$0xff] %v468_v41  ;;  %533 = vst [vmem:[%s768_s26 + $0x1a8] sm:$0xff] %v469_v42  ;;  %v471_v50 = vmax.f32 %v407_v43, 0.0  ;;  %v342_v53 = vmul.f32 %v735_v0, %v271_v39  ;;  %v408_v54 = vadd.f32 %v745_v1, %v337_v46  ;;  %v409_v55 = vadd.f32 %v745_v1, %v338_v47 }
  0x3f   : > { %534 = vst [vmem:[%s768_s26 + $0x1b0] sm:$0xff] %v470_v45  ;;  %v410_v56 = vadd.f32 %v745_v1, %v339_v48  ;;  %v343_v57 = vmul.f32 %v735_v0, %v272_v44  ;;  %v411_v58 = vadd.f32 %v745_v1, %v340_v51  ;;  %v412_v59 = vadd.f32 %v745_v1, %v341_v52 }
  0x40   : > { %535 = vst [vmem:[%s768_s26 + $0x1b8] sm:$0xff] %v471_v50  ;;  %v413_v60 = vadd.f32 %v745_v1, %v342_v53  ;;  %v344_v61 = vmul.f32 %v735_v0, %v273_v49  ;;  %v472_v62 = vmax.f32 %v408_v54, 0.0  ;;  %v473_v63 = vmax.f32 %v409_v55, 0.0 }
  0x41   : > { %v474_v2 = vmax.f32 %v410_v56, 0.0  ;;  %v414_v3 = vadd.f32 %v745_v1, %v343_v57  ;;  %v475_v4 = vmax.f32 %v411_v58, 0.0  ;;  %v476_v5 = vmax.f32 %v412_v59, 0.0 }
  0x42   : > { %v477_v6 = vmax.f32 %v413_v60, 0.0  ;;  %v415_v7 = vadd.f32 %v745_v1, %v344_v61  ;;  %536 = vst [vmem:[%s768_s26 + $0x1c0] sm:$0xff] %v472_v62  ;;  %537 = vst [vmem:[%s768_s26 + $0x1c8] sm:$0xff] %v473_v63 }
  0x43   : > { %538 = vst [vmem:[%s768_s26 + $0x1d0] sm:$0xff] %v474_v2  ;;  %v478_v8 = vmax.f32 %v414_v3, 0.0  ;;  %539 = vst [vmem:[%s768_s26 + $0x1d8] sm:$0xff] %v475_v4 }
  0x44   : > { %540 = vst [vmem:[%s768_s26 + $0x1e0] sm:$0xff] %v476_v5  ;;  %541 = vst [vmem:[%s768_s26 + $0x1e8] sm:$0xff] %v477_v6  ;;  %v479_v0 = vmax.f32 %v415_v7, 0.0 }
  0x45   : > { %542 = vst [vmem:[%s768_s26 + $0x1f0] sm:$0xff] %v478_v8 }
  0x46   : > { %543 = vst [vmem:[%s768_s26 + $0x1f8] sm:$0xff] %v479_v0 }
  0x47 PF: > { %s13_s14 = sadd.s32 1, %s692_s14   ;;  %s1021_s12 = smov %s688_s13 }
  0x48   : > { %p10_p5 = scmp.ge.s32.totalorder %s13_s14, 6   ;;  %s1022_s13 = smov %s1024_s15 }
  0x4a   :  { %12 = sbr.rel (!%p10_p5) target bundleno = 2 (0x2), region = 62 }

// kernel: _lambda_.17
= control target key start
LH: loop header
LB: loop body
LE: loop exit
PB: predicated region body
PF: predicated region fallthrough
CT: control target
= control target key end

     0   :  { %s1566_s9 = smov 0   ;;  %s1568_s10 = smov 0   ;;  %s1823_s0 = inlined_call_operand.vmem [shape: f32[4,2048,32], index: 0, kind: input, shape index: {}]   ;;  %s1824_s1 = inlined_call_operand.vmem [shape: f32[4,32,128], index: 1, kind: input, shape index: {}]   ;;  %s1825_s2 = inlined_call_operand.vmem [shape: f32[4,2048,128], index: 2, kind: output, shape index: {}]  }
   0x1   :  { %s1570_s11 = smov 0   ;;  %s1572_s12 = smov 0  }
   0x2   :  { %s1574_s13 = smov 0  }
   0x3 LB: > { %s21_s14 = sadd.s32 1, %s1541_s11  ;;  %s24_s15 = sadd.s32 1, %s1545_s12  ;;  %s1549_s13 = sphi %s1574_s13, %s12_s13   ;;  %s1545_s12 = sphi %s1572_s12, %s1829_s12   ;;  %s1541_s11 = sphi %s1570_s11, %s1828_s11   ;;  %s1537_s10 = sphi %s1568_s10, %s1827_s10   ;;  %s1533_s9 = sphi %s1566_s9, %s1826_s9  }
   0x4   : > { %p22_p0 = scmp.ge.s32.totalorder %s21_s14, 4  ;;  %p1083_p1 = scmp.ge.s32.totalorder %s1549_s13, 1 }
   0x5   : > { %p143_p2 = scmp.lt.s32.totalorder %s1549_s13, 17 }
   0x6   : > { %s1831_s14 = smov (%p22_p0, %s21_s14), 0  ;;  %s1833_s15 = smov (!%p22_p0, %s24_s15), %s1545_s12 }
   0x7   : > { %p144_p3 = pnand %p1083_p1, %p143_p2  ;;  %p26_p4 = scmp.ge.s32.totalorder %s1833_s15, 4 }
   0x8   : > { %s1084_s16 = sshll.u32 (!%p144_p3), %s1533_s9, 6  ;;  %p179_p5 = scmp.lt.s32.totalorder (!%p144_p3), %s1537_s10, 3  ;;  %vm271_vm0 = vcmask (!%p144_p3), 261120  }
   0x9   : > { %s1835_s15 = smov (%p26_p4, %s1833_s15), 0  ;;  %147 = sbr.rel (%p144_p3) target bundleno = 318 (0x13e), region = 28 }
   0xa   : > { %p181_p6 = scmp.lt.s32.totalorder (!%p144_p3), %s1084_s16, 255 }
  0x10   : > { %s1837_s10 = smov (!%p179_p5, %s1537_s10), 3  ;;  %s1839_s16 = smov (!%p181_p6, %s1084_s16), 255 }
  0x11   : > { %s1085_s17 = sshll.u32 %s1837_s10, 8  ;;  %s1158_s18 = sshll.u32 %s1837_s10, 5 }
  0x12   : > { %s1596_s19 = sadd.s32 %s1085_s17, %s1839_s16  ;;  %s192_s22 = scalar_lea.vmem %s1824_s1, %s1158_s18 }
  0x13   : > { %s1086_s23 = sshll.u32 %s1596_s19, 3  ;;  %v267_v0 = vld [vmem:[%s192_s22] sm:$0xff]  ;;  %v268_v1 = vld [vmem:[%s192_s22 + $0x8] sm:$0xff]  ;;  %v269_v2 = vld [vmem:[%s192_s22 + $0x10] sm:$0xff] }
  0x14   : > { %s1607_s26 = scalar_lea.vmem %s1823_s0, %s1086_s23  ;;  %v1331_v3 = vpack.c.bf16 %v268_v1, %v267_v0  ;;  %v270_v4 = vld [vmem:[%s192_s22 + $0x18] sm:$0xff]  ;;  %s1742_s29 = scalar_lea.vmem %s1825_s2, %s1086_s23 }
  0x15   : > { %v1335_v5 = vpack.c.bf16 %v270_v4, %v269_v2  ;;  %v203_v6 = vld [vmem:[%s1607_s26] sm:$0xff]  ;;  %v204_v8 = vld [vmem:[%s1607_s26 + $0x8] sm:$0xff]  ;;  %v205_v10 = vld [vmem:[%s1607_s26 + $0x10] sm:$0xff] }
  0x16   : > { %1332 = vmatprep.subr.bf16.mxu0 %v1331_v3  ;;  %1339 = vmatprep.subr.bf16.mxu1 %v1331_v3  ;;  %v235_v7 = vld [vmem:[%s1607_s26 + $0x100] sm:$0xff]  ;;  %v236_v9 = vld [vmem:[%s1607_s26 + $0x108] sm:$0xff]  ;;  %v237_v11 = vld [vmem:[%s1607_s26 + $0x110] sm:$0xff] }
  0x17   : > { %1334 = vmatpush3.bf16.msra.mxu0 %v1331_v3  ;;  %1341 = vmatpush3.bf16.msra.mxu1 %v1331_v3  ;;  %v206_v12 = vld [vmem:[%s1607_s26 + $0x18] sm:$0xff]  ;;  %v207_v14 = vld [vmem:[%s1607_s26 + $0x20] sm:$0xff]  ;;  %v208_v16 = vld [vmem:[%s1607_s26 + $0x28] sm:$0xff] }
  0x18   : > { %1336 = vmatprep.subr.bf16.mxu0 %v1335_v5  ;;  %1340 = vmatprep.subr.bf16.mxu1 %v1335_v5  ;;  %v238_v13 = vld [vmem:[%s1607_s26 + $0x118] sm:$0xff]  ;;  %v239_v15 = vld [vmem:[%s1607_s26 + $0x120] sm:$0xff]  ;;  %v240_v17 = vld [vmem:[%s1607_s26 + $0x128] sm:$0xff] }
  0x19   : > { %1235 = vmatprep.mubr.msk.f32.mxu0 %vm271_vm0, %v203_v6  ;;  %1283 = vmatprep.mubr.msk.f32.mxu1 %vm271_vm0, %v235_v7  ;;  %v209_v18 = vld [vmem:[%s1607_s26 + $0x30] sm:$0xff]  ;;  %v210_v20 = vld [vmem:[%s1607_s26 + $0x38] sm:$0xff]  ;;  %v211_v22 = vld [vmem:[%s1607_s26 + $0x40] sm:$0xff] }
  0x1a   : > { %v241_v19 = vld [vmem:[%s1607_s26 + $0x130] sm:$0xff]  ;;  %v242_v21 = vld [vmem:[%s1607_s26 + $0x138] sm:$0xff]  ;;  %v243_v23 = vld [vmem:[%s1607_s26 + $0x140] sm:$0xff] }
  0x1b   : > { %1338 = vmatpush3.bf16.msra.mxu0 %v1335_v5  ;;  %1342 = vmatpush3.bf16.msra.mxu1 %v1335_v5  ;;  %v212_v24 = vld [vmem:[%s1607_s26 + $0x48] sm:$0xff]  ;;  %v213_v26 = vld [vmem:[%s1607_s26 + $0x50] sm:$0xff]  ;;  %v214_v28 = vld [vmem:[%s1607_s26 + $0x58] sm:$0xff] }
  0x1c   : > { %v244_v25 = vld [vmem:[%s1607_s26 + $0x148] sm:$0xff]  ;;  %v245_v27 = vld [vmem:[%s1607_s26 + $0x150] sm:$0xff]  ;;  %v246_v29 = vld [vmem:[%s1607_s26 + $0x158] sm:$0xff] }
  0x1d   : > { %v215_v30 = vld [vmem:[%s1607_s26 + $0x60] sm:$0xff]  ;;  %v216_v32 = vld [vmem:[%s1607_s26 + $0x68] sm:$0xff]  ;;  %v217_v34 = vld [vmem:[%s1607_s26 + $0x70] sm:$0xff] }
  0x1e   : > { %1236 = vmatmul.mubr.msk.f32.vlgmr.msra.gmra.mrb[0].mxu0 %vm271_vm0, %v204_v8  ;;  %1284 = vmatmul.mubr.msk.f32.vlgmr.msra.gmra.mrb[0].mxu1 %vm271_vm0, %v236_v9  ;;  %v247_v31 = vld [vmem:[%s1607_s26 + $0x160] sm:$0xff]  ;;  %v248_v33 = vld [vmem:[%s1607_s26 + $0x168] sm:$0xff]  ;;  %v249_v35 = vld [vmem:[%s1607_s26 + $0x170] sm:$0xff] }
  0x1f   : > { %1238 = vmatprep.mubr.msk.f32.mxu0 %vm271_vm0, %v205_v10  ;;  %1286 = vmatprep.mubr.msk.f32.mxu1 %vm271_vm0, %v237_v11  ;;  %v218_v36 = vld [vmem:[%s1607_s26 + $0x78] sm:$0xff]  ;;  %v219_v38 = vld [vmem:[%s1607_s26 + $0x80] sm:$0xff]  ;;  %v220_v40 = vld [vmem:[%s1607_s26 + $0x88] sm:$0xff] }
  0x20   : > { %v250_v37 = vld [vmem:[%s1607_s26 + $0x178] sm:$0xff]  ;;  %v251_v39 = vld [vmem:[%s1607_s26 + $0x180] sm:$0xff]  ;;  %v252_v41 = vld [vmem:[%s1607_s26 + $0x188] sm:$0xff] }
  0x21   : > { %v221_v42 = vld [vmem:[%s1607_s26 + $0x90] sm:$0xff]  ;;  %v222_v44 = vld [vmem:[%s1607_s26 + $0x98] sm:$0xff]  ;;  %v223_v46 = vld [vmem:[%s1607_s26 + $0xa0] sm:$0xff] }
  0x22   : > { %1239 = vmatmul.mubr.msk.f32.gmra.mrb[2].mxu0 %vm271_vm0, %v206_v12  ;;  %1287 = vmatmul.mubr.msk.f32.gmra.mrb[2].mxu1 %vm271_vm0, %v238_v13  ;;  %v253_v43 = vld [vmem:[%s1607_s26 + $0x190] sm:$0xff]  ;;  %v254_v45 = vld [vmem:[%s1607_s26 + $0x198] sm:$0xff]  ;;  %v255_v47 = vld [vmem:[%s1607_s26 + $0x1a0] sm:$0xff] }
  0x23   : > { %1241 = vmatprep.mubr.msk.f32.mxu0 %vm271_vm0, %v207_v14  ;;  %1289 = vmatprep.mubr.msk.f32.mxu1 %vm271_vm0, %v239_v15  ;;  %v224_v48 = vld [vmem:[%s1607_s26 + $0xa8] sm:$0xff]  ;;  %v225_v50 = vld [vmem:[%s1607_s26 + $0xb0] sm:$0xff]  ;;  %v226_v52 = vld [vmem:[%s1607_s26 + $0xb8] sm:$0xff] }
  0x24   : > { %v256_v49 = vld [vmem:[%s1607_s26 + $0x1a8] sm:$0xff]  ;;  %v257_v51 = vld [vmem:[%s1607_s26 + $0x1b0] sm:$0xff]  ;;  %v258_v53 = vld [vmem:[%s1607_s26 + $0x1b8] sm:$0xff] }
  0x25   : > { %v227_v54 = vld [vmem:[%s1607_s26 + $0xc0] sm:$0xff]  ;;  %v228_v56 = vld [vmem:[%s1607_s26 + $0xc8] sm:$0xff]  ;;  %v229_v58 = vld [vmem:[%s1607_s26 + $0xd0] sm:$0xff] }
  0x26   : > { %1242 = vmatmul.mubr.msk.f32.gmra.mrb[4].mxu0 %vm271_vm0, %v208_v16  ;;  %1290 = vmatmul.mubr.msk.f32.gmra.mrb[4].mxu1 %vm271_vm0, %v240_v17  ;;  %v259_v55 = vld [vmem:[%s1607_s26 + $0x1c0] sm:$0xff]  ;;  %v260_v57 = vld [vmem:[%s1607_s26 + $0x1c8] sm:$0xff]  ;;  %v261_v59 = vld [vmem:[%s1607_s26 + $0x1d0] sm:$0xff] }
  0x27   : > { %1244 = vmatprep.mubr.msk.f32.mxu0 %vm271_vm0, %v209_v18  ;;  %1292 = vmatprep.mubr.msk.f32.mxu1 %vm271_vm0, %v241_v19  ;;  %v230_v60 = vld [vmem:[%s1607_s26 + $0xd8] sm:$0xff]  ;;  %v231_v62 = vld [vmem:[%s1607_s26 + $0xe0] sm:$0xff]  ;;  %v232_v0 = vld [vmem:[%s1607_s26 + $0xe8] sm:$0xff] }
  0x28   : > { %v262_v61 = vld [vmem:[%s1607_s26 + $0x1d8] sm:$0xff]  ;;  %v263_v63 = vld [vmem:[%s1607_s26 + $0x1e0] sm:$0xff]  ;;  %v264_v1 = vld [vmem:[%s1607_s26 + $0x1e8] sm:$0xff] }
  0x29   : > { %v233_v2 = vld [vmem:[%s1607_s26 + $0xf0] sm:$0xff]  ;;  %v234_v4 = vld [vmem:[%s1607_s26 + $0xf8] sm:$0xff] }
  0x2a   : > { %1245 = vmatmul.mubr.msk.f32.gmra.mrb[6].mxu0 %vm271_vm0, %v210_v20  ;;  %1293 = vmatmul.mubr.msk.f32.gmra.mrb[6].mxu1 %vm271_vm0, %v242_v21  ;;  %v265_v3 = vld [vmem:[%s1607_s26 + $0x1f0] sm:$0xff]  ;;  %v266_v5 = vld [vmem:[%s1607_s26 + $0x1f8] sm:$0xff] }
  0x2b   : > { %1247 = vmatprep.mubr.msk.f32.mxu0 %vm271_vm0, %v211_v22  ;;  %1295 = vmatprep.mubr.msk.f32.mxu1 %vm271_vm0, %v243_v23 }
  0x2e   : > { %1248 = vmatmul.mubr.msk.f32.gmra.mrb[8].mxu0 %vm271_vm0, %v212_v24  ;;  %1296 = vmatmul.mubr.msk.f32.gmra.mrb[8].mxu1 %vm271_vm0, %v244_v25 }
  0x2f   : > { %1250 = vmatprep.mubr.msk.f32.mxu0 %vm271_vm0, %v213_v26  ;;  %1298 = vmatprep.mubr.msk.f32.mxu1 %vm271_vm0, %v245_v27 }
  0x32   : > { %1251 = vmatmul.mubr.msk.f32.gmra.mrb[10].mxu0 %vm271_vm0, %v214_v28  ;;  %1299 = vmatmul.mubr.msk.f32.gmra.mrb[10].mxu1 %vm271_vm0, %v246_v29 }
  0x33   : > { %1253 = vmatprep.mubr.msk.f32.mxu0 %vm271_vm0, %v215_v30  ;;  %1301 = vmatprep.mubr.msk.f32.mxu1 %vm271_vm0, %v247_v31 }
  0x36   : > { %1254 = vmatmul.mubr.msk.f32.gmra.mrb[12].mxu0 %vm271_vm0, %v216_v32  ;;  %1302 = vmatmul.mubr.msk.f32.gmra.mrb[12].mxu1 %vm271_vm0, %v248_v33 }
  0x37   : > { %1256 = vmatprep.mubr.msk.f32.mxu0 %vm271_vm0, %v217_v34  ;;  %1304 = vmatprep.mubr.msk.f32.mxu1 %vm271_vm0, %v249_v35 }
  0x3a   : > { %1257 = vmatmul.mubr.msk.f32.gmra.mrb[14].mxu0 %vm271_vm0, %v218_v36  ;;  %1305 = vmatmul.mubr.msk.f32.gmra.mrb[14].mxu1 %vm271_vm0, %v250_v37 }
  0x3b   : > { %1259 = vmatprep.mubr.msk.f32.mxu0 %vm271_vm0, %v219_v38  ;;  %1307 = vmatprep.mubr.msk.f32.mxu1 %vm271_vm0, %v251_v39 }
  0x3e   : > { %1260 = vmatmul.mubr.msk.f32.gmra.mrb[16].mxu0 %vm271_vm0, %v220_v40  ;;  %1308 = vmatmul.mubr.msk.f32.gmra.mrb[16].mxu1 %vm271_vm0, %v252_v41 }
  0x3f   : > { %1262 = vmatprep.mubr.msk.f32.mxu0 %vm271_vm0, %v221_v42  ;;  %1310 = vmatprep.mubr.msk.f32.mxu1 %vm271_vm0, %v253_v43 }
  0x42   : > { %1263 = vmatmul.mubr.msk.f32.gmra.mrb[18].mxu0 %vm271_vm0, %v222_v44  ;;  %1311 = vmatmul.mubr.msk.f32.gmra.mrb[18].mxu1 %vm271_vm0, %v254_v45 }
  0x43   : > { %1265 = vmatprep.mubr.msk.f32.mxu0 %vm271_vm0, %v223_v46  ;;  %1313 = vmatprep.mubr.msk.f32.mxu1 %vm271_vm0, %v255_v47 }
  0x46   : > { %1266 = vmatmul.mubr.msk.f32.gmra.mrb[20].mxu0 %vm271_vm0, %v224_v48  ;;  %1314 = vmatmul.mubr.msk.f32.gmra.mrb[20].mxu1 %vm271_vm0, %v256_v49 }
  0x47   : > { %1268 = vmatprep.mubr.msk.f32.mxu0 %vm271_vm0, %v225_v50  ;;  %1316 = vmatprep.mubr.msk.f32.mxu1 %vm271_vm0, %v257_v51 }
  0x4a   : > { %1269 = vmatmul.mubr.msk.f32.gmra.mrb[22].mxu0 %vm271_vm0, %v226_v52  ;;  %1317 = vmatmul.mubr.msk.f32.gmra.mrb[22].mxu1 %vm271_vm0, %v258_v53 }
  0x4b   : > { %1271 = vmatprep.mubr.msk.f32.mxu0 %vm271_vm0, %v227_v54  ;;  %1319 = vmatprep.mubr.msk.f32.mxu1 %vm271_vm0, %v259_v55 }
  0x4e   : > { %1272 = vmatmul.mubr.msk.f32.gmra.mrb[24].mxu0 %vm271_vm0, %v228_v56  ;;  %1320 = vmatmul.mubr.msk.f32.gmra.mrb[24].mxu1 %vm271_vm0, %v260_v57 }
  0x4f   : > { %1274 = vmatprep.mubr.msk.f32.mxu0 %vm271_vm0, %v229_v58  ;;  %1322 = vmatprep.mubr.msk.f32.mxu1 %vm271_vm0, %v261_v59 }
  0x52   : > { %1275 = vmatmul.mubr.msk.f32.gmra.mrb[26].mxu0 %vm271_vm0, %v230_v60  ;;  %1323 = vmatmul.mubr.msk.f32.gmra.mrb[26].mxu1 %vm271_vm0, %v262_v61 }
  0x53   : > { %1277 = vmatprep.mubr.msk.f32.mxu0 %vm271_vm0, %v231_v62  ;;  %1325 = vmatprep.mubr.msk.f32.mxu1 %vm271_vm0, %v263_v63 }
  0x56   : > { %1278 = vmatmul.mubr.msk.f32.gmra.mrb[28].mxu0 %vm271_vm0, %v232_v0  ;;  %1326 = vmatmul.mubr.msk.f32.gmra.mrb[28].mxu1 %vm271_vm0, %v264_v1 }
  0x57   : > { %1280 = vmatprep.mubr.msk.f32.mxu0 %vm271_vm0, %v233_v2  ;;  %1328 = vmatprep.mubr.msk.f32.mxu1 %vm271_vm0, %v265_v3 }
  0x5a   : > { %1281 = vmatmul.mubr.msk.f32.gmra.mrb[30].mxu0 %vm271_vm0, %v234_v4  ;;  %1329 = vmatmul.mubr.msk.f32.gmra.mrb[30].mxu1 %vm271_vm0, %v266_v5 }
  0xf1   : > { %v1237_v6 = vpop.f32.mrb[0].mxu0  ;;  %v1285_v7 = vpop.f32.mrb[0].mxu1 }
  0xf2   : > { %1383 = vtanh.f32 %v1237_v6  ;;  %v530_v8 = vpop.f32.mrb[1].mxu0  ;;  %v690_v9 = vpop.f32.mrb[1].mxu1 }
  0xf3   : > { %1385 = vtanh.f32 %v1285_v7 }
  0xf4   : > { %1387 = vtanh.f32 %v530_v8 }
  0xf5   : > { %1389 = vtanh.f32 %v690_v9  ;;  %v1240_v10 = vpop.f32.mrb[2].mxu0  ;;  %v1288_v11 = vpop.f32.mrb[2].mxu1 }
  0xf6   : > { %1391 = vtanh.f32 %v1240_v10  ;;  %v540_v12 = vpop.f32.mrb[3].mxu0  ;;  %v700_v13 = vpop.f32.mrb[3].mxu1 }
  0xf7   : > { %1393 = vtanh.f32 %v1288_v11 }
  0xf8   : > { %1395 = vtanh.f32 %v540_v12 }
  0xf9   : > { %1397 = vtanh.f32 %v700_v13  ;;  %v1243_v14 = vpop.f32.mrb[4].mxu0  ;;  %v1291_v15 = vpop.f32.mrb[4].mxu1 }
  0xfa   : > { %1399 = vtanh.f32 %v1243_v14  ;;  %v550_v16 = vpop.f32.mrb[5].mxu0  ;;  %v710_v17 = vpop.f32.mrb[5].mxu1 }
  0xfb   : > { %1401 = vtanh.f32 %v1291_v15 }
  0xfc   : > { %v1384_v18 = vpop.eup %1383  ;;  %1403 = vtanh.f32 %v550_v16 }
  0xfd   : > { %v1386_v19 = vpop.eup %1385  ;;  %914 = vst [vmem:[%s1742_s29 + $0x8] sm:$0xff] %v1384_v18  ;;  %1405 = vtanh.f32 %v710_v17  ;;  %v1246_v20 = vpop.f32.mrb[6].mxu0 }
  0xfe   : > { %v1294_v21 = vpop.f32.mrb[6].mxu1  ;;  %v1388_v22 = vpop.eup %1387  ;;  %946 = vst [vmem:[%s1742_s29 + $0x108] sm:$0xff] %v1386_v19  ;;  %1407 = vtanh.f32 %v1246_v20 }
  0xff   : > { %v560_v23 = vpop.f32.mrb[7].mxu0  ;;  %v720_v24 = vpop.f32.mrb[7].mxu1  ;;  %913 = vst [vmem:[%s1742_s29] sm:$0xff] %v1388_v22  ;;  %1409 = vtanh.f32 %v1294_v21 }
 0x100   : > { %v1390_v25 = vpop.eup %1389  ;;  %1411 = vtanh.f32 %v560_v23 }
 0x101   : > { %v1392_v26 = vpop.eup %1391  ;;  %945 = vst [vmem:[%s1742_s29 + $0x100] sm:$0xff] %v1390_v25  ;;  %1413 = vtanh.f32 %v720_v24  ;;  %v1249_v28 = vpop.f32.mrb[8].mxu0 }
 0x102   : > { %v1394_v27 = vpop.eup %1393  ;;  %916 = vst [vmem:[%s1742_s29 + $0x18] sm:$0xff] %v1392_v26  ;;  %v1297_v29 = vpop.f32.mrb[8].mxu1  ;;  %1415 = vtanh.f32 %v1249_v28 }
 0x103   : > { %v1396_v30 = vpop.eup %1395  ;;  %948 = vst [vmem:[%s1742_s29 + $0x118] sm:$0xff] %v1394_v27  ;;  %v570_v31 = vpop.f32.mrb[9].mxu0  ;;  %1417 = vtanh.f32 %v1297_v29 }
 0x104   : > { %v730_v32 = vpop.f32.mrb[9].mxu1  ;;  %v1398_v33 = vpop.eup %1397  ;;  %915 = vst [vmem:[%s1742_s29 + $0x10] sm:$0xff] %v1396_v30  ;;  %1419 = vtanh.f32 %v570_v31 }
 0x105   : > { %v1400_v34 = vpop.eup %1399  ;;  %947 = vst [vmem:[%s1742_s29 + $0x110] sm:$0xff] %v1398_v33  ;;  %1421 = vtanh.f32 %v730_v32  ;;  %v1252_v36 = vpop.f32.mrb[10].mxu0 }
 0x106   : > { %v1402_v35 = vpop.eup %1401  ;;  %918 = vst [vmem:[%s1742_s29 + $0x28] sm:$0xff] %v1400_v34  ;;  %v1300_v37 = vpop.f32.mrb[10].mxu1  ;;  %1423 = vtanh.f32 %v1252_v36 }
 0x107   : > { %v1404_v38 = vpop.eup %1403  ;;  %950 = vst [vmem:[%s1742_s29 + $0x128] sm:$0xff] %v1402_v35  ;;  %v580_v39 = vpop.f32.mrb[11].mxu0  ;;  %1425 = vtanh.f32 %v1300_v37 }
 0x108   : > { %v740_v40 = vpop.f32.mrb[11].mxu1  ;;  %v1406_v41 = vpop.eup %1405  ;;  %917 = vst [vmem:[%s1742_s29 + $0x20] sm:$0xff] %v1404_v38  ;;  %1427 = vtanh.f32 %v580_v39 }
 0x109   : > { %v1408_v42 = vpop.eup %1407  ;;  %949 = vst [vmem:[%s1742_s29 + $0x120] sm:$0xff] %v1406_v41  ;;  %1429 = vtanh.f32 %v740_v40  ;;  %v1255_v44 = vpop.f32.mrb[12].mxu0 }
 0x10a   : > { %v1410_v43 = vpop.eup %1409  ;;  %920 = vst [vmem:[%s1742_s29 + $0x38] sm:$0xff] %v1408_v42  ;;  %v1303_v45 = vpop.f32.mrb[12].mxu1  ;;  %1431 = vtanh.f32 %v1255_v44 }
 0x10b   : > { %v1412_v46 = vpop.eup %1411  ;;  %952 = vst [vmem:[%s1742_s29 + $0x138] sm:$0xff] %v1410_v43  ;;  %v590_v47 = vpop.f32.mrb[13].mxu0  ;;  %1433 = vtanh.f32 %v1303_v45 }
 0x10c   : > { %v750_v48 = vpop.f32.mrb[13].mxu1  ;;  %v1414_v49 = vpop.eup %1413  ;;  %919 = vst [vmem:[%s1742_s29 + $0x30] sm:$0xff] %v1412_v46  ;;  %1435 = vtanh.f32 %v590_v47 }
 0x10d   : > { %v1416_v50 = vpop.eup %1415  ;;  %951 = vst [vmem:[%s1742_s29 + $0x130] sm:$0xff] %v1414_v49  ;;  %1437 = vtanh.f32 %v750_v48  ;;  %v1258_v52 = vpop.f32.mrb[14].mxu0 }
 0x10e   : > { %v1418_v51 = vpop.eup %1417  ;;  %922 = vst [vmem:[%s1742_s29 + $0x48] sm:$0xff] %v1416_v50  ;;  %v1306_v53 = vpop.f32.mrb[14].mxu1  ;;  %1439 = vtanh.f32 %v1258_v52 }
 0x10f   : > { %v1420_v54 = vpop.eup %1419  ;;  %954 = vst [vmem:[%s1742_s29 + $0x148] sm:$0xff] %v1418_v51  ;;  %v600_v55 = vpop.f32.mrb[15].mxu0  ;;  %1441 = vtanh.f32 %v1306_v53 }
 0x110   : > { %v760_v56 = vpop.f32.mrb[15].mxu1  ;;  %v1422_v57 = vpop.eup %1421  ;;  %921 = vst [vmem:[%s1742_s29 + $0x40] sm:$0xff] %v1420_v54  ;;  %1443 = vtanh.f32 %v600_v55 }
 0x111   : > { %v1424_v58 = vpop.eup %1423  ;;  %953 = vst [vmem:[%s1742_s29 + $0x140] sm:$0xff] %v1422_v57  ;;  %1445 = vtanh.f32 %v760_v56  ;;  %v1261_v60 = vpop.f32.mrb[16].mxu0 }
 0x112   : > { %v1426_v59 = vpop.eup %1425  ;;  %924 = vst [vmem:[%s1742_s29 + $0x58] sm:$0xff] %v1424_v58  ;;  %v1309_v61 = vpop.f32.mrb[16].mxu1  ;;  %1447 = vtanh.f32 %v1261_v60 }
 0x113   : > { %v1428_v62 = vpop.eup %1427  ;;  %956 = vst [vmem:[%s1742_s29 + $0x158] sm:$0xff] %v1426_v59  ;;  %v610_v63 = vpop.f32.mrb[17].mxu0  ;;  %1449 = vtanh.f32 %v1309_v61 }
 0x114   : > { %v770_v0 = vpop.f32.mrb[17].mxu1  ;;  %v1430_v1 = vpop.eup %1429  ;;  %923 = vst [vmem:[%s1742_s29 + $0x50] sm:$0xff] %v1428_v62  ;;  %1451 = vtanh.f32 %v610_v63 }
 0x115   : > { %v1432_v2 = vpop.eup %1431  ;;  %955 = vst [vmem:[%s1742_s29 + $0x150] sm:$0xff] %v1430_v1  ;;  %1453 = vtanh.f32 %v770_v0  ;;  %v1264_v4 = vpop.f32.mrb[18].mxu0 }
 0x116   : > { %v1434_v3 = vpop.eup %1433  ;;  %926 = vst [vmem:[%s1742_s29 + $0x68] sm:$0xff] %v1432_v2  ;;  %v1312_v5 = vpop.f32.mrb[18].mxu1  ;;  %1455 = vtanh.f32 %v1264_v4 }
 0x117   : > { %v1436_v6 = vpop.eup %1435  ;;  %958 = vst [vmem:[%s1742_s29 + $0x168] sm:$0xff] %v1434_v3  ;;  %v620_v7 = vpop.f32.mrb[19].mxu0  ;;  %1457 = vtanh.f32 %v1312_v5 }
 0x118   : > { %v780_v8 = vpop.f32.mrb[19].mxu1  ;;  %v1438_v9 = vpop.eup %1437  ;;  %925 = vst [vmem:[%s1742_s29 + $0x60] sm:$0xff] %v1436_v6  ;;  %1459 = vtanh.f32 %v620_v7 }
 0x119   : > { %v1440_v10 = vpop.eup %1439  ;;  %957 = vst [vmem:[%s1742_s29 + $0x160] sm:$0xff] %v1438_v9  ;;  %1461 = vtanh.f32 %v780_v8  ;;  %v1267_v12 = vpop.f32.mrb[20].mxu0 }
 0x11a   : > { %v1442_v11 = vpop.eup %1441  ;;  %928 = vst [vmem:[%s1742_s29 + $0x78] sm:$0xff] %v1440_v10  ;;  %v1315_v13 = vpop.f32.mrb[20].mxu1  ;;  %1463 = vtanh.f32 %v1267_v12 }
 0x11b   : > { %v1444_v14 = vpop.eup %1443  ;;  %960 = vst [vmem:[%s1742_s29 + $0x178] sm:$0xff] %v1442_v11  ;;  %v630_v15 = vpop.f32.mrb[21].mxu0  ;;  %1465 = vtanh.f32 %v1315_v13 }
 0x11c   : > { %v790_v16 = vpop.f32.mrb[21].mxu1  ;;  %v1446_v17 = vpop.eup %1445  ;;  %927 = vst [vmem:[%s1742_s29 + $0x70] sm:$0xff] %v1444_v14  ;;  %1467 = vtanh.f32 %v630_v15 }
 0x11d   : > { %v1448_v18 = vpop.eup %1447  ;;  %959 = vst [vmem:[%s1742_s29 + $0x170] sm:$0xff] %v1446_v17  ;;  %1469 = vtanh.f32 %v790_v16  ;;  %v1270_v20 = vpop.f32.mrb[22].mxu0 }
 0x11e   : > { %v1450_v19 = vpop.eup %1449  ;;  %930 = vst [vmem:[%s1742_s29 + $0x88] sm:$0xff] %v1448_v18  ;;  %v1318_v21 = vpop.f32.mrb[22].mxu1  ;;  %1471 = vtanh.f32 %v1270_v20 }
 0x11f   : > { %v1452_v22 = vpop.eup %1451  ;;  %962 = vst [vmem:[%s1742_s29 + $0x188] sm:$0xff] %v1450_v19  ;;  %v640_v23 = vpop.f32.mrb[23].mxu0  ;;  %1473 = vtanh.f32 %v1318_v21 }
 0x120   : > { %v800_v24 = vpop.f32.mrb[23].mxu1  ;;  %v1454_v25 = vpop.eup %1453  ;;  %929 = vst [vmem:[%s1742_s29 + $0x80] sm:$0xff] %v1452_v22  ;;  %1475 = vtanh.f32 %v640_v23 }
 0x121   : > { %v1456_v26 = vpop.eup %1455  ;;  %961 = vst [vmem:[%s1742_s29 + $0x180] sm:$0xff] %v1454_v25  ;;  %1477 = vtanh.f32 %v800_v24  ;;  %v1273_v28 = vpop.f32.mrb[24].mxu0 }
 0x122   : > { %v1458_v27 = vpop.eup %1457  ;;  %932 = vst [vmem:[%s1742_s29 + $0x98] sm:$0xff] %v1456_v26  ;;  %v1321_v29 = vpop.f32.mrb[24].mxu1  ;;  %1479 = vtanh.f32 %v1273_v28 }
 0x123   : > { %v1460_v30 = vpop.eup %1459  ;;  %964 = vst [vmem:[%s1742_s29 + $0x198] sm:$0xff] %v1458_v27  ;;  %v650_v31 = vpop.f32.mrb[25].mxu0  ;;  %1481 = vtanh.f32 %v1321_v29 }
 0x124   : > { %v810_v32 = vpop.f32.mrb[25].mxu1  ;;  %v1462_v33 = vpop.eup %1461  ;;  %931 = vst [vmem:[%s1742_s29 + $0x90] sm:$0xff] %v1460_v30  ;;  %1483 = vtanh.f32 %v650_v31 }
 0x125   : > { %v1464_v34 = vpop.eup %1463  ;;  %963 = vst [vmem:[%s1742_s29 + $0x190] sm:$0xff] %v1462_v33  ;;  %1485 = vtanh.f32 %v810_v32  ;;  %v1276_v36 = vpop.f32.mrb[26].mxu0 }
 0x126   : > { %v1466_v35 = vpop.eup %1465  ;;  %934 = vst [vmem:[%s1742_s29 + $0xa8] sm:$0xff] %v1464_v34  ;;  %v1324_v37 = vpop.f32.mrb[26].mxu1  ;;  %1487 = vtanh.f32 %v1276_v36 }
 0x127   : > { %v1468_v38 = vpop.eup %1467  ;;  %966 = vst [vmem:[%s1742_s29 + $0x1a8] sm:$0xff] %v1466_v35  ;;  %v660_v39 = vpop.f32.mrb[27].mxu0  ;;  %1489 = vtanh.f32 %v1324_v37 }
 0x128   : > { %v820_v40 = vpop.f32.mrb[27].mxu1  ;;  %v1470_v41 = vpop.eup %1469  ;;  %933 = vst [vmem:[%s1742_s29 + $0xa0] sm:$0xff] %v1468_v38  ;;  %1491 = vtanh.f32 %v660_v39 }
 0x129   : > { %v1472_v42 = vpop.eup %1471  ;;  %965 = vst [vmem:[%s1742_s29 + $0x1a0] sm:$0xff] %v1470_v41  ;;  %1493 = vtanh.f32 %v820_v40  ;;  %v1279_v44 = vpop.f32.mrb[28].mxu0 }
 0x12a   : > { %v1474_v43 = vpop.eup %1473  ;;  %936 = vst [vmem:[%s1742_s29 + $0xb8] sm:$0xff] %v1472_v42  ;;  %v1327_v45 = vpop.f32.mrb[28].mxu1  ;;  %1495 = vtanh.f32 %v1279_v44 }
 0x12b   : > { %v1476_v46 = vpop.eup %1475  ;;  %968 = vst [vmem:[%s1742_s29 + $0x1b8] sm:$0xff] %v1474_v43  ;;  %v670_v47 = vpop.f32.mrb[29].mxu0  ;;  %1497 = vtanh.f32 %v1327_v45 }
 0x12c   : > { %v830_v48 = vpop.f32.mrb[29].mxu1  ;;  %v1478_v49 = vpop.eup %1477  ;;  %935 = vst [vmem:[%s1742_s29 + $0xb0] sm:$0xff] %v1476_v46  ;;  %1499 = vtanh.f32 %v670_v47 }
 0x12d   : > { %v1480_v50 = vpop.eup %1479  ;;  %967 = vst [vmem:[%s1742_s29 + $0x1b0] sm:$0xff] %v1478_v49  ;;  %1501 = vtanh.f32 %v830_v48  ;;  %v1282_v52 = vpop.f32.mrb[30].mxu0 }
 0x12e   : > { %v1482_v51 = vpop.eup %1481  ;;  %938 = vst [vmem:[%s1742_s29 + $0xc8] sm:$0xff] %v1480_v50  ;;  %v1330_v53 = vpop.f32.mrb[30].mxu1  ;;  %1503 = vtanh.f32 %v1282_v52 }
 0x12f   : > { %v1484_v54 = vpop.eup %1483  ;;  %970 = vst [vmem:[%s1742_s29 + $0x1c8] sm:$0xff] %v1482_v51  ;;  %v680_v55 = vpop.f32.mrb[31].mxu0  ;;  %1505 = vtanh.f32 %v1330_v53 }
 0x130   : > { %v840_v56 = vpop.f32.mrb[31].mxu1  ;;  %v1486_v57 = vpop.eup %1485  ;;  %937 = vst [vmem:[%s1742_s29 + $0xc0] sm:$0xff] %v1484_v54  ;;  %1507 = vtanh.f32 %v680_v55 }
 0x131   : > { %v1488_v58 = vpop.eup %1487  ;;  %969 = vst [vmem:[%s1742_s29 + $0x1c0] sm:$0xff] %v1486_v57  ;;  %1509 = vtanh.f32 %v840_v56 }
 0x132   : > { %v1490_v59 = vpop.eup %1489  ;;  %940 = vst [vmem:[%s1742_s29 + $0xd8] sm:$0xff] %v1488_v58 }
 0x133   : > { %v1492_v60 = vpop.eup %1491  ;;  %972 = vst [vmem:[%s1742_s29 + $0x1d8] sm:$0xff] %v1490_v59 }
 0x134   : > { %v1494_v61 = vpop.eup %1493  ;;  %939 = vst [vmem:[%s1742_s29 + $0xd0] sm:$0xff] %v1492_v60 }
 0x135   : > { %v1496_v62 = vpop.eup %1495  ;;  %971 = vst [vmem:[%s1742_s29 + $0x1d0] sm:$0xff] %v1494_v61 }
 0x136   : > { %v1498_v63 = vpop.eup %1497  ;;  %942 = vst [vmem:[%s1742_s29 + $0xe8] sm:$0xff] %v1496_v62 }
 0x137   : > { %v1500_v0 = vpop.eup %1499  ;;  %974 = vst [vmem:[%s1742_s29 + $0x1e8] sm:$0xff] %v1498_v63 }
 0x138   : > { %v1502_v1 = vpop.eup %1501  ;;  %941 = vst [vmem:[%s1742_s29 + $0xe0] sm:$0xff] %v1500_v0 }
 0x139   : > { %v1504_v2 = vpop.eup %1503  ;;  %973 = vst [vmem:[%s1742_s29 + $0x1e0] sm:$0xff] %v1502_v1 }
 0x13a   : > { %v1506_v3 = vpop.eup %1505  ;;  %944 = vst [vmem:[%s1742_s29 + $0xf8] sm:$0xff] %v1504_v2 }
 0x13b   : > { %v1508_v4 = vpop.eup %1507  ;;  %976 = vst [vmem:[%s1742_s29 + $0x1f8] sm:$0xff] %v1506_v3 }
 0x13c   : > { %v1510_v5 = vpop.eup %1509  ;;  %943 = vst [vmem:[%s1742_s29 + $0xf0] sm:$0xff] %v1508_v4 }
 0x13d   : > { %975 = vst [vmem:[%s1742_s29 + $0x1f0] sm:$0xff] %v1510_v5 }
 0x13e PF: > { %s12_s13 = sadd.s32 1, %s1549_s13   ;;  %s1826_s9 = smov %s1541_s11 }
 0x13f   : > { %p9_p7 = scmp.ge.s32.totalorder %s12_s13, 18   ;;  %s1827_s10 = smov %s1545_s12 }
 0x140   : > { %s1828_s11 = smov %s1831_s14  ;;  %s1829_s12 = smov %s1835_s15 }
 0x141   :  { %11 = sbr.rel (!%p9_p7) target bundleno = 3 (0x3), region = 61 }

</bundles_post_ra>
